<compile_context>
chip_gen: v5e
topology: v5e:2x2
jax: 0.10.0
libtpu: 0.0.40
codegen_flags: <defaults>
</compile_context>

<pallas_src>
import jax
import jax.numpy as jnp
from jax import lax
from jax.experimental import pallas as pl
from jax.experimental.pallas import tpu as pltpu

# ----------------------------- model constants ------------------------------
EMB_DIM   = 100                  # forced by Linear(99,2)/Linear(49,2)
HID       = 2 * EMB_DIM          # 200 (GGNN in/out feats)
HID_P     = 256                  # padded hidden (MXU/lane aligned)
N_STEPS   = 6
N_ETYPES  = 4
CLASS_NUM = 2
VOCAB     = 64
TILE_N    = 128                  # head node tile (lanes)

# conv/pool pipeline lengths (Conv1d(1,1,3) -> MaxPool1d(3,2) -> Conv1d(1,1,1) -> MaxPool1d(2,2))
L_Z0 = 2 * HID                   # 400 = cat(local, feature)
L_Z1 = L_Z0 - 2                  # 398
L_Z2 = (L_Z1 - 3) // 2 + 1       # 198
L_Z3 = (L_Z2 - 2) // 2 + 1       # 99   -> Linear(99, 2)
L_Y0 = HID                       # 200
L_Y1 = L_Y0 - 2                  # 198
L_Y2 = (L_Y1 - 3) // 2 + 1       # 98
L_Y3 = (L_Y2 - 2) // 2 + 1       # 49   -> Linear(49, 2)


def _round_up(x, m):
    return (x + m - 1) // m * m


# ------------------------------ GGNN kernel ---------------------------------
def ggnn_kernel(h0_ref, adjT_ref, wmsg_ref, bmsg_ref, wgru_ref, bgru_ref, out_ref):
    # h0:   [N_P, HID_P] f32   node features ('tk'), zero padded
    # adjT: [E, N_P, N_P] bf16 adjT[e, v, u] = 1 iff edge u -> v of type e
    # wmsg: [HID_P, E*HID_P] bf16   per-etype W_e^T concatenated along lanes
    # bmsg: [1, E*HID_P] f32
    # wgru: [2*HID_P, 4*HID_P] bf16 fused GRU weights, [a|h] -> [r | z | n_i | n_h]
    # bgru: [1, 4*HID_P] f32
    def step(_, h):
        hb = h.astype(jnp.bfloat16)
        # fused per-etype message linear: one [N,256] x [256,1024] matmul
        msg = jnp.dot(hb, wmsg_ref[...], preferred_element_type=jnp.float32) + bmsg_ref[...]
        msgb = msg.astype(jnp.bfloat16)
        # message aggregation: a = sum_e adjT[e] @ msg_e
        a = jnp.dot(adjT_ref[0], msgb[:, 0:HID_P], preferred_element_type=jnp.float32)
        for e in range(1, N_ETYPES):
            a = a + jnp.dot(adjT_ref[e], msgb[:, e * HID_P:(e + 1) * HID_P],
                            preferred_element_type=jnp.float32)
        # fused GRUCell: one [N,512] x [512,1024] matmul, gate math in f32
        ah = jnp.concatenate([a.astype(jnp.bfloat16), hb], axis=1)
        g = jnp.dot(ah, wgru_ref[...], preferred_element_type=jnp.float32) + bgru_ref[...]
        r = jax.nn.sigmoid(g[:, 0:HID_P])
        z = jax.nn.sigmoid(g[:, HID_P:2 * HID_P])
        n = jnp.tanh(g[:, 2 * HID_P:3 * HID_P] + r * g[:, 3 * HID_P:4 * HID_P])
        return (1.0 - z) * n + z * h

    out_ref[...] = lax.fori_loop(0, N_STEPS, step, h0_ref[...])


def ggnn_forward(h0_p, adjT_p, wmsg, bmsg, wgru, bgru):
    # TODO(synk): for large graphs adjT ([E,N,N]) should be tiled over destination-node
    # blocks with a grid instead of being fully VMEM resident.
    n_p = h0_p.shape[0]
    return pl.pallas_call(
        ggnn_kernel,
        out_shape=jax.ShapeDtypeStruct((n_p, HID_P), jnp.float32),
        in_specs=[pl.BlockSpec(memory_space=pltpu.MemorySpace.VMEM)] * 6,
        out_specs=pl.BlockSpec(memory_space=pltpu.MemorySpace.VMEM),
        compiler_params=pltpu.CompilerParams(vmem_limit_bytes=48 * 1024 * 1024),
    )(h0_p, adjT_p, wmsg, bmsg, wgru, bgru)


# ------------------------------ head kernel ---------------------------------
def head_kernel(localT_ref, featT_ref, cp_ref, w1_ref, b1_ref, w2_ref, b2_ref,
                out_ref, g_ref, zc_ref, z2_ref, yc_ref, y2_ref):
    # Layout: length on sublanes, node tile (TILE_N) on lanes.
    # localT/featT : [HID, TILE_N]
    # cp (SMEM, (6,)): [conv1_w0, conv1_w1, conv1_w2, conv1_b, conv2_w, conv2_b]
    # w1: [2, 99], b1: [2, 1], w2: [2, 49], b2: [2, 1]
    w0, w1c, w2c, b1c = cp_ref[0], cp_ref[1], cp_ref[2], cp_ref[3]
    wc2, bc2 = cp_ref[4], cp_ref[5]

    # global_feature = cat([local, feature]) along the length (sublane) axis
    g_ref[pl.ds(0, HID), :] = localT_ref[...]
    g_ref[pl.ds(HID, HID), :] = featT_ref[...]

    # ---------------- z path (global feature) ----------------
    c = (w0 * g_ref[pl.ds(0, L_Z1), :] + w1c * g_ref[pl.ds(1, L_Z1), :]
         + w2c * g_ref[pl.ds(2, L_Z1), :] + b1c)                    # Conv1d(1,1,3)
    zc_ref[pl.ds(0, L_Z1), :] = jnp.maximum(c, 0.0)                 # ReLU
    p = jnp.maximum(jnp.maximum(zc_ref[pl.ds(0, L_Z2, stride=2), :],
                                zc_ref[pl.ds(1, L_Z2, stride=2), :]),
                    zc_ref[pl.ds(2, L_Z2, stride=2), :])            # MaxPool1d(3,2)
    z2_ref[pl.ds(0, L_Z2), :] = jnp.maximum(wc2 * p + bc2, 0.0)     # Conv1d(1,1,1)+ReLU
    zp = jnp.maximum(z2_ref[pl.ds(0, L_Z3, stride=2), :],
                     z2_ref[pl.ds(1, L_Z3, stride=2), :])           # MaxPool1d(2,2) -> [99, TN]
    z_lin = jnp.dot(w1_ref[...], zp, preferred_element_type=jnp.float32) + b1_ref[...]

    # ---------------- y path (local feature) -----------------
    c = (w0 * localT_ref[pl.ds(0, L_Y1), :] + w1c * localT_ref[pl.ds(1, L_Y1), :]
         + w2c * localT_ref[pl.ds(2, L_Y1), :] + b1c)
    yc_ref[pl.ds(0, L_Y1), :] = jnp.maximum(c, 0.0)
    p = jnp.maximum(jnp.maximum(yc_ref[pl.ds(0, L_Y2, stride=2), :],
                                yc_ref[pl.ds(1, L_Y2, stride=2), :]),
                    yc_ref[pl.ds(2, L_Y2, stride=2), :])
    y2_ref[pl.ds(0, L_Y2), :] = jnp.maximum(wc2 * p + bc2, 0.0)
    yp = jnp.maximum(y2_ref[pl.ds(0, L_Y3, stride=2), :],
                     y2_ref[pl.ds(1, L_Y3, stride=2), :])           # [49, TN]
    y_lin = jnp.dot(w2_ref[...], yp, preferred_element_type=jnp.float32) + b2_ref[...]

    out_ref[...] = z_lin * y_lin                                    # res = z_vec * y_vec


def head_forward(localT, featT, cparams, w1, b1, w2, b2):
    n_l = localT.shape[1]
    assert n_l % TILE_N == 0
    grid = (n_l // TILE_N,)
    return pl.pallas_call(
        head_kernel,
        out_shape=jax.ShapeDtypeStruct((CLASS_NUM, n_l), jnp.float32),
        grid_spec=pltpu.PrefetchScalarGridSpec(
            num_scalar_prefetch=0,
            grid=grid,
            in_specs=[
                pl.BlockSpec((HID, TILE_N), lambda i: (0, i)),
                pl.BlockSpec((HID, TILE_N), lambda i: (0, i)),
                pl.BlockSpec(memory_space=pltpu.MemorySpace.SMEM),
                pl.BlockSpec((CLASS_NUM, L_Z3), lambda i: (0, 0)),
                pl.BlockSpec((CLASS_NUM, 1), lambda i: (0, 0)),
                pl.BlockSpec((CLASS_NUM, L_Y3), lambda i: (0, 0)),
                pl.BlockSpec((CLASS_NUM, 1), lambda i: (0, 0)),
            ],
            out_specs=pl.BlockSpec((CLASS_NUM, TILE_N), lambda i: (0, i)),
            scratch_shapes=[
                pltpu.VMEM((L_Z0, TILE_N), jnp.float32),       # concat(local, feature)
                pltpu.VMEM((L_Z0, TILE_N), jnp.float32),       # z conv1 + relu (398 used)
                pltpu.VMEM((L_Z2 + 2, TILE_N), jnp.float32),   # z conv2 + relu (198 used)
                pltpu.VMEM((L_Y1 + 2, TILE_N), jnp.float32),   # y conv1 + relu (198 used)
                pltpu.VMEM((L_Y2 + 6, TILE_N), jnp.float32),   # y conv2 + relu (98 used)
            ],
        ),
        compiler_params=pltpu.CompilerParams(
            dimension_semantics=("parallel",),
            vmem_limit_bytes=48 * 1024 * 1024),
    )(localT, featT, cparams, w1, b1, w2, b2)


# --------------------------- parameter preparation --------------------------
def prepare_params(raw):
    """Pad/fuse torch-layout weights into MXU-aligned fused matrices (bf16 inputs)."""
    we, be = raw["we"], raw["be"]                       # [E,HID,HID], [E,HID]
    wmsg = jnp.zeros((HID_P, N_ETYPES * HID_P), jnp.float32)
    bmsg = jnp.zeros((1, N_ETYPES * HID_P), jnp.float32)
    for e in range(N_ETYPES):
        wmsg = wmsg.at[:HID, e * HID_P:e * HID_P + HID].set(we[e].T)
        bmsg = bmsg.at[0, e * HID_P:e * HID_P + HID].set(be[e])

    wih, whh, bih, bhh = raw["wih"], raw["whh"], raw["bih"], raw["bhh"]   # torch r|z|n order
    W_ir, W_iz, W_in = wih[0:HID], wih[HID:2 * HID], wih[2 * HID:3 * HID]
    W_hr, W_hz, W_hn = whh[0:HID], whh[HID:2 * HID], whh[2 * HID:3 * HID]
    b_ir, b_iz, b_in = bih[0:HID], bih[HID:2 * HID], bih[2 * HID:3 * HID]
    b_hr, b_hz, b_hn = bhh[0:HID], bhh[HID:2 * HID], bhh[2 * HID:3 * HID]

    wgru = jnp.zeros((2 * HID_P, 4 * HID_P), jnp.float32)
    # rows 0:HID_P take 'a', rows HID_P:2*HID_P take 'h'; col blocks r | z | n_i | n_h
    wgru = wgru.at[:HID, 0 * HID_P:0 * HID_P + HID].set(W_ir.T)
    wgru = wgru.at[HID_P:HID_P + HID, 0 * HID_P:0 * HID_P + HID].set(W_hr.T)
    wgru = wgru.at[:HID, 1 * HID_P:1 * HID_P + HID].set(W_iz.T)
    wgru = wgru.at[HID_P:HID_P + HID, 1 * HID_P:1 * HID_P + HID].set(W_hz.T)
    wgru = wgru.at[:HID, 2 * HID_P:2 * HID_P + HID].set(W_in.T)
    wgru = wgru.at[HID_P:HID_P + HID, 3 * HID_P:3 * HID_P + HID].set(W_hn.T)

    bgru = jnp.zeros((1, 4 * HID_P), jnp.float32)
    bgru = bgru.at[0, 0 * HID_P:0 * HID_P + HID].set(b_ir + b_hr)
    bgru = bgru.at[0, 1 * HID_P:1 * HID_P + HID].set(b_iz + b_hz)
    bgru = bgru.at[0, 2 * HID_P:2 * HID_P + HID].set(b_in)
    bgru = bgru.at[0, 3 * HID_P:3 * HID_P + HID].set(b_hn)

    return dict(
        wmsg=wmsg.astype(jnp.bfloat16), bmsg=bmsg,
        wgru=wgru.astype(jnp.bfloat16), bgru=bgru,
        cparams=raw["cparams"],
        w1=raw["lin1_w"], b1=raw["lin1_b"].reshape(CLASS_NUM, 1),
        w2=raw["lin2_w"], b2=raw["lin2_b"].reshape(CLASS_NUM, 1),
    )


# ------------------------------- full forward -------------------------------
def devign_forward(local, adjT, y, params, n_graphs, nodes_per_graph):
    n = local.shape[0]

    # --- GGNN (node-major, zero-padded to HID_P lanes / multiple-of-8 rows) ---
    n_p = _round_up(n, 8)
    h0_p = jnp.zeros((n_p, HID_P), jnp.float32).at[:n, :HID].set(local)
    adjT_p = jnp.zeros((N_ETYPES, n_p, n_p), jnp.float32).at[:, :n, :n].set(adjT)
    feat_p = ggnn_forward(h0_p, adjT_p.astype(jnp.bfloat16),
                          params["wmsg"], params["bmsg"],
                          params["wgru"], params["bgru"])
    feature = feat_p[:n, :HID]

    # --- head (length-major, nodes on lanes, padded to a multiple of TILE_N) ---
    # TODO(synk): 'feature' round-trips through HBM between the two pallas_calls;
    # fusing the head into the final GGNN step would avoid one [N,HID] write + read.
    n_l = _round_up(n, TILE_N)
    localT = jnp.zeros((HID, n_l), jnp.float32).at[:, :n].set(local.T)
    featT = jnp.zeros((HID, n_l), jnp.float32).at[:, :n].set(feature.T)
    resT = head_forward(localT, featT, params["cparams"],
                        params["w1"], params["b1"], params["w2"], params["b2"])
    res_nodes = resT[:, :n].T                                        # [N, 2]

    # dgl.mean_nodes: average node results per graph
    # TODO(synk): assumes uniform nodes-per-graph; ragged dgl batches need a segment mean.
    res = res_nodes.reshape(n_graphs, nodes_per_graph, CLASS_NUM).mean(axis=1)

    # CrossEntropyLoss (mean reduction)
    logp = jax.nn.log_softmax(res, axis=1)
    loss = -jnp.mean(logp[jnp.arange(n_graphs), y])

    # nn.Softmax() on 2-D input -> dim=1, then torch.max(res, dim=1)
    probs = jax.nn.softmax(res, axis=1)
    value = probs.max(axis=1)
    predicted = probs.argmax(axis=1)
    return value, predicted, loss


# --------------------------------- main --------------------------------------
if __name__ == "__main__":
    B, NP = 2, 8                 # 2 graphs, 8 nodes each
    N = B * NP
    T = 4                        # tokens per node 'code' field

    key = jax.random.PRNGKey(0)
    ks = jax.random.split(key, 16)

    # --- node features (stands in for get_localvec / embedding_node) ---
    # TODO(synk): string tokenization + vocab_dict lookup has no Pallas equivalent;
    # token ids are synthesized directly.
    emb_table = jax.random.normal(ks[0], (VOCAB, EMB_DIM), jnp.float32) * 0.1
    code_ids = jax.random.randint(ks[1], (N, T), 0, VOCAB)
    type_ids = jax.random.randint(ks[2], (N,), 0, VOCAB)
    c_vec = emb_table[code_ids].mean(axis=1)                       # mean of code-token embeddings
    t_vec = emb_table[type_ids]                                    # type embedding
    local = jnp.concatenate([c_vec, t_vec], axis=1)                # [N, 200] == ndata['tk']

    # --- dense, block-diagonal (batched-graph) adjacency, transposed for msg sum ---
    A = (jax.random.uniform(ks[3], (B, NP, NP, N_ETYPES)) < 0.3).astype(jnp.float32)
    adjT = jnp.zeros((N_ETYPES, N, N), jnp.float32)
    for g in range(B):
        blockT = jnp.transpose(A[g], (2, 1, 0))                    # [E, v, u]
        adjT = adjT.at[:, g * NP:(g + 1) * NP, g * NP:(g + 1) * NP].set(blockT)

    # --- deterministic synthetic parameters in torch layouts (shapes from __init__) ---
    raw = dict(
        we=jax.random.normal(ks[4], (N_ETYPES, HID, HID), jnp.float32) * 0.05,   # per-etype Linear(200,200)
        be=jax.random.normal(ks[5], (N_ETYPES, HID), jnp.float32) * 0.05,
        wih=jax.random.normal(ks[6], (3 * HID, HID), jnp.float32) * 0.05,        # GRUCell weight_ih (r|z|n)
        bih=jax.random.normal(ks[7], (3 * HID,), jnp.float32) * 0.05,
        whh=jax.random.normal(ks[8], (3 * HID, HID), jnp.float32) * 0.05,        # GRUCell weight_hh
        bhh=jax.random.normal(ks[9], (3 * HID,), jnp.float32) * 0.05,
        # conv_1 (1,1,k=3) w0..w2,b ; conv_2 (1,1,k=1) w,b packed for SMEM
        cparams=jax.random.normal(ks[10], (6,), jnp.float32) * 0.2,
        lin1_w=jax.random.normal(ks[11], (CLASS_NUM, L_Z3), jnp.float32) * 0.1,  # Linear(99,2)
        lin1_b=jax.random.normal(ks[12], (CLASS_NUM,), jnp.float32) * 0.1,
        lin2_w=jax.random.normal(ks[13], (CLASS_NUM, L_Y3), jnp.float32) * 0.1,  # Linear(49,2)
        lin2_b=jax.random.normal(ks[14], (CLASS_NUM,), jnp.float32) * 0.1,
    )
    params = prepare_params(raw)

    y = jax.random.randint(ks[15], (B,), 0, CLASS_NUM)

    value, predicted, loss = devign_forward(local, adjT, y, params, B, NP)
    jax.block_until_ready((value, predicted, loss))
    print("KERNEL_OK")
</pallas_src>

<mosaic_0001>
module attributes {stable_mosaic.version = 11 : i64} {
  func.func @ggnn_kernel(%arg0: memref<16x256xf32, #tpu.memory_space<vmem>>, %arg1: memref<4x16x16xbf16, #tpu.memory_space<vmem>>, %arg2: memref<256x1024xbf16, #tpu.memory_space<vmem>>, %arg3: memref<1x1024xf32, #tpu.memory_space<vmem>>, %arg4: memref<512x1024xbf16, #tpu.memory_space<vmem>>, %arg5: memref<1x1024xf32, #tpu.memory_space<vmem>>, %arg6: memref<16x256xf32, #tpu.memory_space<vmem>>) attributes {dimension_semantics = [], scalar_prefetch = 0 : i64, scratch_operands = 0 : i64, tpu.core_type = #tpu.core_type<tc>} {
    %c0 = arith.constant 0 : index
    %c0_0 = arith.constant 0 : index
    %0 = vector.load %arg0[%c0, %c0_0] : memref<16x256xf32, #tpu.memory_space<vmem>>, vector<16x256xf32>
    %c0_i32 = arith.constant 0 : i32
    %c6_i32 = arith.constant 6 : i32
    %1 = arith.addi %c0_i32, %c6_i32 : i32
    %c1_i32 = arith.constant 1 : i32
    %2 = scf.for %arg7 = %c0_i32 to %1 step %c1_i32 iter_args(%arg8 = %0) -> (vector<16x256xf32>)  : i32 {
      %4 = arith.truncf %arg8 : vector<16x256xf32> to vector<16x256xbf16>
      %c0_3 = arith.constant 0 : index
      %c0_4 = arith.constant 0 : index
      %5 = vector.load %arg2[%c0_3, %c0_4] : memref<256x1024xbf16, #tpu.memory_space<vmem>>, vector<256x1024xbf16>
      %cst = arith.constant dense<0.000000e+00> : vector<16x1024xf32>
      %6 = tpu.matmul %4, %5, %cst {dimension_numbers = #tpu.dot_dimension_numbers<[1], [0], [0], [1], [0, 0, 1, 1], [], []>} : vector<16x256xbf16>, vector<256x1024xbf16>, vector<16x1024xf32> -> vector<16x1024xf32>
      %c0_5 = arith.constant 0 : index
      %c0_6 = arith.constant 0 : index
      %7 = vector.load %arg3[%c0_5, %c0_6] : memref<1x1024xf32, #tpu.memory_space<vmem>>, vector<1x1024xf32>
      %8 = vector.broadcast %7 : vector<1x1024xf32> to vector<16x1024xf32>
      %9 = arith.addf %6, %8 : vector<16x1024xf32>
      %10 = arith.truncf %9 : vector<16x1024xf32> to vector<16x1024xbf16>
      %c0_7 = arith.constant 0 : index
      %c0_8 = arith.constant 0 : index
      %c0_9 = arith.constant 0 : index
      %11 = vector.load %arg1[%c0_7, %c0_8, %c0_9] : memref<4x16x16xbf16, #tpu.memory_space<vmem>>, vector<1x16x16xbf16>
      %12 = vector.shape_cast %11 : vector<1x16x16xbf16> to vector<16x16xbf16>
      %13 = vector.extract_strided_slice %10 {offsets = [0, 0], sizes = [16, 256], strides = [1, 1]} : vector<16x1024xbf16> to vector<16x256xbf16>
      %cst_10 = arith.constant dense<0.000000e+00> : vector<16x256xf32>
      %14 = tpu.matmul %12, %13, %cst_10 {dimension_numbers = #tpu.dot_dimension_numbers<[1], [0], [0], [1], [0, 0, 1, 1], [], []>} : vector<16x16xbf16>, vector<16x256xbf16>, vector<16x256xf32> -> vector<16x256xf32>
      %c1 = arith.constant 1 : index
      %c0_11 = arith.constant 0 : index
      %c0_12 = arith.constant 0 : index
      %15 = vector.load %arg1[%c1, %c0_11, %c0_12] : memref<4x16x16xbf16, #tpu.memory_space<vmem>>, vector<1x16x16xbf16>
      %16 = vector.shape_cast %15 : vector<1x16x16xbf16> to vector<16x16xbf16>
      %17 = vector.extract_strided_slice %10 {offsets = [0, 256], sizes = [16, 256], strides = [1, 1]} : vector<16x1024xbf16> to vector<16x256xbf16>
      %cst_13 = arith.constant dense<0.000000e+00> : vector<16x256xf32>
      %18 = tpu.matmul %16, %17, %cst_13 {dimension_numbers = #tpu.dot_dimension_numbers<[1], [0], [0], [1], [0, 0, 1, 1], [], []>} : vector<16x16xbf16>, vector<16x256xbf16>, vector<16x256xf32> -> vector<16x256xf32>
      %19 = arith.addf %14, %18 : vector<16x256xf32>
      %c2 = arith.constant 2 : index
      %c0_14 = arith.constant 0 : index
      %c0_15 = arith.constant 0 : index
      %20 = vector.load %arg1[%c2, %c0_14, %c0_15] : memref<4x16x16xbf16, #tpu.memory_space<vmem>>, vector<1x16x16xbf16>
      %21 = vector.shape_cast %20 : vector<1x16x16xbf16> to vector<16x16xbf16>
      %22 = vector.extract_strided_slice %10 {offsets = [0, 512], sizes = [16, 256], strides = [1, 1]} : vector<16x1024xbf16> to vector<16x256xbf16>
      %cst_16 = arith.constant dense<0.000000e+00> : vector<16x256xf32>
      %23 = tpu.matmul %21, %22, %cst_16 {dimension_numbers = #tpu.dot_dimension_numbers<[1], [0], [0], [1], [0, 0, 1, 1], [], []>} : vector<16x16xbf16>, vector<16x256xbf16>, vector<16x256xf32> -> vector<16x256xf32>
      %24 = arith.addf %19, %23 : vector<16x256xf32>
      %c3 = arith.constant 3 : index
      %c0_17 = arith.constant 0 : index
      %c0_18 = arith.constant 0 : index
      %25 = vector.load %arg1[%c3, %c0_17, %c0_18] : memref<4x16x16xbf16, #tpu.memory_space<vmem>>, vector<1x16x16xbf16>
      %26 = vector.shape_cast %25 : vector<1x16x16xbf16> to vector<16x16xbf16>
      %27 = vector.extract_strided_slice %10 {offsets = [0, 768], sizes = [16, 256], strides = [1, 1]} : vector<16x1024xbf16> to vector<16x256xbf16>
      %cst_19 = arith.constant dense<0.000000e+00> : vector<16x256xf32>
      %28 = tpu.matmul %26, %27, %cst_19 {dimension_numbers = #tpu.dot_dimension_numbers<[1], [0], [0], [1], [0, 0, 1, 1], [], []>} : vector<16x16xbf16>, vector<16x256xbf16>, vector<16x256xf32> -> vector<16x256xf32>
      %29 = arith.addf %24, %28 : vector<16x256xf32>
      %30 = arith.truncf %29 : vector<16x256xf32> to vector<16x256xbf16>
      %31 = tpu.concatenate %30, %4 in 1 : vector<16x256xbf16>, vector<16x256xbf16> -> vector<16x512xbf16>
      %c0_20 = arith.constant 0 : index
      %c0_21 = arith.constant 0 : index
      %32 = vector.load %arg4[%c0_20, %c0_21] : memref<512x1024xbf16, #tpu.memory_space<vmem>>, vector<512x1024xbf16>
      %cst_22 = arith.constant dense<0.000000e+00> : vector<16x1024xf32>
      %33 = tpu.matmul %31, %32, %cst_22 {dimension_numbers = #tpu.dot_dimension_numbers<[1], [0], [0], [1], [0, 0, 1, 1], [], []>} : vector<16x512xbf16>, vector<512x1024xbf16>, vector<16x1024xf32> -> vector<16x1024xf32>
      %c0_23 = arith.constant 0 : index
      %c0_24 = arith.constant 0 : index
      %34 = vector.load %arg5[%c0_23, %c0_24] : memref<1x1024xf32, #tpu.memory_space<vmem>>, vector<1x1024xf32>
      %35 = vector.broadcast %34 : vector<1x1024xf32> to vector<16x1024xf32>
      %36 = arith.addf %33, %35 : vector<16x1024xf32>
      %37 = vector.extract_strided_slice %36 {offsets = [0, 0], sizes = [16, 256], strides = [1, 1]} : vector<16x1024xf32> to vector<16x256xf32>
      %38 = arith.negf %37 : vector<16x256xf32>
      %39 = math.exp %38 : vector<16x256xf32>
      %cst_25 = arith.constant 1.000000e+00 : f32
      %40 = vector.broadcast %cst_25 : f32 to vector<16x256xf32>
      %41 = arith.addf %40, %39 : vector<16x256xf32>
      %42 = arith.divf %40, %41 : vector<16x256xf32>
      %43 = vector.extract_strided_slice %36 {offsets = [0, 256], sizes = [16, 256], strides = [1, 1]} : vector<16x1024xf32> to vector<16x256xf32>
      %44 = arith.negf %43 : vector<16x256xf32>
      %45 = math.exp %44 : vector<16x256xf32>
      %cst_26 = arith.constant 1.000000e+00 : f32
      %46 = vector.broadcast %cst_26 : f32 to vector<16x256xf32>
      %47 = arith.addf %46, %45 : vector<16x256xf32>
      %48 = arith.divf %46, %47 : vector<16x256xf32>
      %49 = vector.extract_strided_slice %36 {offsets = [0, 512], sizes = [16, 256], strides = [1, 1]} : vector<16x1024xf32> to vector<16x256xf32>
      %50 = vector.extract_strided_slice %36 {offsets = [0, 768], sizes = [16, 256], strides = [1, 1]} : vector<16x1024xf32> to vector<16x256xf32>
      %51 = arith.mulf %42, %50 : vector<16x256xf32>
      %52 = arith.addf %49, %51 : vector<16x256xf32>
      %53 = math.tanh %52 : vector<16x256xf32>
      %cst_27 = arith.constant 1.000000e+00 : f32
      %54 = vector.broadcast %cst_27 : f32 to vector<16x256xf32>
      %55 = arith.subf %54, %48 : vector<16x256xf32>
      %56 = arith.mulf %55, %53 : vector<16x256xf32>
      %57 = arith.mulf %48, %arg8 : vector<16x256xf32>
      %58 = arith.addf %56, %57 : vector<16x256xf32>
      scf.yield %58 : vector<16x256xf32>
    }
    %c0_1 = arith.constant 0 : index
    %c0_2 = arith.constant 0 : index
    %3 = vector.load %arg6[%c0_1, %c0_2] : memref<16x256xf32, #tpu.memory_space<vmem>>, vector<16x256xf32>
    tpu.vector_store %arg6[%c0_1, %c0_2], %2 {strides = array<i32>} : memref<16x256xf32, #tpu.memory_space<vmem>>, vector<16x256xf32>,
    return
  }
}

</mosaic_0001>

<bundles_post_ra>
// kernel: tpu_custom_call.1
= control target key start
LH: loop header
LB: loop body
LE: loop exit
PB: predicated region body
PF: predicated region fallthrough
CT: control target
= control target key end

     0   :  { %11 = vsyncpa [#allocation3], 0  ;;  %s6301_s0 = inlined_call_operand.hbm [shape: f32[16,256], index: 0, kind: input, shape index: {}]   ;;  %s6302_s1 = inlined_call_operand.hbm [shape: bf16[4,16,16], index: 1, kind: input, shape index: {}]   ;;  %s6303_s2 = inlined_call_operand.hbm [shape: bf16[256,1024], index: 2, kind: input, shape index: {}]   ;;  %s6304_s3 = inlined_call_operand.hbm [shape: f32[1,1024], index: 3, kind: input, shape index: {}]   ;;  %s6305_s4 = inlined_call_operand.hbm [shape: bf16[512,1024], index: 4, kind: input, shape index: {}]   ;;  %s6306_s5 = inlined_call_operand.hbm [shape: f32[1,1024], index: 5, kind: input, shape index: {}]   ;;  %s6307_s6 = inlined_call_operand.hbm [shape: f32[16,256], index: 6, kind: output, shape index: {}]  }
   0x1   :  { %12 = vsyncpa [#allocation6], 0 }
   0x2   :  { %13 = vsyncpa [#allocation9], 0 }
   0x3   :  { %14 = vsyncpa [#allocation12], 0  ;;  %s33_s23 = sshll.u32 %s6302_s1, 4  ;;  %s34_s23 = int_to_ptr.hbm [resolvable:$true] %s33_s23 }
   0x4   :  { %15 = vsyncpa [#allocation4], 0  ;;  %s5867_s24 = smov [#allocation5]   ;;  %s60_s28 = sshll.u32 %s6304_s3, 4  ;;  %s61_s28 = int_to_ptr.hbm [resolvable:$true] %s60_s28 }
   0x5   :  { %s35_s25 = sshll.u32 %s5867_s24, 4  ;;  %s5868_s29 = smov 64   ;;  %s36_s25 = int_to_ptr.vmem [resolvable:$true] %s35_s25 }
   0x6   :  { %s5869_s30 = smov 4   ;;  %s5870_s7 = smov [#allocation8]  }
   0x7   :  { %41 = dma.hbm_to_vmem [thread:$0]  %s34_s23, 512, %s36_s25, [#allocation6], %s5868_s29, %s5868_s29, %s5869_s30  }
   0x8   :  { %s62_s8 = sshll.u32 %s5870_s7, 4  ;;  %s20_s11 = sshll.u32 %s6301_s0, 4  ;;  %s63_s8 = int_to_ptr.vmem [resolvable:$true] %s62_s8  ;;  %s21_s11 = int_to_ptr.hbm [resolvable:$true] %s20_s11 }
   0x9   :  { %65 = dma.hbm_to_vmem [thread:$0]  %s61_s28, 128, %s63_s8, [#allocation9]  }
   0xa   :  { %s5871_s1 = smov [#allocation2]   ;;  %s46_s3 = sshll.u32 %s6303_s2, 4  ;;  %s47_s3 = int_to_ptr.hbm [resolvable:$true] %s46_s3 }
   0xb   :  { %s22_s12 = sshll.u32 %s5871_s1, 4  ;;  %s5872_s15 = smov 256   ;;  %s23_s12 = int_to_ptr.vmem [resolvable:$true] %s22_s12 }
   0xc   :  { %s5873_s16 = smov 16   ;;  %s5874_s17 = smov [#allocation7]  }
   0xd   :  { %28 = dma.hbm_to_vmem [thread:$0]  %s21_s11, 512, %s23_s12, [#allocation3], %s5872_s15, %s5872_s15, %s5873_s16  }
   0xe   :  { %s48_s18 = sshll.u32 %s5874_s17, 4  ;;  %s5875_s0 = smov 512   ;;  %s49_s18 = int_to_ptr.vmem [resolvable:$true] %s48_s18 }
   0xf   :  { %s5876_s19 = smov 32   ;;  %s70_s22 = sshll.u32 %s6305_s4, 4  ;;  %s71_s22 = int_to_ptr.hbm [resolvable:$true] %s70_s22 }
  0x10   :  { %54 = dma.hbm_to_vmem [thread:$0]  %s47_s3, 16384, %s49_s18, [#allocation6], %s5875_s0, %s5875_s0, %s5876_s19  }
  0x11   :  { %s5877_s23 = smov [#allocation10]   ;;  %s84_s26 = sshll.u32 %s6306_s5, 4  ;;  %s85_s26 = int_to_ptr.hbm [resolvable:$true] %s84_s26 }
  0x12   :  { %s72_s2 = sshll.u32 %s5877_s23, 4  ;;  %s5878_s27 = smov [#allocation11]   ;;  %s73_s2 = int_to_ptr.vmem [resolvable:$true] %s72_s2 }
  0x13   :  { %78 = dma.hbm_to_vmem [thread:$0]  %s71_s22, 32768, %s73_s2, [#allocation9], %s5875_s0, %s5875_s0, %s5876_s19  }
  0x14   :  { %s86_s28 = sshll.u32 %s5878_s27, 4  ;;  %s87_s28 = int_to_ptr.vmem [resolvable:$true] %s86_s28 }
  0x15   :  { %89 = dma.hbm_to_vmem [thread:$0]  %s85_s26, 128, %s87_s28, [#allocation12]  }
  0x16   :  { %5837 = dma.done.wait [#allocation3], 512  }
  0x17   :  { %5838 = vsyncadd [#allocation3], 4294966784 }
  0x18   :  { %5839 = dma.done.wait [#allocation6], 16896  }
  0x19   :  { %5840 = vsyncadd [#allocation6], 4294950400 }
  0x1a   :  { %5841 = dma.done.wait [#allocation9], 32896  }
  0x1b   :  { %5842 = vsyncadd [#allocation9], 4294934400 }
  0x1c   :  { %5843 = dma.done.wait [#allocation12], 128  }
  0x1d   :  { %5844 = vsyncadd [#allocation12], 4294967168  ;;  %v115_v0 = vld [vmem:[#allocation2] sm:$0xff]   ;;  %v116_v1 = vld [vmem:[#allocation2 + $0x8] sm:$0xff]   ;;  %s5944_s4 = smov 0  }
  0x1e   :  { %v117_v2 = vld [vmem:[#allocation2 + $0x10] sm:$0xff]   ;;  %v118_v3 = vld [vmem:[#allocation2 + $0x18] sm:$0xff]  }
  0x1f LB: > { %v3826_v4 = vld [vmem:[#allocation7 + $0x1c0] sm:$0xf]  ;;  %v5224_v9 = vld [vmem:[#allocation7 + $0x1c4] sm:$0xf]  ;;  %vm1179_vm0 = vcmask 130048   ;;  %s124_s4 = sadd.s32 1, %s5865_s4   ;;  %s5865_s4 = sphi %s5944_s4, %s124_s4   ;;  %v5861_v0 = vphi %v115_v0, %v6323_v0   ;;  %v5857_v1 = vphi %v116_v1, %v6322_v1   ;;  %v5853_v2 = vphi %v117_v2, %v6321_v2   ;;  %v5849_v3 = vphi %v118_v3, %v6320_v3  }
  0x20   : > { %v5228_v5 = vld [vmem:[#allocation7 + $0x1dc] sm:$0xf0]  ;;  %v3828_v10 = vld [vmem:[#allocation7 + $0x1e0] sm:$0xf0]  ;;  %p121_p0 = scmp.ge.s32.totalorder %s124_s4, 6  }
  0x21   : > { %v4082_v6 = vld [vmem:[#allocation7 + $0x3c0] sm:$0xf]  ;;  %v3827_v7 = vor.u32 %v5228_v5, %v3826_v4  ;;  %v3831_v12 = vor.u32 %v5224_v9, %v3828_v10  ;;  %v5288_v13 = vld [vmem:[#allocation7 + $0x3c4] sm:$0xf]  ;;  %s3567_s30 = sshll.u32 (%p121_p0), %s6307_s6, 4  ;;  %s5879_s7 = smov (%p121_p0), [#allocation13]   ;;  %s3568_s30 = int_to_ptr.hbm [resolvable:$true] %s3567_s30 }
  0x22   : > { %v5292_v8 = vld [vmem:[#allocation7 + $0x3dc] sm:$0xf0]  ;;  %v4084_v14 = vld [vmem:[#allocation7 + $0x3e0] sm:$0xf0]  ;;  %s3565_s8 = sshll.u32 (%p121_p0), %s5879_s7, 4  ;;  %s3566_s8 = int_to_ptr.vmem [resolvable:$true] %s3565_s8 }
  0x23   : > { %v4083_v11 = vor.u32 %v5292_v8, %v4082_v6  ;;  %v3794_v15 = vld [vmem:[#allocation7 + $0x180] sm:$0xf]  ;;  %927 = vmatpush.bf16.msra.mxu0 %v3827_v7  ;;  %v4087_v16 = vor.u32 %v5288_v13, %v4084_v14  ;;  %955 = vmatpush.bf16.msra.mxu2 %v3831_v12  ;;  %v5216_v22 = vld [vmem:[#allocation7 + $0x184] sm:$0xf] }
  0x24   : > { %v5220_v17 = vld [vmem:[#allocation7 + $0x19c] sm:$0xf0]  ;;  %v3796_v23 = vld [vmem:[#allocation7 + $0x1a0] sm:$0xf0] }
  0x25   : > { %v4050_v18 = vld [vmem:[#allocation7 + $0x380] sm:$0xf]  ;;  %941 = vmatpush.bf16.msra.mxu1 %v4083_v11  ;;  %v3795_v20 = vor.u32 %v5220_v17, %v3794_v15  ;;  %v5280_v24 = vld [vmem:[#allocation7 + $0x384] sm:$0xf]  ;;  %969 = vmatpush.bf16.msra.mxu3 %v4087_v16  ;;  %v3799_v25 = vor.u32 %v5216_v22, %v3796_v23 }
  0x26   : > { %v5284_v19 = vld [vmem:[#allocation7 + $0x39c] sm:$0xf0]  ;;  %v4052_v26 = vld [vmem:[#allocation7 + $0x3a0] sm:$0xf0] }
  0x27   : > { %v4051_v21 = vor.u32 %v5284_v19, %v4050_v18  ;;  %v3762_v27 = vld [vmem:[#allocation7 + $0x140] sm:$0xf]  ;;  %v4055_v29 = vor.u32 %v5280_v24, %v4052_v26  ;;  %v5208_v32 = vld [vmem:[#allocation7 + $0x144] sm:$0xf]  ;;  %928 = vmatpush.bf16.msra.mxu0 %v3795_v20  ;;  %956 = vmatpush.bf16.msra.mxu2 %v3799_v25 }
  0x28   : > { %v5212_v28 = vld [vmem:[#allocation7 + $0x15c] sm:$0xf0]  ;;  %v3764_v34 = vld [vmem:[#allocation7 + $0x160] sm:$0xf0] }
  0x29   : > { %v4018_v30 = vld [vmem:[#allocation7 + $0x340] sm:$0xf]  ;;  %v3763_v33 = vor.u32 %v5212_v28, %v3762_v27  ;;  %v5272_v35 = vld [vmem:[#allocation7 + $0x344] sm:$0xf]  ;;  %942 = vmatpush.bf16.msra.mxu1 %v4051_v21  ;;  %v3767_v38 = vor.u32 %v5208_v32, %v3764_v34  ;;  %970 = vmatpush.bf16.msra.mxu3 %v4055_v29  ;;  %v129_v27 = vpack.c.bf16 %v5857_v1, %v5861_v0 }
  0x2a   : > { %v5276_v31 = vld [vmem:[#allocation7 + $0x35c] sm:$0xf0]  ;;  %v4020_v36 = vld [vmem:[#allocation7 + $0x360] sm:$0xf0]  ;;  %v130_v28 = vpack.c.bf16 %v5849_v3, %v5853_v2 }
  0x2b   : > { %v4019_v37 = vor.u32 %v5276_v31, %v4018_v30  ;;  %v3730_v39 = vld [vmem:[#allocation7 + $0x100] sm:$0xf]  ;;  %v4023_v42 = vor.u32 %v5272_v35, %v4020_v36  ;;  %v5200_v44 = vld [vmem:[#allocation7 + $0x104] sm:$0xf]  ;;  %929 = vmatpush.bf16.msra.mxu0 %v3763_v33  ;;  %957 = vmatpush.bf16.msra.mxu2 %v3767_v38  ;;  %v3834_v38 = vld [vmem:[#allocation7 + $0x1c8] sm:$0xf] }
  0x2c   : > { %v5204_v40 = vld [vmem:[#allocation7 + $0x11c] sm:$0xf0]  ;;  %v3732_v45 = vld [vmem:[#allocation7 + $0x120] sm:$0xf0] }
  0x2d   : > { %v3986_v41 = vld [vmem:[#allocation7 + $0x300] sm:$0xf]  ;;  %v5264_v46 = vld [vmem:[#allocation7 + $0x304] sm:$0xf]  ;;  %v3731_v48 = vor.u32 %v5204_v40, %v3730_v39  ;;  %943 = vmatpush.bf16.msra.mxu1 %v4019_v37  ;;  %v3735_v52 = vor.u32 %v5200_v44, %v3732_v45  ;;  %971 = vmatpush.bf16.msra.mxu3 %v4023_v42  ;;  %v5229_v39 = vld [vmem:[#allocation7 + $0x1e4] sm:$0xf0]  ;;  %v279_v45 = vunpack.c.l.b16 %v129_v27 }
  0x2e   : > { %v5268_v43 = vld [vmem:[#allocation7 + $0x31c] sm:$0xf0]  ;;  %v3988_v47 = vld [vmem:[#allocation7 + $0x320] sm:$0xf0]  ;;  %v4090_v40 = vld [vmem:[#allocation7 + $0x3c8] sm:$0xf] }
  0x2f   : > { %v3698_v49 = vld [vmem:[#allocation7 + $0xc0] sm:$0xf]  ;;  %v3987_v51 = vor.u32 %v5268_v43, %v3986_v41  ;;  %v5192_v55 = vld [vmem:[#allocation7 + $0xc4] sm:$0xf]  ;;  %v3991_v56 = vor.u32 %v5264_v46, %v3988_v47  ;;  %930 = vmatpush.bf16.msra.mxu0 %v3731_v48  ;;  %958 = vmatpush.bf16.msra.mxu2 %v3735_v52  ;;  %v5293_v42 = vld [vmem:[#allocation7 + $0x3e4] sm:$0xf0]  ;;  %v281_v46 = vunpack.c.l.b16 %v130_v28  ;;  %v282_v52 = vunpack.c.h.b16 %v130_v28 }
  0x30   : > { %v5196_v50 = vld [vmem:[#allocation7 + $0xdc] sm:$0xf0]  ;;  %v3700_v57 = vld [vmem:[#allocation7 + $0xe0] sm:$0xf0]  ;;  %v5225_v43 = vld [vmem:[#allocation7 + $0x1cc] sm:$0xf] }
  0x31   : > { %v3954_v53 = vld [vmem:[#allocation7 + $0x2c0] sm:$0xf]  ;;  %v5256_v58 = vld [vmem:[#allocation7 + $0x2c4] sm:$0xf]  ;;  %v3699_v60 = vor.u32 %v5196_v50, %v3698_v49  ;;  %944 = vmatpush.bf16.msra.mxu1 %v3987_v51  ;;  %v3703_v5 = vor.u32 %v5192_v55, %v3700_v57  ;;  %972 = vmatpush.bf16.msra.mxu3 %v3991_v56  ;;  %v3836_v44 = vld [vmem:[#allocation7 + $0x1e8] sm:$0xf0]  ;;  %v280_v51 = vunpack.c.h.b16 %v129_v27  ;;  %v4091_v55 = vor.u32 %v5293_v42, %v4090_v40 }
  0x32   : > { %v5260_v54 = vld [vmem:[#allocation7 + $0x2dc] sm:$0xf0]  ;;  %v3956_v59 = vld [vmem:[#allocation7 + $0x2e0] sm:$0xf0]  ;;  %v5289_v49 = vld [vmem:[#allocation7 + $0x3cc] sm:$0xf]  ;;  %v3839_v56 = vor.u32 %v5225_v43, %v3836_v44 }
  0x33   : > { %v3666_v61 = vld [vmem:[#allocation7 + $0x80] sm:$0xf]  ;;  %v3955_v4 = vor.u32 %v5260_v54, %v3954_v53  ;;  %v3959_v6 = vor.u32 %v5256_v58, %v3956_v59  ;;  %v5184_v8 = vld [vmem:[#allocation7 + $0x84] sm:$0xf]  ;;  %931 = vmatpush.bf16.msra.mxu0 %v3699_v60  ;;  %959 = vmatpush.bf16.msra.mxu2 %v3703_v5  ;;  %v4092_v50 = vld [vmem:[#allocation7 + $0x3e8] sm:$0xf0]  ;;  %v3835_v54 = vor.u32 %v5229_v39, %v3834_v38 }
  0x34   : > { %v5188_v62 = vld [vmem:[#allocation7 + $0x9c] sm:$0xf0]  ;;  %v3668_v9 = vld [vmem:[#allocation7 + $0xa0] sm:$0xf0]  ;;  %v3802_v57 = vld [vmem:[#allocation7 + $0x188] sm:$0xf]  ;;  %v4095_v60 = vor.u32 %v5289_v49, %v4092_v50 }
  0x35   : > { %v3922_v63 = vld [vmem:[#allocation7 + $0x280] sm:$0xf]  ;;  %v5248_v10 = vld [vmem:[#allocation7 + $0x284] sm:$0xf]  ;;  %v3667_v12 = vor.u32 %v5188_v62, %v3666_v61  ;;  %v3671_v14 = vor.u32 %v5184_v8, %v3668_v9  ;;  %945 = vmatpush.bf16.msra.mxu1 %v3955_v4  ;;  %973 = vmatpush.bf16.msra.mxu3 %v3959_v6  ;;  %v5221_v58 = vld [vmem:[#allocation7 + $0x1a4] sm:$0xf0]  ;;  %v5965_v4 = vpack.c.b16 %v281_v46, %v279_v45 }
  0x36   : > { %v5252_v7 = vld [vmem:[#allocation7 + $0x29c] sm:$0xf0]  ;;  %v3924_v11 = vld [vmem:[#allocation7 + $0x2a0] sm:$0xf0]  ;;  %v4058_v59 = vld [vmem:[#allocation7 + $0x388] sm:$0xf]  ;;  %v3803_v8 = vor.u32 %v5221_v58, %v3802_v57 }
  0x37   : > { %v3923_v13 = vor.u32 %v5252_v7, %v3922_v63  ;;  %v3634_v15 = vld [vmem:[#allocation7 + $0x40] sm:$0xf]  ;;  %v3927_v18 = vor.u32 %v5248_v10, %v3924_v11  ;;  %v5176_v20 = vld [vmem:[#allocation7 + $0x44] sm:$0xf]  ;;  %932 = vmatpush.bf16.msra.mxu0 %v3667_v12  ;;  %960 = vmatpush.bf16.msra.mxu2 %v3671_v14  ;;  %v5285_v61 = vld [vmem:[#allocation7 + $0x3a4] sm:$0xf0]  ;;  %v5967_v7 = vpack.c.b16 %v282_v52, %v280_v51 }
  0x38   : > { %v5180_v16 = vld [vmem:[#allocation7 + $0x5c] sm:$0xf0]  ;;  %v3636_v21 = vld [vmem:[#allocation7 + $0x60] sm:$0xf0]  ;;  %v5217_v62 = vld [vmem:[#allocation7 + $0x18c] sm:$0xf]  ;;  %v4059_v9 = vor.u32 %v5285_v61, %v4058_v59 }
  0x39   : > { %v3890_v17 = vld [vmem:[#allocation7 + $0x240] sm:$0xf]  ;;  %v5240_v22 = vld [vmem:[#allocation7 + $0x244] sm:$0xf]  ;;  %v3635_v24 = vor.u32 %v5180_v16, %v3634_v15  ;;  %946 = vmatpush.bf16.msra.mxu1 %v3923_v13  ;;  %v3639_v30 = vor.u32 %v5176_v20, %v3636_v21  ;;  %974 = vmatpush.bf16.msra.mxu3 %v3927_v18  ;;  %v3804_v63 = vld [vmem:[#allocation7 + $0x1a8] sm:$0xf0] }
  0x3a   : > { %v5244_v19 = vld [vmem:[#allocation7 + $0x25c] sm:$0xf0]  ;;  %v3892_v23 = vld [vmem:[#allocation7 + $0x260] sm:$0xf0]  ;;  %v5281_v5 = vld [vmem:[#allocation7 + $0x38c] sm:$0xf]  ;;  %v3807_v10 = vor.u32 %v5217_v62, %v3804_v63 }
  0x3b   : > { %v3602_v25 = vld [vmem:[#allocation7] sm:$0xf]  ;;  %v3891_v29 = vor.u32 %v5244_v19, %v3890_v17  ;;  %v5168_v33 = vld [vmem:[#allocation7 + $0x4] sm:$0xf]  ;;  %v3895_v34 = vor.u32 %v5240_v22, %v3892_v23  ;;  %933 = vmatpush.bf16.msra.mxu0 %v3635_v24  ;;  %961 = vmatpush.bf16.msra.mxu2 %v3639_v30  ;;  %v4060_v6 = vld [vmem:[#allocation7 + $0x3a8] sm:$0xf0] }
  0x3c   : > { %v5172_v26 = vld [vmem:[#allocation7 + $0x1c] sm:$0xf0]  ;;  %v3604_v35 = vld [vmem:[#allocation7 + $0x20] sm:$0xf0]  ;;  %v3770_v11 = vld [vmem:[#allocation7 + $0x148] sm:$0xf]  ;;  %v4063_v14 = vor.u32 %v5281_v5, %v4060_v6 }
  0x3d   : > { %v3858_v31 = vld [vmem:[#allocation7 + $0x200] sm:$0xf]  ;;  %v5232_v36 = vld [vmem:[#allocation7 + $0x204] sm:$0xf]  ;;  %v3603_v41 = vor.u32 %v5172_v26, %v3602_v25  ;;  %947 = vmatpush.bf16.msra.mxu1 %v3891_v29  ;;  %v3607_v48 = vor.u32 %v5168_v33, %v3604_v35  ;;  %975 = vmatpush.bf16.msra.mxu3 %v3895_v34  ;;  %v5213_v12 = vld [vmem:[#allocation7 + $0x164] sm:$0xf0] }
  0x3e   : > { %v5236_v32 = vld [vmem:[#allocation7 + $0x21c] sm:$0xf0]  ;;  %v3860_v37 = vld [vmem:[#allocation7 + $0x220] sm:$0xf0]  ;;  %v4026_v13 = vld [vmem:[#allocation7 + $0x348] sm:$0xf]  ;;  %v3771_v20 = vor.u32 %v5213_v12, %v3770_v11 }
  0x3f   : > { %v3859_v47 = vor.u32 %v5236_v32, %v3858_v31  ;;  %v3863_v53 = vor.u32 %v5232_v36, %v3860_v37  ;;  %934 = vmatpush.bf16.msra.mxu0 %v3603_v41  ;;  %962 = vmatpush.bf16.msra.mxu2 %v3607_v48  ;;  %v5277_v15 = vld [vmem:[#allocation7 + $0x364] sm:$0xf0]  ;;  %v5209_v16 = vld [vmem:[#allocation7 + $0x14c] sm:$0xf] }
  0x40   : > { %v3772_v17 = vld [vmem:[#allocation7 + $0x168] sm:$0xf0]  ;;  %v4027_v21 = vor.u32 %v5277_v15, %v4026_v13  ;;  %v3738_v23 = vld [vmem:[#allocation7 + $0x108] sm:$0xf] }
  0x41   : > { %948 = vmatpush.bf16.msra.mxu1 %v3859_v47  ;;  %976 = vmatpush.bf16.msra.mxu3 %v3863_v53  ;;  %v5273_v18 = vld [vmem:[#allocation7 + $0x34c] sm:$0xf]  ;;  %v3775_v22 = vor.u32 %v5209_v16, %v3772_v17  ;;  %v5205_v24 = vld [vmem:[#allocation7 + $0x124] sm:$0xf0] }
  0x42   : > { %963 = vmatmul.bf16.vlgmr.msra.gmra.mxu2 %v5965_v4  ;;  %v4028_v19 = vld [vmem:[#allocation7 + $0x368] sm:$0xf0]  ;;  %935 = vmatmul.bf16.vlgmr.msra.gmra.mxu0 %v5965_v4  ;;  %v3994_v25 = vld [vmem:[#allocation7 + $0x308] sm:$0xf]  ;;  %v3739_v32 = vor.u32 %v5205_v24, %v3738_v23  ;;  %v5230_v23 = vld [vmem:[#allocation7 + $0x1ec] sm:$0xf0] }
  0x43   : > { %983 = vmatpush.bf16.msrb.mxu0 %v3835_v54  ;;  %1011 = vmatpush.bf16.msrb.mxu2 %v3839_v56  ;;  %v4031_v26 = vor.u32 %v5273_v18, %v4028_v19  ;;  %v5269_v27 = vld [vmem:[#allocation7 + $0x324] sm:$0xf0]  ;;  %v5201_v28 = vld [vmem:[#allocation7 + $0x10c] sm:$0xf]  ;;  %v4098_v24 = vld [vmem:[#allocation7 + $0x3d0] sm:$0xf] }
  0x44   : > { %977 = vmatmul.bf16.vlgmr.msra.gmra.mxu3 %v5967_v7  ;;  %949 = vmatmul.bf16.vlgmr.msra.gmra.mxu1 %v5967_v7  ;;  %v3740_v29 = vld [vmem:[#allocation7 + $0x128] sm:$0xf0]  ;;  %v3995_v33 = vor.u32 %v5269_v27, %v3994_v25  ;;  %v3706_v35 = vld [vmem:[#allocation7 + $0xc8] sm:$0xf]  ;;  %v5226_v27 = vld [vmem:[#allocation7 + $0x1d4] sm:$0xf] }
  0x45   : > { %997 = vmatpush.bf16.msrb.mxu1 %v4091_v55  ;;  %1025 = vmatpush.bf16.msrb.mxu3 %v4095_v60  ;;  %v5265_v30 = vld [vmem:[#allocation7 + $0x30c] sm:$0xf]  ;;  %v3743_v34 = vor.u32 %v5201_v28, %v3740_v29  ;;  %v5197_v36 = vld [vmem:[#allocation7 + $0xe4] sm:$0xf0]  ;;  %v3844_v28 = vld [vmem:[#allocation7 + $0x1f0] sm:$0xf0] }
  0x46   : > { %v3996_v31 = vld [vmem:[#allocation7 + $0x328] sm:$0xf0]  ;;  %v3962_v37 = vld [vmem:[#allocation7 + $0x2c8] sm:$0xf]  ;;  %v3707_v44 = vor.u32 %v5197_v36, %v3706_v35  ;;  %v3847_v36 = vor.u32 %v5226_v27, %v3844_v28  ;;  %v3682_v27 = vld [vmem:[#allocation7 + $0x90] sm:$0xf] }
  0x47   : > { %984 = vmatpush.bf16.msrb.mxu0 %v3803_v8  ;;  %1012 = vmatpush.bf16.msrb.mxu2 %v3807_v10  ;;  %v3999_v38 = vor.u32 %v5265_v30, %v3996_v31  ;;  %v5261_v39 = vld [vmem:[#allocation7 + $0x2e4] sm:$0xf0]  ;;  %v5193_v40 = vld [vmem:[#allocation7 + $0xcc] sm:$0xf]  ;;  %v5290_v31 = vld [vmem:[#allocation7 + $0x3d4] sm:$0xf] }
  0x48   : > { %v3708_v41 = vld [vmem:[#allocation7 + $0xe8] sm:$0xf0]  ;;  %v3963_v45 = vor.u32 %v5261_v39, %v3962_v37  ;;  %v3674_v47 = vld [vmem:[#allocation7 + $0x88] sm:$0xf]  ;;  %v3810_v37 = vld [vmem:[#allocation7 + $0x190] sm:$0xf] }
  0x49   : > { %998 = vmatpush.bf16.msrb.mxu1 %v4059_v9  ;;  %1026 = vmatpush.bf16.msrb.mxu3 %v4063_v14  ;;  %v5257_v42 = vld [vmem:[#allocation7 + $0x2cc] sm:$0xf]  ;;  %v3711_v46 = vor.u32 %v5193_v40, %v3708_v41  ;;  %v5189_v48 = vld [vmem:[#allocation7 + $0xa4] sm:$0xf0]  ;;  %v4066_v39 = vld [vmem:[#allocation7 + $0x390] sm:$0xf] }
  0x4a   : > { %v3964_v43 = vld [vmem:[#allocation7 + $0x2e8] sm:$0xf0]  ;;  %v3930_v49 = vld [vmem:[#allocation7 + $0x288] sm:$0xf]  ;;  %v3675_v56 = vor.u32 %v5189_v48, %v3674_v47  ;;  %v5286_v41 = vld [vmem:[#allocation7 + $0x3ac] sm:$0xf0] }
  0x4b   : > { %985 = vmatpush.bf16.msrb.mxu0 %v3771_v20  ;;  %1013 = vmatpush.bf16.msrb.mxu2 %v3775_v22  ;;  %v3967_v50 = vor.u32 %v5257_v42, %v3964_v43  ;;  %v5253_v51 = vld [vmem:[#allocation7 + $0x2a4] sm:$0xf0]  ;;  %v5185_v52 = vld [vmem:[#allocation7 + $0x8c] sm:$0xf]  ;;  %v3842_v22 = vld [vmem:[#allocation7 + $0x1d0] sm:$0xf]  ;;  %v4067_v47 = vor.u32 %v5286_v41, %v4066_v39 }
  0x4c   : > { %v3676_v53 = vld [vmem:[#allocation7 + $0xa8] sm:$0xf0]  ;;  %v3931_v57 = vor.u32 %v5253_v51, %v3930_v49  ;;  %v3642_v59 = vld [vmem:[#allocation7 + $0x48] sm:$0xf]  ;;  %v5218_v42 = vld [vmem:[#allocation7 + $0x194] sm:$0xf] }
  0x4d   : > { %999 = vmatpush.bf16.msrb.mxu1 %v4027_v21  ;;  %1027 = vmatpush.bf16.msrb.mxu3 %v4031_v26  ;;  %v5249_v54 = vld [vmem:[#allocation7 + $0x28c] sm:$0xf]  ;;  %v3679_v58 = vor.u32 %v5185_v52, %v3676_v53  ;;  %v5181_v60 = vld [vmem:[#allocation7 + $0x64] sm:$0xf0]  ;;  %v5294_v26 = vld [vmem:[#allocation7 + $0x3ec] sm:$0xf0] }
  0x4e   : > { %v3932_v55 = vld [vmem:[#allocation7 + $0x2a8] sm:$0xf0]  ;;  %v3898_v61 = vld [vmem:[#allocation7 + $0x248] sm:$0xf]  ;;  %v3643_v10 = vor.u32 %v5181_v60, %v3642_v59  ;;  %v4099_v35 = vor.u32 %v5294_v26, %v4098_v24  ;;  %v3812_v43 = vld [vmem:[#allocation7 + $0x1b0] sm:$0xf0] }
  0x4f   : > { %986 = vmatpush.bf16.msrb.mxu0 %v3739_v32  ;;  %1014 = vmatpush.bf16.msrb.mxu2 %v3743_v34  ;;  %v3935_v62 = vor.u32 %v5249_v54, %v3932_v55  ;;  %v5245_v63 = vld [vmem:[#allocation7 + $0x264] sm:$0xf0]  ;;  %v5177_v5 = vld [vmem:[#allocation7 + $0x4c] sm:$0xf]  ;;  %v4100_v32 = vld [vmem:[#allocation7 + $0x3f0] sm:$0xf0]  ;;  %v3843_v34 = vor.u32 %v5230_v23, %v3842_v22  ;;  %v3815_v48 = vor.u32 %v5218_v42, %v3812_v43 }
  0x50   : > { %v3644_v6 = vld [vmem:[#allocation7 + $0x68] sm:$0xf0]  ;;  %v3610_v11 = vld [vmem:[#allocation7 + $0x8] sm:$0xf]  ;;  %v3899_v13 = vor.u32 %v5245_v63, %v3898_v61  ;;  %v4103_v40 = vor.u32 %v5290_v31, %v4100_v32  ;;  %v3778_v49 = vld [vmem:[#allocation7 + $0x150] sm:$0xf] }
  0x51   : > { %1000 = vmatpush.bf16.msrb.mxu1 %v3995_v33  ;;  %1028 = vmatpush.bf16.msrb.mxu3 %v3999_v38  ;;  %v5241_v8 = vld [vmem:[#allocation7 + $0x24c] sm:$0xf]  ;;  %v5173_v12 = vld [vmem:[#allocation7 + $0x24] sm:$0xf0]  ;;  %v3647_v14 = vor.u32 %v5177_v5, %v3644_v6  ;;  %v5222_v38 = vld [vmem:[#allocation7 + $0x1ac] sm:$0xf0] }
  0x52   : > { %v3900_v9 = vld [vmem:[#allocation7 + $0x268] sm:$0xf0]  ;;  %v3866_v15 = vld [vmem:[#allocation7 + $0x208] sm:$0xf]  ;;  %v3611_v25 = vor.u32 %v5173_v12, %v3610_v11  ;;  %v4034_v51 = vld [vmem:[#allocation7 + $0x350] sm:$0xf] }
  0x53   : > { %987 = vmatpush.bf16.msrb.mxu0 %v3707_v44  ;;  %1015 = vmatpush.bf16.msrb.mxu2 %v3711_v46  ;;  %v5237_v16 = vld [vmem:[#allocation7 + $0x224] sm:$0xf0]  ;;  %v5169_v17 = vld [vmem:[#allocation7 + $0xc] sm:$0xf]  ;;  %v3903_v18 = vor.u32 %v5241_v8, %v3900_v9  ;;  %v5282_v44 = vld [vmem:[#allocation7 + $0x394] sm:$0xf]  ;;  %v3811_v46 = vor.u32 %v5222_v38, %v3810_v37 }
  0x54   : > { %v3612_v19 = vld [vmem:[#allocation7 + $0x28] sm:$0xf0]  ;;  %v3867_v29 = vor.u32 %v5237_v16, %v3866_v15  ;;  %v5278_v53 = vld [vmem:[#allocation7 + $0x36c] sm:$0xf0]  ;;  %v5210_v54 = vld [vmem:[#allocation7 + $0x154] sm:$0xf] }
  0x55   : > { %1001 = vmatpush.bf16.msrb.mxu1 %v3963_v45  ;;  %1029 = vmatpush.bf16.msrb.mxu3 %v3967_v50  ;;  %v5233_v20 = vld [vmem:[#allocation7 + $0x20c] sm:$0xf]  ;;  %v3615_v30 = vor.u32 %v5169_v17, %v3612_v19  ;;  %v4068_v45 = vld [vmem:[#allocation7 + $0x3b0] sm:$0xf0]  ;;  %v5214_v50 = vld [vmem:[#allocation7 + $0x16c] sm:$0xf0]  ;;  %v4035_v59 = vor.u32 %v5278_v53, %v4034_v51 }
  0x56   : > { %v3868_v21 = vld [vmem:[#allocation7 + $0x228] sm:$0xf0]  ;;  %v4071_v52 = vor.u32 %v5282_v44, %v4068_v45  ;;  %v3780_v55 = vld [vmem:[#allocation7 + $0x170] sm:$0xf0]  ;;  %v3746_v61 = vld [vmem:[#allocation7 + $0x110] sm:$0xf] }
  0x57   : > { %988 = vmatpush.bf16.msrb.mxu0 %v3675_v56  ;;  %1016 = vmatpush.bf16.msrb.mxu2 %v3679_v58  ;;  %v3871_v33 = vor.u32 %v5233_v20, %v3868_v21  ;;  %v5274_v56 = vld [vmem:[#allocation7 + $0x354] sm:$0xf]  ;;  %v3779_v58 = vor.u32 %v5214_v50, %v3778_v49  ;;  %v3783_v60 = vor.u32 %v5210_v54, %v3780_v55  ;;  %v4002_v63 = vld [vmem:[#allocation7 + $0x310] sm:$0xf] }
  0x58   : > { %v5270_v6 = vld [vmem:[#allocation7 + $0x32c] sm:$0xf0]  ;;  %v5202_v8 = vld [vmem:[#allocation7 + $0x114] sm:$0xf] }
  0x59   : > { %1002 = vmatpush.bf16.msrb.mxu1 %v3931_v57  ;;  %1030 = vmatpush.bf16.msrb.mxu3 %v3935_v62  ;;  %v4036_v57 = vld [vmem:[#allocation7 + $0x370] sm:$0xf0]  ;;  %v5206_v62 = vld [vmem:[#allocation7 + $0x12c] sm:$0xf0] }
  0x5a   : > { %v4039_v5 = vor.u32 %v5274_v56, %v4036_v57  ;;  %v3748_v9 = vld [vmem:[#allocation7 + $0x130] sm:$0xf0]  ;;  %v3747_v12 = vor.u32 %v5206_v62, %v3746_v61  ;;  %v3714_v15 = vld [vmem:[#allocation7 + $0xd0] sm:$0xf]  ;;  %v5231_v61 = vld [vmem:[#allocation7 + $0x1f4] sm:$0xf0] }
  0x5b   : > { %989 = vmatpush.bf16.msrb.mxu0 %v3643_v10  ;;  %1017 = vmatpush.bf16.msrb.mxu2 %v3647_v14  ;;  %v5266_v10 = vld [vmem:[#allocation7 + $0x314] sm:$0xf]  ;;  %v3751_v14 = vor.u32 %v5202_v8, %v3748_v9  ;;  %v5198_v16 = vld [vmem:[#allocation7 + $0xec] sm:$0xf0]  ;;  %v4106_v62 = vld [vmem:[#allocation7 + $0x3d8] sm:$0xf] }
  0x5c   : > { %v4004_v11 = vld [vmem:[#allocation7 + $0x330] sm:$0xf0]  ;;  %v3970_v17 = vld [vmem:[#allocation7 + $0x2d0] sm:$0xf]  ;;  %v3715_v24 = vor.u32 %v5198_v16, %v3714_v15  ;;  %v3852_v8 = vld [vmem:[#allocation7 + $0x1f8] sm:$0xf0] }
  0x5d   : > { %1003 = vmatpush.bf16.msrb.mxu1 %v3899_v13  ;;  %1031 = vmatpush.bf16.msrb.mxu3 %v3903_v18  ;;  %v4003_v13 = vor.u32 %v5270_v6, %v4002_v63  ;;  %v4007_v18 = vor.u32 %v5266_v10, %v4004_v11  ;;  %v5262_v19 = vld [vmem:[#allocation7 + $0x2ec] sm:$0xf0]  ;;  %v5194_v20 = vld [vmem:[#allocation7 + $0xd4] sm:$0xf]  ;;  %v5227_v6 = vld [vmem:[#allocation7 + $0x1dc] sm:$0xf] }
  0x5e   : > { %v3716_v21 = vld [vmem:[#allocation7 + $0xf0] sm:$0xf0]  ;;  %v5190_v28 = vld [vmem:[#allocation7 + $0xac] sm:$0xf0]  ;;  %v5291_v11 = vld [vmem:[#allocation7 + $0x3dc] sm:$0xf]  ;;  %v3855_v16 = vor.u32 %v5227_v6, %v3852_v8 }
  0x5f   : > { %990 = vmatpush.bf16.msrb.mxu0 %v3611_v25  ;;  %1018 = vmatpush.bf16.msrb.mxu2 %v3615_v30  ;;  %v5258_v22 = vld [vmem:[#allocation7 + $0x2d4] sm:$0xf]  ;;  %v3971_v25 = vor.u32 %v5262_v19, %v3970_v17  ;;  %v3719_v26 = vor.u32 %v5194_v20, %v3716_v21  ;;  %v5254_v31 = vld [vmem:[#allocation7 + $0x2ac] sm:$0xf0]  ;;  %v3818_v17 = vld [vmem:[#allocation7 + $0x198] sm:$0xf] }
  0x60   : > { %v3972_v23 = vld [vmem:[#allocation7 + $0x2f0] sm:$0xf0]  ;;  %v3650_v39 = vld [vmem:[#allocation7 + $0x50] sm:$0xf]  ;;  %v4074_v19 = vld [vmem:[#allocation7 + $0x398] sm:$0xf] }
  0x61   : > { %1004 = vmatpush.bf16.msrb.mxu1 %v3867_v29  ;;  %1032 = vmatpush.bf16.msrb.mxu3 %v3871_v33  ;;  %v3938_v29 = vld [vmem:[#allocation7 + $0x290] sm:$0xf]  ;;  %v3975_v30 = vor.u32 %v5258_v22, %v3972_v23  ;;  %v5186_v32 = vld [vmem:[#allocation7 + $0x94] sm:$0xf]  ;;  %v5287_v21 = vld [vmem:[#allocation7 + $0x3b4] sm:$0xf0] }
  0x62   : > { %1019 = vmatmul.bf16.vlgmr.msrb.gmra.mxu2 %v5965_v4  ;;  %991 = vmatmul.bf16.vlgmr.msrb.gmra.mxu0 %v5965_v4  ;;  %v3684_v33 = vld [vmem:[#allocation7 + $0xb0] sm:$0xf0]  ;;  %v3939_v37 = vor.u32 %v5254_v31, %v3938_v29  ;;  %v3906_v41 = vld [vmem:[#allocation7 + $0x250] sm:$0xf]  ;;  %v5219_v22 = vld [vmem:[#allocation7 + $0x19c] sm:$0xf] }
  0x63   : > { %1039 = vmatpush.bf16.msra.mxu0 %v3843_v34  ;;  %1067 = vmatpush.bf16.msra.mxu2 %v3847_v36  ;;  %v5250_v34 = vld [vmem:[#allocation7 + $0x294] sm:$0xf]  ;;  %v3683_v36 = vor.u32 %v5190_v28, %v3682_v27  ;;  %v3687_v38 = vor.u32 %v5186_v32, %v3684_v33  ;;  %v5246_v43 = vld [vmem:[#allocation7 + $0x26c] sm:$0xf0]  ;;  %v3820_v23 = vld [vmem:[#allocation7 + $0x1b8] sm:$0xf0]  ;;  %v4075_v27 = vor.u32 %v5287_v21, %v4074_v19 }
  0x64   : > { %1033 = vmatmul.bf16.vlgmr.msrb.gmra.mxu3 %v5967_v7  ;;  %1005 = vmatmul.bf16.vlgmr.msrb.gmra.mxu1 %v5967_v7  ;;  %v5178_v44 = vld [vmem:[#allocation7 + $0x54] sm:$0xf]  ;;  %v3618_v49 = vld [vmem:[#allocation7 + $0x10] sm:$0xf]  ;;  %v3907_v51 = vor.u32 %v5246_v43, %v3906_v41  ;;  %v3823_v28 = vor.u32 %v5219_v22, %v3820_v23  ;;  %v3786_v29 = vld [vmem:[#allocation7 + $0x158] sm:$0xf] }
  0x65   : > { %1053 = vmatpush.bf16.msra.mxu1 %v4099_v35  ;;  %1081 = vmatpush.bf16.msra.mxu3 %v4103_v40  ;;  %v3940_v35 = vld [vmem:[#allocation7 + $0x2b0] sm:$0xf0]  ;;  %v5182_v40 = vld [vmem:[#allocation7 + $0x6c] sm:$0xf0]  ;;  %v4042_v31 = vld [vmem:[#allocation7 + $0x358] sm:$0xf] }
  0x66   : > { %v3943_v42 = vor.u32 %v5250_v34, %v3940_v35  ;;  %v3652_v45 = vld [vmem:[#allocation7 + $0x70] sm:$0xf0]  ;;  %v5174_v50 = vld [vmem:[#allocation7 + $0x2c] sm:$0xf0]  ;;  %v5279_v33 = vld [vmem:[#allocation7 + $0x374] sm:$0xf0] }
  0x67   : > { %1040 = vmatpush.bf16.msra.mxu0 %v3811_v46  ;;  %1068 = vmatpush.bf16.msra.mxu2 %v3815_v48  ;;  %v5242_v46 = vld [vmem:[#allocation7 + $0x254] sm:$0xf]  ;;  %v3651_v48 = vor.u32 %v5182_v40, %v3650_v39  ;;  %v3874_v53 = vld [vmem:[#allocation7 + $0x210] sm:$0xf]  ;;  %v3619_v63 = vor.u32 %v5174_v50, %v3618_v49  ;;  %v5211_v34 = vld [vmem:[#allocation7 + $0x15c] sm:$0xf]  ;;  %v4043_v39 = vor.u32 %v5279_v33, %v4042_v31 }
  0x68   : > { %v5238_v54 = vld [vmem:[#allocation7 + $0x22c] sm:$0xf0]  ;;  %v5170_v55 = vld [vmem:[#allocation7 + $0x14] sm:$0xf]  ;;  %v3788_v35 = vld [vmem:[#allocation7 + $0x178] sm:$0xf0] }
  0x69   : > { %1054 = vmatpush.bf16.msra.mxu1 %v4067_v47  ;;  %1082 = vmatpush.bf16.msra.mxu3 %v4071_v52  ;;  %v3908_v47 = vld [vmem:[#allocation7 + $0x270] sm:$0xf0]  ;;  %v3655_v52 = vor.u32 %v5178_v44, %v3652_v45  ;;  %v3875_v9 = vor.u32 %v5238_v54, %v3874_v53  ;;  %v3791_v40 = vor.u32 %v5211_v34, %v3788_v35  ;;  %v3754_v41 = vld [vmem:[#allocation7 + $0x118] sm:$0xf]  ;;  %v4012_v49 = vld [vmem:[#allocation7 + $0x338] sm:$0xf0] }
  0x6a   : > { %v3911_v56 = vor.u32 %v5242_v46, %v3908_v47  ;;  %v3620_v57 = vld [vmem:[#allocation7 + $0x30] sm:$0xf0]  ;;  %v4010_v43 = vld [vmem:[#allocation7 + $0x318] sm:$0xf]  ;;  %v5203_v46 = vld [vmem:[#allocation7 + $0x11c] sm:$0xf] }
  0x6b   : > { %1041 = vmatpush.bf16.msra.mxu0 %v3779_v58  ;;  %1069 = vmatpush.bf16.msra.mxu2 %v3783_v60  ;;  %v5234_v58 = vld [vmem:[#allocation7 + $0x214] sm:$0xf]  ;;  %v3850_v60 = vld [vmem:[#allocation7 + $0x1d8] sm:$0xf]  ;;  %v3623_v10 = vor.u32 %v5170_v55, %v3620_v57  ;;  %v3756_v47 = vld [vmem:[#allocation7 + $0x138] sm:$0xf0] }
  0x6c   : > { %v5271_v45 = vld [vmem:[#allocation7 + $0x334] sm:$0xf0] }
  0x6d   : > { %1055 = vmatpush.bf16.msra.mxu1 %v4035_v59  ;;  %1083 = vmatpush.bf16.msra.mxu3 %v4039_v5  ;;  %v3876_v59 = vld [vmem:[#allocation7 + $0x230] sm:$0xf0]  ;;  %v5295_v5 = vld [vmem:[#allocation7 + $0x3f4] sm:$0xf0] }
  0x6e   : > { %v4107_v15 = vor.u32 %v5295_v5, %v4106_v62  ;;  %v3722_v53 = vld [vmem:[#allocation7 + $0xd8] sm:$0xf] }
  0x6f   : > { %1042 = vmatpush.bf16.msra.mxu0 %v3747_v12  ;;  %1070 = vmatpush.bf16.msra.mxu2 %v3751_v14  ;;  %v4108_v12 = vld [vmem:[#allocation7 + $0x3f8] sm:$0xf0]  ;;  %v3851_v14 = vor.u32 %v5231_v61, %v3850_v60  ;;  %v5199_v54 = vld [vmem:[#allocation7 + $0xf4] sm:$0xf0] }
  0x70   : > { %v4111_v20 = vor.u32 %v5291_v11, %v4108_v12  ;;  %v3978_v55 = vld [vmem:[#allocation7 + $0x2d8] sm:$0xf]  ;;  %v5259_v60 = vld [vmem:[#allocation7 + $0x2dc] sm:$0xf]  ;;  %v3723_v62 = vor.u32 %v5199_v54, %v3722_v53 }
  0x71   : > { %1056 = vmatpush.bf16.msra.mxu1 %v4003_v13  ;;  %1084 = vmatpush.bf16.msra.mxu3 %v4007_v18  ;;  %v3879_v13 = vor.u32 %v5234_v58, %v3876_v59  ;;  %v5223_v18 = vld [vmem:[#allocation7 + $0x1b4] sm:$0xf0]  ;;  %v5195_v58 = vld [vmem:[#allocation7 + $0xdc] sm:$0xf] }
  0x72   : > { %v5263_v57 = vld [vmem:[#allocation7 + $0x2f4] sm:$0xf0]  ;;  %v3724_v59 = vld [vmem:[#allocation7 + $0xf8] sm:$0xf0] }
  0x73   : > { %1043 = vmatpush.bf16.msra.mxu0 %v3715_v24  ;;  %1071 = vmatpush.bf16.msra.mxu2 %v3719_v26  ;;  %v5283_v24 = vld [vmem:[#allocation7 + $0x39c] sm:$0xf]  ;;  %v3819_v26 = vor.u32 %v5223_v18, %v3818_v17  ;;  %v3727_v5 = vor.u32 %v5195_v58, %v3724_v59  ;;  %v3690_v6 = vld [vmem:[#allocation7 + $0x98] sm:$0xf] }
  0x74   : > { %v3980_v61 = vld [vmem:[#allocation7 + $0x2f8] sm:$0xf0]  ;;  %v5191_v8 = vld [vmem:[#allocation7 + $0xb4] sm:$0xf0] }
  0x75   : > { %1057 = vmatpush.bf16.msra.mxu1 %v3971_v25  ;;  %1085 = vmatpush.bf16.msra.mxu3 %v3975_v30  ;;  %v4076_v25 = vld [vmem:[#allocation7 + $0x3b8] sm:$0xf0]  ;;  %v5215_v30 = vld [vmem:[#allocation7 + $0x174] sm:$0xf0] }
  0x76   : > { %v4079_v32 = vor.u32 %v5283_v24, %v4076_v25  ;;  %v5255_v11 = vld [vmem:[#allocation7 + $0x2b4] sm:$0xf0]  ;;  %v5187_v12 = vld [vmem:[#allocation7 + $0x9c] sm:$0xf] }
  0x77   : > { %1044 = vmatpush.bf16.msra.mxu0 %v3683_v36  ;;  %1072 = vmatpush.bf16.msra.mxu2 %v3687_v38  ;;  %v5275_v36 = vld [vmem:[#allocation7 + $0x35c] sm:$0xf]  ;;  %v3787_v38 = vor.u32 %v5215_v30, %v3786_v29  ;;  %v3658_v19 = vld [vmem:[#allocation7 + $0x58] sm:$0xf] }
  0x78   : > { %v3914_v21 = vld [vmem:[#allocation7 + $0x258] sm:$0xf]  ;;  %v5179_v24 = vld [vmem:[#allocation7 + $0x5c] sm:$0xf] }
  0x79   : > { %1058 = vmatpush.bf16.msra.mxu1 %v3939_v37  ;;  %1086 = vmatpush.bf16.msra.mxu3 %v3943_v42  ;;  %v4044_v37 = vld [vmem:[#allocation7 + $0x378] sm:$0xf0]  ;;  %v5207_v42 = vld [vmem:[#allocation7 + $0x134] sm:$0xf0] }
  0x7a   : > { %v4047_v44 = vor.u32 %v5275_v36, %v4044_v37  ;;  %v3755_v50 = vor.u32 %v5207_v42, %v3754_v41  ;;  %v5247_v23 = vld [vmem:[#allocation7 + $0x274] sm:$0xf0]  ;;  %v3660_v25 = vld [vmem:[#allocation7 + $0x78] sm:$0xf0] }
  0x7b   : > { %1045 = vmatpush.bf16.msra.mxu0 %v3651_v48  ;;  %1073 = vmatpush.bf16.msra.mxu2 %v3655_v52  ;;  %v5267_v48 = vld [vmem:[#allocation7 + $0x31c] sm:$0xf]  ;;  %v3759_v52 = vor.u32 %v5203_v46, %v3756_v47  ;;  %v3915_v29 = vor.u32 %v5247_v23, %v3914_v21  ;;  %v3663_v30 = vor.u32 %v5179_v24, %v3660_v25  ;;  %v3626_v31 = vld [vmem:[#allocation7 + $0x18] sm:$0xf] }
  0x7c   : > { %v3882_v33 = vld [vmem:[#allocation7 + $0x218] sm:$0xf]  ;;  %v5171_v36 = vld [vmem:[#allocation7 + $0x1c] sm:$0xf] }
  0x7d   : > { %1059 = vmatpush.bf16.msra.mxu1 %v3907_v51  ;;  %1087 = vmatpush.bf16.msra.mxu3 %v3911_v56  ;;  %v4011_v51 = vor.u32 %v5271_v45, %v4010_v43  ;;  %v4015_v56 = vor.u32 %v5267_v48, %v4012_v49  ;;  %v5239_v35 = vld [vmem:[#allocation7 + $0x234] sm:$0xf0]  ;;  %v3628_v37 = vld [vmem:[#allocation7 + $0x38] sm:$0xf0] }
  0x7e   : > { %v3883_v41 = vor.u32 %v5239_v35, %v3882_v33  ;;  %v3631_v42 = vor.u32 %v5171_v36, %v3628_v37 }
  0x7f   : > { %1046 = vmatpush.bf16.msra.mxu0 %v3619_v63  ;;  %1074 = vmatpush.bf16.msra.mxu2 %v3623_v10  ;;  %v3979_v63 = vor.u32 %v5263_v57, %v3978_v55  ;;  %v3983_v10 = vor.u32 %v5259_v60, %v3980_v61 }
  0x81   : > { %1060 = vmatpush.bf16.msra.mxu1 %v3875_v9  ;;  %1088 = vmatpush.bf16.msra.mxu3 %v3879_v13  ;;  %v3946_v9 = vld [vmem:[#allocation7 + $0x298] sm:$0xf]  ;;  %v3692_v13 = vld [vmem:[#allocation7 + $0xb8] sm:$0xf0] }
  0x82   : > { %1075 = vmatmul.bf16.vlgmr.msra.gmra.mxu2 %v5965_v4  ;;  %1047 = vmatmul.bf16.vlgmr.msra.gmra.mxu0 %v5965_v4  ;;  %v3947_v17 = vor.u32 %v5255_v11, %v3946_v9  ;;  %v3695_v18 = vor.u32 %v5187_v12, %v3692_v13 }
  0x83   : > { %1095 = vmatpush.bf16.msrb.mxu0 %v3851_v14  ;;  %1123 = vmatpush.bf16.msrb.mxu2 %v3855_v16  ;;  %v5251_v14 = vld [vmem:[#allocation7 + $0x29c] sm:$0xf]  ;;  %v3691_v16 = vor.u32 %v5191_v8, %v3690_v6 }
  0x84   : > { %1089 = vmatmul.bf16.vlgmr.msra.gmra.mxu3 %v5967_v7  ;;  %1061 = vmatmul.bf16.vlgmr.msra.gmra.mxu1 %v5967_v7 }
  0x85   : > { %1109 = vmatpush.bf16.msrb.mxu1 %v4107_v15  ;;  %1137 = vmatpush.bf16.msrb.mxu3 %v4111_v20  ;;  %v3948_v15 = vld [vmem:[#allocation7 + $0x2b8] sm:$0xf0]  ;;  %v5183_v20 = vld [vmem:[#allocation7 + $0x74] sm:$0xf0] }
  0x86   : > { %v3951_v22 = vor.u32 %v5251_v14, %v3948_v15 }
  0x87   : > { %1096 = vmatpush.bf16.msrb.mxu0 %v3819_v26  ;;  %1124 = vmatpush.bf16.msrb.mxu2 %v3823_v28  ;;  %v5243_v26 = vld [vmem:[#allocation7 + $0x25c] sm:$0xf]  ;;  %v3659_v28 = vor.u32 %v5183_v20, %v3658_v19 }
  0x89   : > { %1110 = vmatpush.bf16.msrb.mxu1 %v4075_v27  ;;  %1138 = vmatpush.bf16.msrb.mxu3 %v4079_v32  ;;  %v3916_v27 = vld [vmem:[#allocation7 + $0x278] sm:$0xf0]  ;;  %v5175_v32 = vld [vmem:[#allocation7 + $0x34] sm:$0xf0] }
  0x8a   : > { %v3919_v34 = vor.u32 %v5243_v26, %v3916_v27 }
  0x8b   : > { %1097 = vmatpush.bf16.msrb.mxu0 %v3787_v38  ;;  %1125 = vmatpush.bf16.msrb.mxu2 %v3791_v40  ;;  %v5235_v38 = vld [vmem:[#allocation7 + $0x21c] sm:$0xf]  ;;  %v3627_v40 = vor.u32 %v5175_v32, %v3626_v31 }
  0x8d   : > { %1111 = vmatpush.bf16.msrb.mxu1 %v4043_v39  ;;  %1139 = vmatpush.bf16.msrb.mxu3 %v4047_v44  ;;  %v3884_v39 = vld [vmem:[#allocation7 + $0x238] sm:$0xf0]  ;;  %v5985_v44 = vld [vmem:[#allocation8] sm:$0xff] }
  0x8e   : > { %v3887_v43 = vor.u32 %v5235_v38, %v3884_v39  ;;  %v261_v47 = vperm.slane %v5985_v44, 0  ;;  %v262_v48 = vperm.slane %v5985_v44, 1  ;;  %v263_v15 = vperm.slane %v5985_v44, 2  ;;  %v5297_v39 = vld [vmem:[#allocation5 + $0x8] sm:$0xff] }
  0x8f   : > { %1098 = vmatpush.bf16.msrb.mxu0 %v3755_v50  ;;  %1126 = vmatpush.bf16.msrb.mxu2 %v3759_v52 }
  0x91   : > { %1112 = vmatpush.bf16.msrb.mxu1 %v4011_v51  ;;  %1140 = vmatpush.bf16.msrb.mxu3 %v4015_v56 }
  0x93   : > { %1099 = vmatpush.bf16.msrb.mxu0 %v3723_v62  ;;  %1127 = vmatpush.bf16.msrb.mxu2 %v3727_v5 }
  0x95   : > { %1113 = vmatpush.bf16.msrb.mxu1 %v3979_v63  ;;  %1141 = vmatpush.bf16.msrb.mxu3 %v3983_v10 }
  0x97   : > { %1100 = vmatpush.bf16.msrb.mxu0 %v3691_v16  ;;  %1128 = vmatpush.bf16.msrb.mxu2 %v3695_v18  ;;  %v264_v16 = vperm.slane %v5985_v44, 3 }
  0x99   : > { %1114 = vmatpush.bf16.msrb.mxu1 %v3947_v17  ;;  %1142 = vmatpush.bf16.msrb.mxu3 %v3951_v22 }
  0x9b   : > { %1101 = vmatpush.bf16.msrb.mxu0 %v3659_v28  ;;  %1129 = vmatpush.bf16.msrb.mxu2 %v3663_v30 }
  0x9d   : > { %1115 = vmatpush.bf16.msrb.mxu1 %v3915_v29  ;;  %1143 = vmatpush.bf16.msrb.mxu3 %v3919_v34 }
  0x9f   : > { %1102 = vmatpush.bf16.msrb.mxu0 %v3627_v40  ;;  %1130 = vmatpush.bf16.msrb.mxu2 %v3631_v42  ;;  %v5296_v40 = vld [vmem:[#allocation5] sm:$0xff] }
  0xa1   : > { %1116 = vmatpush.bf16.msrb.mxu1 %v3883_v41  ;;  %1144 = vmatpush.bf16.msrb.mxu3 %v3887_v43  ;;  %v265_v43 = vperm.slane %v5985_v44, 4 }
  0xa2   : > { %1103 = vmatmul.bf16.vlgmr.msrb.gmra.mxu0 %v5965_v4  ;;  %1131 = vmatmul.bf16.vlgmr.msrb.gmra.mxu2 %v5965_v4 }
  0xa4   : > { %1117 = vmatmul.bf16.vlgmr.msrb.gmra.mxu1 %v5967_v7  ;;  %1145 = vmatmul.bf16.vlgmr.msrb.gmra.mxu3 %v5967_v7 }
  0xbf   : > { %v936_v45 = vpop.f32.mrf.mxu0 }
  0xc0   : > { %v937_v50 = vadd.f32 %v936_v45, %v261_v47  ;;  %v266_v45 = vperm.slane %v5985_v44, 5 }
  0xc1   : > { %v950_v46 = vpop.f32.mrf.mxu1 }
  0xc2   : > { %v951_v54 = vadd.f32 %v950_v46, %v937_v50 }
  0xc5   : > { %v964_v49 = vpop.f32.mrf.mxu2 }
  0xc6   : > { %v965_v51 = vadd.f32 %v964_v49, %v262_v48 }
  0xc7   : > { %v978_v52 = vpop.f32.mrf.mxu3  ;;  %v938_v53 = vpop.f32.mrf.mxu0 }
  0xc8   : > { %v979_v55 = vadd.f32 %v978_v52, %v965_v51  ;;  %v939_v56 = vadd.f32 %v938_v53, %v261_v47 }
  0xc9   : > { %v952_v57 = vpop.f32.mrf.mxu1 }
  0xca   : > { %v1151_v59 = vpack.c.bf16 %v979_v55, %v951_v54  ;;  %v953_v61 = vadd.f32 %v952_v57, %v939_v56 }
  0xcc   : > { %v1218_v5 = vunpack.c.l.b16 %v1151_v59  ;;  %v1219_v6 = vunpack.c.h.b16 %v1151_v59 }
  0xcd   : > { %v966_v58 = vpop.f32.mrf.mxu2 }
  0xce   : > { %v967_v60 = vadd.f32 %v966_v58, %v262_v48 }
  0xcf   : > { %v980_v62 = vpop.f32.mrf.mxu3 }
  0xd0   : > { %v981_v63 = vadd.f32 %v980_v62, %v967_v60 }
  0xd2   : > { %v1155_v8 = vpack.c.bf16 %v981_v63, %v953_v61 }
  0xd4   : > { %v1220_v9 = vunpack.c.l.b16 %v1155_v8  ;;  %v1221_v10 = vunpack.c.h.b16 %v1155_v8 }
  0xd6   : > { %v1222_v11 = vpack.c.b16 %v1220_v9, %v1218_v5  ;;  %v1223_v12 = vpack.c.b16 %v1221_v10, %v1219_v6  ;;  %v5298_v10 = vld [vmem:[#allocation5 + $0x10] sm:$0xff] }
  0xd8   : > { %1236 = vmatpush.bf16.msra.mxu2 %v1222_v11  ;;  %1250 = vmatpush.bf16.msra.mxu3 %v1223_v12  ;;  %v4362_v12 = vld [vmem:[#allocation10 + $0x1c0] sm:$0xf] }
  0xdb   : > { %4122 = vmatmul.msk.bf16.vlgmr.msra.gmra.mxu2 %vm1179_vm0, %v5296_v40  ;;  %4123 = vmatmul.msk.bf16.vlgmr.msra.gmra.mxu3 %vm1179_vm0, %v5296_v40 }
  0xdf   : > { %v992_v13 = vpop.f32.mrf.mxu0 }
  0xe0   : > { %v993_v18 = vadd.f32 %v992_v13, %v263_v15  ;;  %v5360_v13 = vld [vmem:[#allocation10 + $0x1dc] sm:$0xf0] }
  0xe1   : > { %v1006_v14 = vpop.f32.mrf.mxu1 }
  0xe2   : > { %v1007_v22 = vadd.f32 %v1006_v14, %v993_v18  ;;  %v4618_v14 = vld [vmem:[#allocation10 + $0x3c0] sm:$0xf]  ;;  %v267_v18 = vperm.slane %v5985_v44, 6 }
  0xe5   : > { %v1020_v17 = vpop.f32.mrf.mxu2 }
  0xe6   : > { %v1021_v19 = vadd.f32 %v1020_v17, %v264_v16 }
  0xe7   : > { %v1034_v20 = vpop.f32.mrf.mxu3  ;;  %v994_v21 = vpop.f32.mrf.mxu0 }
  0xe8   : > { %v1035_v23 = vadd.f32 %v1034_v20, %v1021_v19  ;;  %v995_v24 = vadd.f32 %v994_v21, %v263_v15  ;;  %v4363_v15 = vor.u32 %v5360_v13, %v4362_v12  ;;  %v268_v19 = vperm.slane %v5985_v44, 7  ;;  %v5034_v13 = vld [vmem:[#allocation10 + $0x700] sm:$0xf] }
  0xe9   : > { %v1008_v25 = vpop.f32.mrf.mxu1 }
  0xea   : > { %v1152_v27 = vpack.c.bf16 %v1035_v23, %v1007_v22  ;;  %v1009_v29 = vadd.f32 %v1008_v25, %v995_v24 }
  0xec   : > { %v1171_v32 = vunpack.c.l.b16 %v1152_v27  ;;  %v1172_v33 = vunpack.c.h.b16 %v1152_v27 }
  0xed   : > { %v1022_v26 = vpop.f32.mrf.mxu2 }
  0xee   : > { %v1023_v28 = vadd.f32 %v1022_v26, %v264_v16  ;;  %v5424_v16 = vld [vmem:[#allocation10 + $0x3dc] sm:$0xf0] }
  0xef   : > { %v1036_v30 = vpop.f32.mrf.mxu3  ;;  %v4619_v17 = vor.u32 %v5424_v16, %v4618_v14  ;;  %v5528_v14 = vld [vmem:[#allocation10 + $0x71c] sm:$0xf0] }
  0xf0   : > { %v1037_v31 = vadd.f32 %v1036_v30, %v1023_v28  ;;  %v5035_v16 = vor.u32 %v5528_v14, %v5034_v13  ;;  %v4844_v13 = vld [vmem:[#allocation10 + $0x5a0] sm:$0xf0]  ;;  %v4170_v14 = vld [vmem:[#allocation10 + $0x40] sm:$0xf] }
  0xf2   : > { %v1156_v34 = vpack.c.bf16 %v1037_v31, %v1009_v29 }
  0xf4   : > { %v1173_v35 = vunpack.c.l.b16 %v1156_v34  ;;  %v1174_v36 = vunpack.c.h.b16 %v1156_v34 }
  0xf6   : > { %v1175_v37 = vpack.c.b16 %v1173_v35, %v1171_v32  ;;  %v1176_v38 = vpack.c.b16 %v1174_v36, %v1172_v33  ;;  %v4874_v36 = vld [vmem:[#allocation10 + $0x5c0] sm:$0xf] }
  0xf8   : > { %1190 = vmatpush.bf16.msra.mxu0 %v1175_v37  ;;  %1204 = vmatpush.bf16.msra.mxu1 %v1176_v38  ;;  %v5488_v37 = vld [vmem:[#allocation10 + $0x5dc] sm:$0xf0] }
  0xf9   : > { %v5130_v38 = vld [vmem:[#allocation10 + $0x7c0] sm:$0xf] }
  0xfb   : > { %4116 = vmatmul.msk.bf16.vlgmr.msra.gmra.mxu0 %vm1179_vm0, %v5297_v39  ;;  %4117 = vmatmul.msk.bf16.vlgmr.msra.gmra.mxu1 %vm1179_vm0, %v5297_v39  ;;  %v5552_v39 = vld [vmem:[#allocation10 + $0x7dc] sm:$0xf0] }
  0xff   : > { %v1048_v41 = vpop.f32.mrf.mxu0 }
 0x100   : > { %v1049_v47 = vadd.f32 %v1048_v41, %v265_v43 }
 0x101   : > { %v1062_v42 = vpop.f32.mrf.mxu1 }
 0x102   : > { %v1063_v51 = vadd.f32 %v1062_v42, %v1049_v47  ;;  %v4842_v47 = vld [vmem:[#allocation10 + $0x580] sm:$0xf] }
 0x105   : > { %v1076_v46 = vpop.f32.mrf.mxu2 }
 0x106   : > { %v1077_v48 = vadd.f32 %v1076_v46, %v266_v45  ;;  %v5131_v46 = vor.u32 %v5552_v39, %v5130_v38  ;;  %v4682_v38 = vld [vmem:[#allocation10 + $0x440] sm:$0xf] }
 0x107   : > { %v1090_v49 = vpop.f32.mrf.mxu3  ;;  %v1050_v50 = vpop.f32.mrf.mxu0 }
 0x108   : > { %v1091_v52 = vadd.f32 %v1090_v49, %v1077_v48  ;;  %v1051_v53 = vadd.f32 %v1050_v50, %v265_v43  ;;  %v5480_v50 = vld [vmem:[#allocation10 + $0x59c] sm:$0xf0] }
 0x109   : > { %v1064_v54 = vpop.f32.mrf.mxu1 }
 0x10a   : > { %v1153_v56 = vpack.c.bf16 %v1091_v52, %v1063_v51  ;;  %v1065_v58 = vadd.f32 %v1064_v54, %v1051_v53  ;;  %v5098_v51 = vld [vmem:[#allocation10 + $0x780] sm:$0xf]  ;;  %v5299_v53 = vld [vmem:[#allocation5 + $0x18] sm:$0xff]  ;;  %v4843_v54 = vor.u32 %v5480_v50, %v4842_v47 }
 0x10b   : > { %v5544_v52 = vld [vmem:[#allocation10 + $0x79c] sm:$0xf0] }
 0x10c   : > { %v1267_v61 = vunpack.c.l.b16 %v1153_v56  ;;  %v1268_v62 = vunpack.c.h.b16 %v1153_v56  ;;  %v4810_v56 = vld [vmem:[#allocation10 + $0x540] sm:$0xf] }
 0x10d   : > { %v1078_v55 = vpop.f32.mrf.mxu2  ;;  %v5392_v47 = vld [vmem:[#allocation10 + $0x2dc] sm:$0xf0] }
 0x10e   : > { %v1079_v57 = vadd.f32 %v1078_v55, %v266_v45  ;;  %v4875_v45 = vor.u32 %v5488_v37, %v4874_v36  ;;  %v5099_v55 = vor.u32 %v5544_v52, %v5098_v51  ;;  %v5512_v37 = vld [vmem:[#allocation10 + $0x69c] sm:$0xf0] }
 0x10f   : > { %v1092_v59 = vpop.f32.mrf.mxu3  ;;  %v5504_v50 = vld [vmem:[#allocation10 + $0x65c] sm:$0xf0] }
 0x110   : > { %v1093_v60 = vadd.f32 %v1092_v59, %v1079_v57  ;;  %v5472_v57 = vld [vmem:[#allocation10 + $0x55c] sm:$0xf0] }
 0x111   : > { %v5536_v59 = vld [vmem:[#allocation10 + $0x75c] sm:$0xf0] }
 0x112   : > { %v1157_v63 = vpack.c.bf16 %v1093_v60, %v1065_v58  ;;  %v5066_v58 = vld [vmem:[#allocation10 + $0x740] sm:$0xf]  ;;  %v4811_v60 = vor.u32 %v5472_v57, %v4810_v56  ;;  %v4876_v56 = vld [vmem:[#allocation10 + $0x5e0] sm:$0xf0] }
 0x113   : > { %v4650_v52 = vld [vmem:[#allocation10 + $0x400] sm:$0xf] }
 0x114   : > { %v1269_v5 = vunpack.c.l.b16 %v1157_v63  ;;  %v1270_v6 = vunpack.c.h.b16 %v1157_v63  ;;  %v5464_v63 = vld [vmem:[#allocation10 + $0x51c] sm:$0xf0] }
 0x115   : > { %v4202_v57 = vld [vmem:[#allocation10 + $0x80] sm:$0xf] }
 0x116   : > { %v1271_v8 = vpack.c.b16 %v1269_v5, %v1267_v61  ;;  %v1272_v9 = vpack.c.b16 %v1270_v6, %v1268_v62  ;;  %v5067_v61 = vor.u32 %v5536_v59, %v5066_v58  ;;  %v4778_v62 = vld [vmem:[#allocation10 + $0x500] sm:$0xf] }
 0x117   : > { %v4330_v5 = vld [vmem:[#allocation10 + $0x180] sm:$0xf]  ;;  %v4779_v6 = vor.u32 %v5464_v63, %v4778_v62 }
 0x118   : > { %1285 = vmatpush.bf16.msrb.mxu0 %v1271_v8  ;;  %1299 = vmatpush.bf16.msrb.mxu1 %v1272_v9  ;;  %v5352_v8 = vld [vmem:[#allocation10 + $0x19c] sm:$0xf0] }
 0x119   : > { %v4586_v9 = vld [vmem:[#allocation10 + $0x380] sm:$0xf] }
 0x11a   : > { %v5320_v58 = vld [vmem:[#allocation10 + $0x9c] sm:$0xf0] }
 0x11b   : > { %4128 = vmatmul.msk.bf16.vlgmr.msrb.gmra.mxu0 %vm1179_vm0, %v5298_v10  ;;  %4129 = vmatmul.msk.bf16.vlgmr.msrb.gmra.mxu1 %vm1179_vm0, %v5298_v10  ;;  %v5416_v10 = vld [vmem:[#allocation10 + $0x39c] sm:$0xf0] }
 0x11c   : > { %2929 = vmatpush.bf16.msra.mxu0 %v4363_v15  ;;  %2943 = vmatpush.bf16.msra.mxu1 %v4619_v17  ;;  %v4587_v12 = vor.u32 %v5416_v10, %v4586_v9  ;;  %v4746_v15 = vld [vmem:[#allocation10 + $0x4c0] sm:$0xf]  ;;  %v5132_v9 = vld [vmem:[#allocation10 + $0x7e0] sm:$0xf0] }
 0x11d   : > { %v5456_v17 = vld [vmem:[#allocation10 + $0x4dc] sm:$0xf0] }
 0x11e   : > { %v5384_v62 = vld [vmem:[#allocation10 + $0x29c] sm:$0xf0] }
 0x11f   : > { %v1104_v11 = vpop.f32.mrf.mxu0  ;;  %v4906_v63 = vld [vmem:[#allocation10 + $0x600] sm:$0xf] }
 0x120   : > { %v1105_v23 = vadd.f32 %v1104_v11, %v267_v18  ;;  %v4331_v11 = vor.u32 %v5352_v8, %v4330_v5  ;;  %2944 = vmatpush.bf16.msra.mxu1 %v4587_v12  ;;  %v5548_v8 = vld [vmem:[#allocation10 + $0x7c4] sm:$0xf] }
 0x121   : > { %v1118_v20 = vpop.f32.mrf.mxu1  ;;  %v5476_v12 = vld [vmem:[#allocation10 + $0x584] sm:$0xf] }
 0x122   : > { %v1119_v26 = vadd.f32 %v1118_v20, %v1105_v23  ;;  %2930 = vmatpush.bf16.msra.mxu0 %v4331_v11  ;;  %v4747_v20 = vor.u32 %v5456_v17, %v4746_v15  ;;  %v5408_v23 = vld [vmem:[#allocation10 + $0x35c] sm:$0xf0]  ;;  %v5135_v11 = vor.u32 %v5548_v8, %v5132_v9  ;;  %v4847_v15 = vor.u32 %v5476_v12, %v4844_v13  ;;  %v4716_v8 = vld [vmem:[#allocation10 + $0x4a0] sm:$0xf0] }
 0x123   : > { %v4426_v17 = vld [vmem:[#allocation10 + $0x240] sm:$0xf]  ;;  %v4268_v12 = vld [vmem:[#allocation10 + $0x120] sm:$0xf0] }
 0x124   : > { %v5396_v13 = vld [vmem:[#allocation10 + $0x304] sm:$0xf] }
 0x125   : > { %v1132_v21 = vpop.f32.mrf.mxu2 }
 0x126   : > { %v1133_v24 = vadd.f32 %v1132_v21, %v268_v19 }
 0x127   : > { %v1146_v22 = vpop.f32.mrf.mxu3  ;;  %v1106_v25 = vpop.f32.mrf.mxu0 }
 0x128   : > { %v1147_v27 = vadd.f32 %v1146_v22, %v1133_v24  ;;  %v1107_v28 = vadd.f32 %v1106_v25, %v267_v18  ;;  %v4298_v18 = vld [vmem:[#allocation10 + $0x140] sm:$0xf] }
 0x129   : > { %v1120_v31 = vpop.f32.mrf.mxu1  ;;  %v4554_v22 = vld [vmem:[#allocation10 + $0x340] sm:$0xf] }
 0x12a   : > { %v1154_v33 = vpack.c.bf16 %v1147_v27, %v1119_v26  ;;  %v1121_v34 = vadd.f32 %v1120_v31, %v1107_v28  ;;  %v5002_v24 = vld [vmem:[#allocation10 + $0x6c0] sm:$0xf]  ;;  %v4555_v25 = vor.u32 %v5408_v23, %v4554_v22  ;;  %v5100_v22 = vld [vmem:[#allocation10 + $0x7a0] sm:$0xf0] }
 0x12b   : > { %v5520_v26 = vld [vmem:[#allocation10 + $0x6dc] sm:$0xf0]  ;;  %v5468_v23 = vld [vmem:[#allocation10 + $0x544] sm:$0xf] }
 0x12c   : > { %v1320_v40 = vunpack.c.l.b16 %v1154_v33  ;;  %v1321_v41 = vunpack.c.h.b16 %v1154_v33  ;;  %v5003_v27 = vor.u32 %v5520_v26, %v5002_v24  ;;  %2945 = vmatpush.bf16.msra.mxu1 %v4555_v25  ;;  %v4714_v28 = vld [vmem:[#allocation10 + $0x480] sm:$0xf]  ;;  %v4812_v25 = vld [vmem:[#allocation10 + $0x560] sm:$0xf0] }
 0x12d   : > { %v1134_v29 = vpop.f32.mrf.mxu2  ;;  %v4522_v33 = vld [vmem:[#allocation10 + $0x300] sm:$0xf] }
 0x12e   : > { %v1135_v30 = vadd.f32 %v1134_v29, %v268_v19  ;;  %v5344_v19 = vld [vmem:[#allocation10 + $0x15c] sm:$0xf0] }
 0x12f   : > { %v1148_v32 = vpop.f32.mrf.mxu3  ;;  %v4299_v21 = vor.u32 %v5344_v19, %v4298_v18  ;;  %v5448_v29 = vld [vmem:[#allocation10 + $0x49c] sm:$0xf0] }
 0x130   : > { %v1149_v35 = vadd.f32 %v1148_v32, %v1135_v30  ;;  %v4266_v30 = vld [vmem:[#allocation10 + $0x100] sm:$0xf]  ;;  %v4715_v31 = vor.u32 %v5448_v29, %v4714_v28  ;;  %v4815_v28 = vor.u32 %v5468_v23, %v4812_v25  ;;  %v5324_v23 = vld [vmem:[#allocation10 + $0xc4] sm:$0xf] }
 0x131   : > { %2931 = vmatpush.bf16.msra.mxu0 %v4299_v21  ;;  %v5336_v32 = vld [vmem:[#allocation10 + $0x11c] sm:$0xf0]  ;;  %v5540_v21 = vld [vmem:[#allocation10 + $0x784] sm:$0xf] }
 0x132   : > { %v1158_v44 = vpack.c.bf16 %v1149_v35, %v1121_v34  ;;  %v5400_v34 = vld [vmem:[#allocation10 + $0x31c] sm:$0xf0]  ;;  %v4267_v35 = vor.u32 %v5336_v32, %v4266_v30  ;;  %v5103_v24 = vor.u32 %v5540_v21, %v5100_v22  ;;  %v5356_v32 = vld [vmem:[#allocation10 + $0x1c4] sm:$0xf] }
 0x133   : > { %v4523_v36 = vor.u32 %v5400_v34, %v4522_v33  ;;  %v5376_v18 = vld [vmem:[#allocation10 + $0x25c] sm:$0xf0]  ;;  %v4364_v34 = vld [vmem:[#allocation10 + $0x1e0] sm:$0xf0] }
 0x134   : > { %v1322_v42 = vunpack.c.l.b16 %v1158_v44  ;;  %v1323_v43 = vunpack.c.h.b16 %v1158_v44  ;;  %v4970_v44 = vld [vmem:[#allocation10 + $0x680] sm:$0xf]  ;;  %v4684_v21 = vld [vmem:[#allocation10 + $0x460] sm:$0xf0] }
 0x135   : > { %v4971_v39 = vor.u32 %v5512_v37, %v4970_v44  ;;  %2932 = vmatpush.bf16.msra.mxu0 %v4267_v35  ;;  %2946 = vmatpush.bf16.msra.mxu1 %v4523_v36  ;;  %v4138_v26 = vld [vmem:[#allocation10] sm:$0xf]  ;;  %v5420_v35 = vld [vmem:[#allocation10 + $0x3c4] sm:$0xf]  ;;  %v4367_v44 = vor.u32 %v5356_v32, %v4364_v34 }
 0x136   : > { %v1324_v48 = vpack.c.b16 %v1322_v42, %v1320_v40  ;;  %v1325_v49 = vpack.c.b16 %v1323_v43, %v1321_v41  ;;  %v5440_v40 = vld [vmem:[#allocation10 + $0x45c] sm:$0xf0]  ;;  %v4620_v36 = vld [vmem:[#allocation10 + $0x3e0] sm:$0xf0] }
 0x137   : > { %v4234_v41 = vld [vmem:[#allocation10 + $0xc0] sm:$0xf]  ;;  %v4683_v43 = vor.u32 %v5440_v40, %v4682_v38  ;;  %v4623_v37 = vor.u32 %v5420_v35, %v4620_v36  ;;  %v5532_v38 = vld [vmem:[#allocation10 + $0x744] sm:$0xf]  ;;  %v4882_v35 = vld [vmem:[#allocation10 + $0x5c8] sm:$0xf] }
 0x138   : > { %1338 = vmatpush.bf16.msrb.mxu2 %v1324_v48  ;;  %1352 = vmatpush.bf16.msrb.mxu3 %v1325_v49  ;;  %v5328_v42 = vld [vmem:[#allocation10 + $0xdc] sm:$0xf0]  ;;  %v5460_v40 = vld [vmem:[#allocation10 + $0x504] sm:$0xf]  ;;  %v5489_v36 = vld [vmem:[#allocation10 + $0x5e4] sm:$0xf0] }
 0x139   : > { %v4938_v48 = vld [vmem:[#allocation10 + $0x640] sm:$0xf]  ;;  %v5388_v25 = vld [vmem:[#allocation10 + $0x2c4] sm:$0xf] }
 0x13a   : > { %v4939_v51 = vor.u32 %v5504_v50, %v4938_v48  ;;  %v4394_v30 = vld [vmem:[#allocation10 + $0x200] sm:$0xf]  ;;  %v5412_v48 = vld [vmem:[#allocation10 + $0x384] sm:$0xf] }
 0x13b   : > { %4134 = vmatmul.msk.bf16.vlgmr.msrb.gmra.mxu2 %vm1179_vm0, %v5299_v53  ;;  %4135 = vmatmul.msk.bf16.vlgmr.msrb.gmra.mxu3 %vm1179_vm0, %v5299_v53  ;;  %v5432_v53 = vld [vmem:[#allocation10 + $0x41c] sm:$0xf0]  ;;  %v5524_v50 = vld [vmem:[#allocation10 + $0x704] sm:$0xf] }
 0x13c   : > { %2957 = vmatpush.bf16.msra.mxu2 %v4875_v45  ;;  %2971 = vmatpush.bf16.msra.mxu3 %v5131_v46  ;;  %v4235_v45 = vor.u32 %v5328_v42, %v4234_v41  ;;  %v4490_v46 = vld [vmem:[#allocation10 + $0x2c0] sm:$0xf]  ;;  %v4780_v42 = vld [vmem:[#allocation10 + $0x520] sm:$0xf0] }
 0x13d   : > { %v4491_v49 = vor.u32 %v5392_v47, %v4490_v46  ;;  %v4783_v46 = vor.u32 %v5460_v40, %v4780_v42  ;;  %v5428_v32 = vld [vmem:[#allocation10 + $0x404] sm:$0xf] }
 0x13e   : > { %2933 = vmatpush.bf16.msra.mxu0 %v4235_v45  ;;  %v4332_v45 = vld [vmem:[#allocation10 + $0x1a0] sm:$0xf0] }
 0x13f   : > { %2947 = vmatpush.bf16.msra.mxu1 %v4491_v49  ;;  %v4588_v49 = vld [vmem:[#allocation10 + $0x3a0] sm:$0xf0] }
 0x140   : > { %2958 = vmatpush.bf16.msra.mxu2 %v4843_v54  ;;  %2972 = vmatpush.bf16.msra.mxu3 %v5099_v55  ;;  %v5484_v54 = vld [vmem:[#allocation10 + $0x5c4] sm:$0xf]  ;;  %v4651_v55 = vor.u32 %v5432_v53, %v4650_v52 }
 0x141   : > { %v4879_v59 = vor.u32 %v5484_v54, %v4876_v56  ;;  %v5036_v52 = vld [vmem:[#allocation10 + $0x720] sm:$0xf0] }
 0x142   : > { %v5452_v53 = vld [vmem:[#allocation10 + $0x4c4] sm:$0xf] }
 0x143   : > { %v4748_v54 = vld [vmem:[#allocation10 + $0x4e0] sm:$0xf0] }
 0x144   : > { %2959 = vmatpush.bf16.msra.mxu2 %v4811_v60  ;;  %2973 = vmatpush.bf16.msra.mxu3 %v5067_v61  ;;  %v4203_v60 = vor.u32 %v5320_v58, %v4202_v57  ;;  %v4458_v61 = vld [vmem:[#allocation10 + $0x280] sm:$0xf]  ;;  %v4751_v56 = vor.u32 %v5452_v53, %v4748_v54  ;;  %v5340_v57 = vld [vmem:[#allocation10 + $0x144] sm:$0xf]  ;;  %v5481_v53 = vld [vmem:[#allocation10 + $0x5a4] sm:$0xf0] }
 0x145   : > { %v4459_v5 = vor.u32 %v5384_v62, %v4458_v61  ;;  %v4300_v58 = vld [vmem:[#allocation10 + $0x160] sm:$0xf0] }
 0x146   : > { %2934 = vmatpush.bf16.msra.mxu0 %v4203_v60  ;;  %v4556_v60 = vld [vmem:[#allocation10 + $0x360] sm:$0xf0] }
 0x147   : > { %2948 = vmatpush.bf16.msra.mxu1 %v4459_v5  ;;  %v5516_v61 = vld [vmem:[#allocation10 + $0x6c4] sm:$0xf] }
 0x148   : > { %2960 = vmatpush.bf16.msra.mxu2 %v4779_v6  ;;  %2974 = vmatpush.bf16.msra.mxu3 %v5035_v16  ;;  %v5496_v6 = vld [vmem:[#allocation10 + $0x61c] sm:$0xf0]  ;;  %v5004_v62 = vld [vmem:[#allocation10 + $0x6e0] sm:$0xf0] }
 0x149   : > { %v4907_v10 = vor.u32 %v5496_v6, %v4906_v63  ;;  %v5312_v16 = vld [vmem:[#allocation10 + $0x5c] sm:$0xf0]  ;;  %v4303_v63 = vor.u32 %v5340_v57, %v4300_v58  ;;  %v5444_v6 = vld [vmem:[#allocation10 + $0x484] sm:$0xf]  ;;  %v5007_v9 = vor.u32 %v5516_v61, %v5004_v62  ;;  %v5545_v61 = vld [vmem:[#allocation10 + $0x7a4] sm:$0xf0] }
 0x14a   : > { %v4171_v19 = vor.u32 %v5312_v16, %v4170_v14  ;;  %v5508_v16 = vld [vmem:[#allocation10 + $0x684] sm:$0xf] }
 0x14b   : > { %v4204_v40 = vld [vmem:[#allocation10 + $0xa0] sm:$0xf0] }
 0x14c   : > { %2961 = vmatpush.bf16.msra.mxu2 %v4747_v20  ;;  %2975 = vmatpush.bf16.msra.mxu3 %v5003_v27  ;;  %v4427_v20 = vor.u32 %v5376_v18, %v4426_v17  ;;  %v5304_v27 = vld [vmem:[#allocation10 + $0x1c] sm:$0xf0]  ;;  %v4972_v17 = vld [vmem:[#allocation10 + $0x6a0] sm:$0xf0] }
 0x14d   : > { %2935 = vmatpush.bf16.msra.mxu0 %v4171_v19  ;;  %v4139_v29 = vor.u32 %v5304_v27, %v4138_v26  ;;  %v4975_v19 = vor.u32 %v5508_v16, %v4972_v17  ;;  %v4492_v27 = vld [vmem:[#allocation10 + $0x2e0] sm:$0xf0] }
 0x14e   : > { %2949 = vmatpush.bf16.msra.mxu1 %v4427_v20  ;;  %v5436_v20 = vld [vmem:[#allocation10 + $0x444] sm:$0xf] }
 0x14f   : > { %v4687_v22 = vor.u32 %v5436_v20, %v4684_v21  ;;  %v5372_v57 = vld [vmem:[#allocation10 + $0x244] sm:$0xf]  ;;  %v5537_v20 = vld [vmem:[#allocation10 + $0x764] sm:$0xf0] }
 0x150   : > { %2962 = vmatpush.bf16.msra.mxu2 %v4715_v31  ;;  %2976 = vmatpush.bf16.msra.mxu3 %v4971_v39  ;;  %v5368_v31 = vld [vmem:[#allocation10 + $0x21c] sm:$0xf0]  ;;  %v5068_v39 = vld [vmem:[#allocation10 + $0x760] sm:$0xf0]  ;;  %v4786_v21 = vld [vmem:[#allocation10 + $0x508] sm:$0xf] }
 0x151   : > { %v4395_v33 = vor.u32 %v5368_v31, %v4394_v30  ;;  %2936 = vmatpush.bf16.msra.mxu0 %v4139_v29  ;;  %v5071_v41 = vor.u32 %v5532_v38, %v5068_v39  ;;  %v4940_v29 = vld [vmem:[#allocation10 + $0x660] sm:$0xf0]  ;;  %v4495_v30 = vor.u32 %v5388_v25, %v4492_v27  ;;  %v4883_v38 = vor.u32 %v5489_v36, %v4882_v35  ;;  %v5042_v25 = vld [vmem:[#allocation10 + $0x708] sm:$0xf] }
 0x152   : > { %v5316_v39 = vld [vmem:[#allocation10 + $0x84] sm:$0xf]  ;;  %v4722_v36 = vld [vmem:[#allocation10 + $0x488] sm:$0xf] }
 0x153   : > { %2950 = vmatpush.bf16.msra.mxu1 %v4395_v33  ;;  %v4652_v33 = vld [vmem:[#allocation10 + $0x420] sm:$0xf0]  ;;  %v4207_v42 = vor.u32 %v5316_v39, %v4204_v40 }
 0x154   : > { %2963 = vmatpush.bf16.msra.mxu2 %v4683_v43  ;;  %2977 = vmatpush.bf16.msra.mxu3 %v4939_v51  ;;  %v5348_v43 = vld [vmem:[#allocation10 + $0x184] sm:$0xf]  ;;  %v4591_v51 = vor.u32 %v5412_v48, %v4588_v49  ;;  %v4655_v34 = vor.u32 %v5428_v32, %v4652_v33  ;;  %v5138_v49 = vld [vmem:[#allocation10 + $0x7c8] sm:$0xf] }
 0x155   : > { %2985 = vmatpush.bf16.msrb.mxu0 %v4367_v44  ;;  %v4335_v47 = vor.u32 %v5348_v43, %v4332_v45  ;;  %v4460_v43 = vld [vmem:[#allocation10 + $0x2a0] sm:$0xf0] }
 0x156   : > { %v5492_v45 = vld [vmem:[#allocation10 + $0x604] sm:$0xf] }
 0x157   : > { %2999 = vmatpush.bf16.msrb.mxu1 %v4623_v37 }
 0x158   : > { %2964 = vmatpush.bf16.msra.mxu2 %v4651_v55  ;;  %2978 = vmatpush.bf16.msra.mxu3 %v4907_v10  ;;  %v5039_v55 = vor.u32 %v5524_v50, %v5036_v52  ;;  %v4719_v10 = vor.u32 %v5444_v6, %v4716_v8  ;;  %v5553_v50 = vld [vmem:[#allocation10 + $0x7e4] sm:$0xf0] }
 0x159   : > { %2986 = vmatpush.bf16.msrb.mxu0 %v4335_v47  ;;  %v4850_v52 = vld [vmem:[#allocation10 + $0x588] sm:$0xf] }
 0x15a   : > { %v4851_v54 = vor.u32 %v5481_v53, %v4850_v52  ;;  %v5473_v6 = vld [vmem:[#allocation10 + $0x564] sm:$0xf0] }
 0x15b   : > { %2965 = vmatmul.bf16.vlgmr.msra.gmra.mxu2 %v5965_v4  ;;  %2979 = vmatmul.bf16.vlgmr.msra.gmra.mxu3 %v5967_v7  ;;  %v4946_v53 = vld [vmem:[#allocation10 + $0x648] sm:$0xf] }
 0x15c   : > { %3013 = vmatpush.bf16.msrb.mxu2 %v4879_v59  ;;  %3027 = vmatpush.bf16.msrb.mxu3 %v5135_v11  ;;  %v5404_v59 = vld [vmem:[#allocation10 + $0x344] sm:$0xf] }
 0x15d   : > { %3000 = vmatpush.bf16.msrb.mxu1 %v4591_v51  ;;  %v4559_v5 = vor.u32 %v5404_v59, %v4556_v60  ;;  %2987 = vmatpush.bf16.msrb.mxu0 %v4303_v63  ;;  %v5332_v11 = vld [vmem:[#allocation10 + $0x104] sm:$0xf]  ;;  %v5139_v51 = vor.u32 %v5553_v50, %v5138_v49  ;;  %v5106_v60 = vld [vmem:[#allocation10 + $0x788] sm:$0xf] }
 0x15e   : > { %v4271_v14 = vor.u32 %v5332_v11, %v4268_v12  ;;  %v4428_v59 = vld [vmem:[#allocation10 + $0x260] sm:$0xf0]  ;;  %v5107_v63 = vor.u32 %v5545_v61, %v5106_v60  ;;  %v1238_v8 = vpop.f32.mrf.mxu2  ;;  %v5485_v61 = vld [vmem:[#allocation10 + $0x5cc] sm:$0xf] }
 0x15f   : > { %v4431_v62 = vor.u32 %v5372_v57, %v4428_v59  ;;  %v5300_v11 = vld [vmem:[#allocation10 + $0x4] sm:$0xf]  ;;  %v5433_v57 = vld [vmem:[#allocation10 + $0x424] sm:$0xf0] }
 0x160   : > { %3014 = vmatpush.bf16.msrb.mxu2 %v4847_v15  ;;  %3028 = vmatpush.bf16.msrb.mxu3 %v5103_v24  ;;  %v4524_v15 = vld [vmem:[#allocation10 + $0x320] sm:$0xf0] }
 0x161   : > { %3001 = vmatpush.bf16.msrb.mxu1 %v4559_v5  ;;  %v4527_v18 = vor.u32 %v5396_v13, %v4524_v15  ;;  %2988 = vmatpush.bf16.msrb.mxu0 %v4271_v14  ;;  %v4236_v24 = vld [vmem:[#allocation10 + $0xe0] sm:$0xf0]  ;;  %v4818_v5 = vld [vmem:[#allocation10 + $0x548] sm:$0xf] }
 0x162   : > { %v4239_v26 = vor.u32 %v5324_v23, %v4236_v24  ;;  %v4140_v12 = vld [vmem:[#allocation10 + $0x20] sm:$0xf0] }
 0x163   : > { %v5364_v13 = vld [vmem:[#allocation10 + $0x204] sm:$0xf]  ;;  %v4143_v14 = vor.u32 %v5300_v11, %v4140_v12  ;;  %v5497_v11 = vld [vmem:[#allocation10 + $0x624] sm:$0xf0]  ;;  %v5549_v12 = vld [vmem:[#allocation10 + $0x7cc] sm:$0xf] }
 0x164   : > { %3015 = vmatpush.bf16.msrb.mxu2 %v4815_v28  ;;  %3029 = vmatpush.bf16.msrb.mxu3 %v5071_v41  ;;  %v5500_v28 = vld [vmem:[#allocation10 + $0x644] sm:$0xf] }
 0x165   : > { %3002 = vmatpush.bf16.msrb.mxu1 %v4527_v18  ;;  %v4943_v31 = vor.u32 %v5500_v28, %v4940_v29  ;;  %2989 = vmatpush.bf16.msrb.mxu0 %v4239_v26  ;;  %v5380_v41 = vld [vmem:[#allocation10 + $0x284] sm:$0xf]  ;;  %v5529_v26 = vld [vmem:[#allocation10 + $0x724] sm:$0xf0] }
 0x166   : > { %v4463_v47 = vor.u32 %v5380_v41, %v4460_v43  ;;  %v4396_v15 = vld [vmem:[#allocation10 + $0x220] sm:$0xf0]  ;;  %v5043_v27 = vor.u32 %v5529_v26, %v5042_v25  ;;  %v4754_v28 = vld [vmem:[#allocation10 + $0x4c8] sm:$0xf]  ;;  %v1240_v32 = vpop.f32.mrf.mxu2  ;;  %v5108_v25 = vld [vmem:[#allocation10 + $0x7a8] sm:$0xf0] }
 0x167   : > { %v4399_v18 = vor.u32 %v5364_v13, %v4396_v15  ;;  %v5457_v29 = vld [vmem:[#allocation10 + $0x4e4] sm:$0xf0] }
 0x168   : > { %3016 = vmatpush.bf16.msrb.mxu2 %v4783_v46  ;;  %3030 = vmatpush.bf16.msrb.mxu3 %v5039_v55  ;;  %v4908_v46 = vld [vmem:[#allocation10 + $0x620] sm:$0xf0]  ;;  %v5513_v43 = vld [vmem:[#allocation10 + $0x6a4] sm:$0xf0] }
 0x169   : > { %3003 = vmatpush.bf16.msrb.mxu1 %v4495_v30  ;;  %v4911_v48 = vor.u32 %v5492_v45, %v4908_v46  ;;  %2990 = vmatpush.bf16.msrb.mxu0 %v4207_v42  ;;  %v5308_v55 = vld [vmem:[#allocation10 + $0x44] sm:$0xf]  ;;  %v4755_v30 = vor.u32 %v5457_v29, %v4754_v28  ;;  %v4978_v42 = vld [vmem:[#allocation10 + $0x688] sm:$0xf] }
 0x16a   : > { %v4979_v45 = vor.u32 %v5513_v43, %v4978_v42  ;;  %v4690_v46 = vld [vmem:[#allocation10 + $0x448] sm:$0xf]  ;;  %v5533_v42 = vld [vmem:[#allocation10 + $0x74c] sm:$0xf] }
 0x16b   : > { %v4370_v29 = vld [vmem:[#allocation10 + $0x1c8] sm:$0xf]  ;;  %v5076_v43 = vld [vmem:[#allocation10 + $0x768] sm:$0xf0] }
 0x16c   : > { %3017 = vmatpush.bf16.msrb.mxu2 %v4751_v56  ;;  %3031 = vmatpush.bf16.msrb.mxu3 %v5007_v9  ;;  %v4172_v56 = vld [vmem:[#allocation10 + $0x60] sm:$0xf0]  ;;  %v1252_v9 = vpop.f32.mrf.mxu3 }
 0x16d   : > { %3004 = vmatpush.bf16.msrb.mxu1 %v4463_v47  ;;  %v4175_v58 = vor.u32 %v5308_v55, %v4172_v56  ;;  %v5441_v47 = vld [vmem:[#allocation10 + $0x464] sm:$0xf0] }
 0x16e   : > { %v4691_v50 = vor.u32 %v5441_v47, %v4690_v46  ;;  %v4658_v56 = vld [vmem:[#allocation10 + $0x408] sm:$0xf] }
 0x16f   : > { %2991 = vmatpush.bf16.msrb.mxu0 %v4175_v58  ;;  %v4659_v60 = vor.u32 %v5433_v57, %v4658_v56  ;;  %v4338_v47 = vld [vmem:[#allocation10 + $0x188] sm:$0xf]  ;;  %v5525_v57 = vld [vmem:[#allocation10 + $0x70c] sm:$0xf] }
 0x170   : > { %3018 = vmatpush.bf16.msrb.mxu2 %v4719_v10  ;;  %3032 = vmatpush.bf16.msrb.mxu3 %v4975_v19  ;;  %v4819_v10 = vor.u32 %v5473_v6, %v4818_v5  ;;  %v5074_v19 = vld [vmem:[#allocation10 + $0x748] sm:$0xf] }
 0x171   : > { %3005 = vmatpush.bf16.msrb.mxu1 %v4431_v62  ;;  %v5075_v23 = vor.u32 %v5537_v20, %v5074_v19  ;;  %v4884_v62 = vld [vmem:[#allocation10 + $0x5e8] sm:$0xf0] }
 0x172   : > { %v4852_v19 = vld [vmem:[#allocation10 + $0x5a8] sm:$0xf0] }
 0x173   : > { %2992 = vmatpush.bf16.msrb.mxu0 %v4143_v14  ;;  %v5140_v14 = vld [vmem:[#allocation10 + $0x7e8] sm:$0xf0] }
 0x174   : > { %3019 = vmatpush.bf16.msrb.mxu2 %v4687_v22  ;;  %3033 = vmatpush.bf16.msrb.mxu3 %v4943_v31  ;;  %v5465_v22 = vld [vmem:[#allocation10 + $0x524] sm:$0xf0]  ;;  %v1254_v33 = vpop.f32.mrf.mxu3  ;;  %v5143_v15 = vor.u32 %v5549_v12, %v5140_v14  ;;  %v5445_v14 = vld [vmem:[#allocation10 + $0x48c] sm:$0xf] }
 0x175   : > { %3006 = vmatpush.bf16.msrb.mxu1 %v4399_v18  ;;  %v4787_v24 = vor.u32 %v5465_v22, %v4786_v21  ;;  %v5010_v31 = vld [vmem:[#allocation10 + $0x6c8] sm:$0xf]  ;;  %v5477_v18 = vld [vmem:[#allocation10 + $0x58c] sm:$0xf] }
 0x178   : > { %v6005_v44 = vpop.f32.mrf.mxu0  ;;  %v6007_v37 = vpop.f32.mrf.mxu1  ;;  %3020 = vmatpush.bf16.msrb.mxu2 %v4655_v34  ;;  %3034 = vmatpush.bf16.msrb.mxu3 %v4911_v48  ;;  %v5521_v34 = vld [vmem:[#allocation10 + $0x6e4] sm:$0xf0] }
 0x179   : > { %v5011_v35 = vor.u32 %v5521_v34, %v5010_v31  ;;  %v1239_v48 = vadd.f32 %v1238_v8, %v6005_v44  ;;  %v1253_v49 = vadd.f32 %v1252_v9, %v6007_v37  ;;  %v4887_v44 = vor.u32 %v5485_v61, %v4884_v62  ;;  %v4820_v31 = vld [vmem:[#allocation10 + $0x568] sm:$0xf0]  ;;  %v4626_v34 = vld [vmem:[#allocation10 + $0x3c8] sm:$0xf] }
 0x17a   : > { %v4306_v61 = vld [vmem:[#allocation10 + $0x148] sm:$0xf]  ;;  %v5453_v62 = vld [vmem:[#allocation10 + $0x4cc] sm:$0xf] }
 0x17b   : > { %3021 = vmatmul.bf16.vlgmr.msrb.gmra.mxu2 %v5965_v4  ;;  %3035 = vmatmul.bf16.vlgmr.msrb.gmra.mxu3 %v5967_v7 }
 0x17c   : > { %3069 = vmatpush.bf16.msra.mxu2 %v4883_v38  ;;  %3083 = vmatpush.bf16.msra.mxu3 %v5139_v51  ;;  %v5449_v38 = vld [vmem:[#allocation10 + $0x4a4] sm:$0xf0] }
 0x17d   : > { %v4723_v41 = vor.u32 %v5449_v38, %v4722_v36 }
 0x180   : > { %3070 = vmatpush.bf16.msra.mxu2 %v4851_v54  ;;  %3084 = vmatpush.bf16.msra.mxu3 %v5107_v63  ;;  %v1194_v16 = vpop.f32.mrf.mxu0  ;;  %v1208_v17 = vpop.f32.mrf.mxu1  ;;  %v5505_v54 = vld [vmem:[#allocation10 + $0x664] sm:$0xf0] }
 0x181   : > { %v4947_v55 = vor.u32 %v5505_v54, %v4946_v53  ;;  %v1241_v63 = vadd.f32 %v1240_v32, %v1194_v16  ;;  %v1255_v5 = vadd.f32 %v1254_v33, %v1208_v17  ;;  %v4855_v16 = vor.u32 %v5477_v18, %v4852_v19  ;;  %v5361_v33 = vld [vmem:[#allocation10 + $0x1e4] sm:$0xf0] }
 0x182   : > { %v4594_v53 = vld [vmem:[#allocation10 + $0x388] sm:$0xf] }
 0x183   : > { %v5417_v54 = vld [vmem:[#allocation10 + $0x3a4] sm:$0xf0] }
 0x184   : > { %3071 = vmatpush.bf16.msra.mxu2 %v4819_v10  ;;  %3085 = vmatpush.bf16.msra.mxu3 %v5075_v23  ;;  %v4914_v10 = vld [vmem:[#allocation10 + $0x608] sm:$0xf] }
 0x185   : > { %v4915_v13 = vor.u32 %v5497_v11, %v4914_v10  ;;  %v5012_v10 = vld [vmem:[#allocation10 + $0x6e8] sm:$0xf0]  ;;  %v5337_v18 = vld [vmem:[#allocation10 + $0x124] sm:$0xf0] }
 0x186   : > { %v4530_v19 = vld [vmem:[#allocation10 + $0x308] sm:$0xf] }
 0x188   : > { %3072 = vmatpush.bf16.msra.mxu2 %v4787_v24  ;;  %3086 = vmatpush.bf16.msra.mxu3 %v5043_v27  ;;  %v5541_v24 = vld [vmem:[#allocation10 + $0x78c] sm:$0xf] }
 0x189   : > { %v5111_v28 = vor.u32 %v5541_v24, %v5108_v25  ;;  %v4242_v25 = vld [vmem:[#allocation10 + $0xc8] sm:$0xf] }
 0x18c   : > { %3073 = vmatpush.bf16.msra.mxu2 %v4755_v30  ;;  %3087 = vmatpush.bf16.msra.mxu3 %v5011_v35  ;;  %v5469_v30 = vld [vmem:[#allocation10 + $0x54c] sm:$0xf]  ;;  %v5425_v35 = vld [vmem:[#allocation10 + $0x3e4] sm:$0xf0] }
 0x18d   : > { %v4823_v36 = vor.u32 %v5469_v30, %v4820_v31  ;;  %v4627_v46 = vor.u32 %v5425_v35, %v4626_v34  ;;  %v5393_v30 = vld [vmem:[#allocation10 + $0x2e4] sm:$0xf0] }
 0x18e   : > { %v4210_v34 = vld [vmem:[#allocation10 + $0x88] sm:$0xf] }
 0x18f   : > { %v5321_v35 = vld [vmem:[#allocation10 + $0xa4] sm:$0xf0] }
 0x190   : > { %3074 = vmatpush.bf16.msra.mxu2 %v4723_v41  ;;  %3088 = vmatpush.bf16.msra.mxu3 %v4979_v45  ;;  %v4371_v45 = vor.u32 %v5361_v33, %v4370_v29  ;;  %v4498_v29 = vld [vmem:[#allocation10 + $0x2c8] sm:$0xf]  ;;  %v5501_v33 = vld [vmem:[#allocation10 + $0x64c] sm:$0xf] }
 0x194   : > { %3075 = vmatpush.bf16.msra.mxu2 %v4691_v50  ;;  %3089 = vmatpush.bf16.msra.mxu3 %v4947_v55  ;;  %v5079_v55 = vor.u32 %v5533_v42, %v5076_v43  ;;  %v4660_v42 = vld [vmem:[#allocation10 + $0x428] sm:$0xf0]  ;;  %v5385_v43 = vld [vmem:[#allocation10 + $0x2a4] sm:$0xf0] }
 0x198   : > { %v1287_v39 = vpop.f32.mrf.mxu0  ;;  %v1301_v40 = vpop.f32.mrf.mxu1  ;;  %3076 = vmatpush.bf16.msra.mxu2 %v4659_v60  ;;  %3090 = vmatpush.bf16.msra.mxu3 %v4915_v13  ;;  %v4595_v60 = vor.u32 %v5417_v54, %v4594_v53  ;;  %v4274_v13 = vld [vmem:[#allocation10 + $0x108] sm:$0xf]  ;;  %v5493_v53 = vld [vmem:[#allocation10 + $0x60c] sm:$0xf] }
 0x199   : > { %v1306_v58 = vadd.f32 %v1287_v39, %v1239_v48  ;;  %v1307_v59 = vadd.f32 %v1301_v40, %v1253_v49  ;;  %v5461_v48 = vld [vmem:[#allocation10 + $0x50c] sm:$0xf] }
 0x19a   : > { %v4788_v49 = vld [vmem:[#allocation10 + $0x528] sm:$0xf0] }
 0x19b   : > { %3077 = vmatmul.bf16.vlgmr.msra.gmra.mxu2 %v5965_v4  ;;  %3091 = vmatmul.bf16.vlgmr.msra.gmra.mxu3 %v5967_v7  ;;  %v4791_v56 = vor.u32 %v5461_v48, %v4788_v49  ;;  %v5490_v48 = vld [vmem:[#allocation10 + $0x5ec] sm:$0xf0]  ;;  %v4916_v54 = vld [vmem:[#allocation10 + $0x628] sm:$0xf0] }
 0x19c   : > { %3125 = vmatpush.bf16.msrb.mxu2 %v4887_v44  ;;  %3139 = vmatpush.bf16.msrb.mxu3 %v5143_v15  ;;  %v4562_v44 = vld [vmem:[#allocation10 + $0x348] sm:$0xf]  ;;  %v4724_v15 = vld [vmem:[#allocation10 + $0x4a8] sm:$0xf0] }
 0x1a0   : > { %v1289_v6 = vpop.f32.mrf.mxu0  ;;  %v1303_v37 = vpop.f32.mrf.mxu1  ;;  %3126 = vmatpush.bf16.msrb.mxu2 %v4855_v16  ;;  %3140 = vmatpush.bf16.msrb.mxu3 %v5111_v28  ;;  %v4727_v16 = vor.u32 %v5445_v14, %v4724_v15  ;;  %v5329_v28 = vld [vmem:[#allocation10 + $0xe4] sm:$0xf0]  ;;  %v5357_v15 = vld [vmem:[#allocation10 + $0x1cc] sm:$0xf] }
 0x1a1   : > { %v1308_v20 = vadd.f32 %v1289_v6, %v1241_v63  ;;  %v1309_v21 = vadd.f32 %v1303_v37, %v1255_v5  ;;  %v4756_v63 = vld [vmem:[#allocation10 + $0x4e8] sm:$0xf0]  ;;  %v5345_v5 = vld [vmem:[#allocation10 + $0x164] sm:$0xf0] }
 0x1a2   : > { %v5409_v6 = vld [vmem:[#allocation10 + $0x364] sm:$0xf0]  ;;  %v4307_v11 = vor.u32 %v5345_v5, %v4306_v61  ;;  %v5482_v5 = vld [vmem:[#allocation10 + $0x5ac] sm:$0xf0] }
 0x1a3   : > { %v4563_v12 = vor.u32 %v5409_v6, %v4562_v44  ;;  %v5377_v61 = vld [vmem:[#allocation10 + $0x264] sm:$0xf0] }
 0x1a4   : > { %3127 = vmatpush.bf16.msrb.mxu2 %v4823_v36  ;;  %3141 = vmatpush.bf16.msrb.mxu3 %v5079_v55  ;;  %v4948_v36 = vld [vmem:[#allocation10 + $0x668] sm:$0xf0]  ;;  %v5146_v55 = vld [vmem:[#allocation10 + $0x7d0] sm:$0xf]  ;;  %v5369_v14 = vld [vmem:[#allocation10 + $0x224] sm:$0xf0] }
 0x1a8   : > { %3128 = vmatpush.bf16.msrb.mxu2 %v4791_v56  ;;  %v4211_v56 = vor.u32 %v5321_v35, %v4210_v34  ;;  %v4596_v34 = vld [vmem:[#allocation10 + $0x3a8] sm:$0xf0] }
 0x1be   : > { %v1340_v51 = vpop.f32.mrf.mxu2  ;;  %v1354_v52 = vpop.f32.mrf.mxu3 }
 0x1bf   : > { %v1359_v8 = vadd.f32 %v1340_v51, %v1306_v58  ;;  %v1360_v9 = vadd.f32 %v1354_v52, %v1307_v59  ;;  %v5353_v52 = vld [vmem:[#allocation10 + $0x1a4] sm:$0xf0]  ;;  %v5044_v58 = vld [vmem:[#allocation10 + $0x728] sm:$0xf0] }
 0x1c0   : > { %v4339_v59 = vor.u32 %v5353_v52, %v4338_v47  ;;  %v5047_v37 = vor.u32 %v5525_v57, %v5044_v58  ;;  %v4890_v47 = vld [vmem:[#allocation10 + $0x5d0] sm:$0xf]  ;;  %v4178_v52 = vld [vmem:[#allocation10 + $0x48] sm:$0xf] }
 0x1c1   : > { %v1363_v17 = vpack.c.bf16 %v1360_v9, %v1359_v8  ;;  %v4759_v8 = vor.u32 %v5453_v62, %v4756_v63  ;;  %v5517_v9 = vld [vmem:[#allocation10 + $0x6cc] sm:$0xf]  ;;  %v4891_v49 = vor.u32 %v5490_v48, %v4890_v47  ;;  %v5313_v58 = vld [vmem:[#allocation10 + $0x64] sm:$0xf0]  ;;  %v4919_v62 = vor.u32 %v5493_v53, %v4916_v54  ;;  %v4858_v63 = vld [vmem:[#allocation10 + $0x590] sm:$0xf] }
 0x1c2   : > { %3142 = vmatpush.bf16.msrb.mxu3 %v5047_v37  ;;  %v4859_v6 = vor.u32 %v5482_v5, %v4858_v63  ;;  %v4146_v37 = vld [vmem:[#allocation10 + $0x8] sm:$0xf]  ;;  %v5405_v47 = vld [vmem:[#allocation10 + $0x34c] sm:$0xf]  ;;  %v5018_v53 = vld [vmem:[#allocation10 + $0x6d0] sm:$0xf] }
 0x1c3   : > { %v1367_v38 = vunpack.c.l.b16 %v1363_v17  ;;  %v1368_v39 = vunpack.c.h.b16 %v1363_v17  ;;  %3129 = vmatpush.bf16.msrb.mxu2 %v4759_v8  ;;  %v5509_v17 = vld [vmem:[#allocation10 + $0x68c] sm:$0xf]  ;;  %v5114_v8 = vld [vmem:[#allocation10 + $0x790] sm:$0xf] }
 0x1c4   : > { %v4564_v48 = vld [vmem:[#allocation10 + $0x368] sm:$0xf0]  ;;  %v5522_v54 = vld [vmem:[#allocation10 + $0x6ec] sm:$0xf0] }
 0x1c5   : > { %v5019_v63 = vor.u32 %v5522_v54, %v5018_v53  ;;  %v5116_v53 = vld [vmem:[#allocation10 + $0x7b0] sm:$0xf0] }
 0x1c6   : > { %v1342_v22 = vpop.f32.mrf.mxu2  ;;  %v1356_v23 = vpop.f32.mrf.mxu3 }
 0x1c7   : > { %v1361_v26 = vadd.f32 %v1342_v22, %v1308_v20  ;;  %v1362_v27 = vadd.f32 %v1356_v23, %v1309_v21  ;;  %v5401_v20 = vld [vmem:[#allocation10 + $0x324] sm:$0xf0]  ;;  %v5015_v21 = vor.u32 %v5517_v9, %v5012_v10  ;;  %v4980_v22 = vld [vmem:[#allocation10 + $0x6a8] sm:$0xf0]  ;;  %v4275_v23 = vor.u32 %v5337_v18, %v4274_v13  ;;  %3130 = vmatpush.bf16.msrb.mxu2 %v4727_v16  ;;  %v5546_v9 = vld [vmem:[#allocation10 + $0x7ac] sm:$0xf0] }
 0x1c8   : > { %v4531_v24 = vor.u32 %v5401_v20, %v4530_v19  ;;  %v4983_v31 = vor.u32 %v5509_v17, %v4980_v22  ;;  %v4179_v10 = vor.u32 %v5313_v58, %v4178_v52  ;;  %v4402_v13 = vld [vmem:[#allocation10 + $0x208] sm:$0xf]  ;;  %v4826_v18 = vld [vmem:[#allocation10 + $0x550] sm:$0xf]  ;;  %v4372_v20 = vld [vmem:[#allocation10 + $0x1e8] sm:$0xf0]  ;;  %v5115_v17 = vor.u32 %v5546_v9, %v5114_v8 }
 0x1c9   : > { %v1364_v32 = vpack.c.bf16 %v1362_v27, %v1361_v26  ;;  %v5437_v26 = vld [vmem:[#allocation10 + $0x44c] sm:$0xf]  ;;  %3143 = vmatpush.bf16.msrb.mxu3 %v5015_v21  ;;  %v5474_v19 = vld [vmem:[#allocation10 + $0x56c] sm:$0xf0] }
 0x1ca   : > { %v4692_v27 = vld [vmem:[#allocation10 + $0x468] sm:$0xf0]  ;;  %v4827_v22 = vor.u32 %v5474_v19, %v4826_v18  ;;  %v4730_v58 = vld [vmem:[#allocation10 + $0x490] sm:$0xf] }
 0x1cb   : > { %v1369_v40 = vunpack.c.l.b16 %v1364_v32  ;;  %v1370_v41 = vunpack.c.h.b16 %v1364_v32  ;;  %v4695_v32 = vor.u32 %v5437_v26, %v4692_v27  ;;  %v5421_v21 = vld [vmem:[#allocation10 + $0x3cc] sm:$0xf]  ;;  %v5538_v26 = vld [vmem:[#allocation10 + $0x76c] sm:$0xf0]  ;;  %v4375_v27 = vor.u32 %v5357_v15, %v4372_v20 }
 0x1cc   : > { %v4628_v16 = vld [vmem:[#allocation10 + $0x3e8] sm:$0xf0]  ;;  %v4954_v19 = vld [vmem:[#allocation10 + $0x650] sm:$0xf] }
 0x1cd   : > { %v6015_v50 = vpack.c.b16 %v1369_v40, %v1367_v38  ;;  %v6017_v51 = vpack.c.b16 %v1370_v41, %v1368_v39  ;;  %v4243_v38 = vor.u32 %v5329_v28, %v4242_v25  ;;  %v4499_v39 = vor.u32 %v5393_v30, %v4498_v29  ;;  %v4466_v40 = vld [vmem:[#allocation10 + $0x288] sm:$0xf]  ;;  %v5429_v41 = vld [vmem:[#allocation10 + $0x40c] sm:$0xf]  ;;  %3144 = vmatpush.bf16.msrb.mxu3 %v4983_v31  ;;  %v5082_v25 = vld [vmem:[#allocation10 + $0x750] sm:$0xf] }
 0x1ce   : > { %3131 = vmatpush.bf16.msrb.mxu2 %v4695_v32  ;;  %v4467_v57 = vor.u32 %v5385_v43, %v4466_v40  ;;  %v4631_v28 = vor.u32 %v5421_v21, %v4628_v16  ;;  %v5349_v29 = vld [vmem:[#allocation10 + $0x18c] sm:$0xf]  ;;  %v4794_v30 = vld [vmem:[#allocation10 + $0x510] sm:$0xf]  ;;  %v5083_v35 = vor.u32 %v5538_v26, %v5082_v25 }
 0x1cf   : > { %2937 = vmatmul.bf16.vlgmr.msra.gmra.mxu0 %v6015_v50  ;;  %2951 = vmatmul.bf16.vlgmr.msra.gmra.mxu1 %v6017_v51  ;;  %v5466_v31 = vld [vmem:[#allocation10 + $0x52c] sm:$0xf0]  ;;  %v4340_v32 = vld [vmem:[#allocation10 + $0x1a8] sm:$0xf0] }
 0x1d0   : > { %3041 = vmatpush.bf16.msra.mxu0 %v4371_v45  ;;  %3055 = vmatpush.bf16.msra.mxu1 %v4627_v46  ;;  %v4951_v45 = vor.u32 %v5501_v33, %v4948_v36  ;;  %v4663_v46 = vor.u32 %v5429_v41, %v4660_v42  ;;  %v5413_v33 = vld [vmem:[#allocation10 + $0x38c] sm:$0xf]  ;;  %v4795_v36 = vor.u32 %v5466_v31, %v4794_v30  ;;  %v4762_v43 = vld [vmem:[#allocation10 + $0x4d0] sm:$0xf]  ;;  %v4892_v30 = vld [vmem:[#allocation10 + $0x5f0] sm:$0xf0] }
 0x1d1   : > { %v4343_v40 = vor.u32 %v5349_v29, %v4340_v32  ;;  %v4599_v41 = vor.u32 %v5413_v33, %v4596_v34  ;;  %v5341_v42 = vld [vmem:[#allocation10 + $0x14c] sm:$0xf]  ;;  %v5506_v16 = vld [vmem:[#allocation10 + $0x66c] sm:$0xf0]  ;;  %v5486_v29 = vld [vmem:[#allocation10 + $0x5d4] sm:$0xf] }
 0x1d2   : > { %3145 = vmatpush.bf16.msrb.mxu3 %v4951_v45  ;;  %3132 = vmatpush.bf16.msrb.mxu2 %v4663_v46  ;;  %v5458_v45 = vld [vmem:[#allocation10 + $0x4ec] sm:$0xf0]  ;;  %v4308_v46 = vld [vmem:[#allocation10 + $0x168] sm:$0xf0]  ;;  %v4895_v31 = vor.u32 %v5486_v29, %v4892_v30 }
 0x1d3   : > { %v4763_v52 = vor.u32 %v5458_v45, %v4762_v43  ;;  %v5325_v9 = vld [vmem:[#allocation10 + $0xcc] sm:$0xf]  ;;  %v5434_v25 = vld [vmem:[#allocation10 + $0x42c] sm:$0xf0]  ;;  %v5478_v45 = vld [vmem:[#allocation10 + $0x594] sm:$0xf] }
 0x1d4   : > { %3042 = vmatpush.bf16.msra.mxu0 %v4339_v59  ;;  %3056 = vmatpush.bf16.msra.mxu1 %v4595_v60  ;;  %v4434_v59 = vld [vmem:[#allocation10 + $0x248] sm:$0xf]  ;;  %v5554_v60 = vld [vmem:[#allocation10 + $0x7ec] sm:$0xf0]  ;;  %v5317_v20 = vld [vmem:[#allocation10 + $0x8c] sm:$0xf] }
 0x1d5   : > { %v5147_v44 = vor.u32 %v5554_v60, %v5146_v55  ;;  %3133 = vmatmul.bf16.vlgmr.msrb.gmra.mxu2 %v5965_v4  ;;  %v4311_v55 = vor.u32 %v5341_v42, %v4308_v46  ;;  %v4276_v60 = vld [vmem:[#allocation10 + $0x128] sm:$0xf0]  ;;  %v4922_v33 = vld [vmem:[#allocation10 + $0x610] sm:$0xf]  ;;  %v4860_v46 = vld [vmem:[#allocation10 + $0x5b0] sm:$0xf0] }
 0x1d6   : > { %3181 = vmatpush.bf16.msra.mxu2 %v4891_v49  ;;  %3146 = vmatpush.bf16.msrb.mxu3 %v4919_v62  ;;  %v4532_v62 = vld [vmem:[#allocation10 + $0x328] sm:$0xf0]  ;;  %v5498_v34 = vld [vmem:[#allocation10 + $0x62c] sm:$0xf0] }
 0x1d7   : > { %v4212_v21 = vld [vmem:[#allocation10 + $0xa8] sm:$0xf0]  ;;  %v4923_v43 = vor.u32 %v5498_v34, %v4922_v33  ;;  %v4570_v29 = vld [vmem:[#allocation10 + $0x350] sm:$0xf]  ;;  %v5518_v33 = vld [vmem:[#allocation10 + $0x6d4] sm:$0xf] }
 0x1d8   : > { %3043 = vmatpush.bf16.msra.mxu0 %v4307_v11  ;;  %3057 = vmatpush.bf16.msra.mxu1 %v4563_v12  ;;  %v4435_v11 = vor.u32 %v5377_v61, %v4434_v59  ;;  %v5305_v12 = vld [vmem:[#allocation10 + $0x24] sm:$0xf0]  ;;  %v5450_v59 = vld [vmem:[#allocation10 + $0x4ac] sm:$0xf0]  ;;  %v5397_v61 = vld [vmem:[#allocation10 + $0x30c] sm:$0xf] }
 0x1d9   : > { %3147 = vmatmul.bf16.vlgmr.msrb.gmra.mxu3 %v5967_v7  ;;  %v4731_v5 = vor.u32 %v5450_v59, %v4730_v58  ;;  %v4535_v8 = vor.u32 %v5397_v61, %v4532_v62  ;;  %v4468_v26 = vld [vmem:[#allocation10 + $0x2a8] sm:$0xf0]  ;;  %v4378_v59 = vld [vmem:[#allocation10 + $0x1d0] sm:$0xf]  ;;  %v4828_v61 = vld [vmem:[#allocation10 + $0x570] sm:$0xf0] }
 0x1da   : > { %3195 = vmatpush.bf16.msra.mxu3 %v5147_v44  ;;  %3182 = vmatpush.bf16.msra.mxu2 %v4859_v6  ;;  %v4986_v44 = vld [vmem:[#allocation10 + $0x690] sm:$0xf]  ;;  %v5309_v32 = vld [vmem:[#allocation10 + $0x4c] sm:$0xf]  ;;  %v5020_v34 = vld [vmem:[#allocation10 + $0x6f0] sm:$0xf0] }
 0x1db   : > { %v5514_v6 = vld [vmem:[#allocation10 + $0x6ac] sm:$0xf0]  ;;  %v4436_v42 = vld [vmem:[#allocation10 + $0x268] sm:$0xf0] }
 0x1dc   : > { %3044 = vmatpush.bf16.msra.mxu0 %v4275_v23  ;;  %3058 = vmatpush.bf16.msra.mxu1 %v4531_v24  ;;  %v4147_v23 = vor.u32 %v5305_v12, %v4146_v37  ;;  %v4403_v24 = vor.u32 %v5369_v14, %v4402_v13  ;;  %v4244_v12 = vld [vmem:[#allocation10 + $0xe8] sm:$0xf0]  ;;  %v4987_v15 = vor.u32 %v5514_v6, %v4986_v44  ;;  %v5362_v62 = vld [vmem:[#allocation10 + $0x1ec] sm:$0xf0] }
 0x1dd   : > { %v5389_v13 = vld [vmem:[#allocation10 + $0x2cc] sm:$0xf]  ;;  %v5410_v30 = vld [vmem:[#allocation10 + $0x36c] sm:$0xf0] }
 0x1de   : > { %3196 = vmatpush.bf16.msra.mxu3 %v5115_v17  ;;  %3183 = vmatpush.bf16.msra.mxu2 %v4827_v22  ;;  %v4500_v14 = vld [vmem:[#allocation10 + $0x2e8] sm:$0xf0]  ;;  %v4247_v17 = vor.u32 %v5325_v9, %v4244_v12  ;;  %v5534_v9 = vld [vmem:[#allocation10 + $0x754] sm:$0xf] }
 0x1df   : > { %2993 = vmatmul.bf16.vlgmr.msrb.gmra.mxu0 %v6015_v50  ;;  %3007 = vmatmul.bf16.vlgmr.msrb.gmra.mxu1 %v6017_v51  ;;  %v4503_v22 = vor.u32 %v5389_v13, %v4500_v14  ;;  %v4404_v58 = vld [vmem:[#allocation10 + $0x228] sm:$0xf0]  ;;  %v4346_v13 = vld [vmem:[#allocation10 + $0x190] sm:$0xf]  ;;  %v5462_v14 = vld [vmem:[#allocation10 + $0x514] sm:$0xf] }
 0x1e0   : > { %3045 = vmatpush.bf16.msra.mxu0 %v4243_v38  ;;  %3059 = vmatpush.bf16.msra.mxu1 %v4499_v39  ;;  %v5050_v38 = vld [vmem:[#allocation10 + $0x710] sm:$0xf] }
 0x1e1   : > { %v5530_v39 = vld [vmem:[#allocation10 + $0x72c] sm:$0xf0] }
 0x1e2   : > { %3197 = vmatpush.bf16.msra.mxu3 %v5083_v35  ;;  %3184 = vmatpush.bf16.msra.mxu2 %v4795_v36  ;;  %v5051_v49 = vor.u32 %v5530_v39, %v5050_v38  ;;  %v5550_v35 = vld [vmem:[#allocation10 + $0x7d4] sm:$0xf]  ;;  %v4215_v36 = vor.u32 %v5317_v20, %v4212_v21  ;;  %v4180_v39 = vld [vmem:[#allocation10 + $0x68] sm:$0xf0]  ;;  %v5418_v20 = vld [vmem:[#allocation10 + $0x3ac] sm:$0xf0] }
 0x1e3   : > { %v4183_v54 = vor.u32 %v5309_v32, %v4180_v39  ;;  %v5446_v39 = vld [vmem:[#allocation10 + $0x494] sm:$0xf] }
 0x1e4   : > { %3046 = vmatpush.bf16.msra.mxu0 %v4211_v56  ;;  %3060 = vmatpush.bf16.msra.mxu1 %v4467_v57  ;;  %v4567_v56 = vor.u32 %v5405_v47, %v4564_v48  ;;  %v5333_v57 = vld [vmem:[#allocation10 + $0x10c] sm:$0xf]  ;;  %v4863_v48 = vor.u32 %v5478_v45, %v4860_v46  ;;  %v5023_v45 = vor.u32 %v5518_v33, %v5020_v34  ;;  %v5547_v33 = vld [vmem:[#allocation10 + $0x7b4] sm:$0xf0] }
 0x1e5   : > { %v4279_v37 = vor.u32 %v5333_v57, %v4276_v60  ;;  %v5365_v57 = vld [vmem:[#allocation10 + $0x20c] sm:$0xf]  ;;  %v5470_v60 = vld [vmem:[#allocation10 + $0x554] sm:$0xf] }
 0x1e6   : > { %3198 = vmatpush.bf16.msra.mxu3 %v5051_v49  ;;  %3185 = vmatpush.bf16.msra.mxu2 %v4763_v52  ;;  %v5301_v49 = vld [vmem:[#allocation10 + $0xc] sm:$0xf]  ;;  %v5542_v52 = vld [vmem:[#allocation10 + $0x794] sm:$0xf]  ;;  %v4831_v6 = vor.u32 %v5470_v60, %v4828_v61 }
 0x1e7   : > { %v5119_v44 = vor.u32 %v5542_v52, %v5116_v53  ;;  %v4250_v53 = vld [vmem:[#allocation10 + $0xd0] sm:$0xf]  ;;  %v5502_v61 = vld [vmem:[#allocation10 + $0x654] sm:$0xf] }
 0x1e8   : > { %3047 = vmatpush.bf16.msra.mxu0 %v4179_v10  ;;  %3061 = vmatpush.bf16.msra.mxu1 %v4435_v11  ;;  %v4698_v10 = vld [vmem:[#allocation10 + $0x450] sm:$0xf] }
 0x1e9   : > { %v5442_v11 = vld [vmem:[#allocation10 + $0x46c] sm:$0xf0] }
 0x1ea   : > { %3199 = vmatpush.bf16.msra.mxu3 %v5019_v63  ;;  %3186 = vmatpush.bf16.msra.mxu2 %v4731_v5  ;;  %v4699_v18 = vor.u32 %v5442_v11, %v4698_v10  ;;  %v4634_v63 = vld [vmem:[#allocation10 + $0x3d0] sm:$0xf]  ;;  %v5084_v10 = vld [vmem:[#allocation10 + $0x770] sm:$0xf0]  ;;  %v4379_v11 = vor.u32 %v5362_v62, %v4378_v59 }
 0x1eb   : > { %v5426_v5 = vld [vmem:[#allocation10 + $0x3ec] sm:$0xf0]  ;;  %v5087_v21 = vor.u32 %v5534_v9, %v5084_v10  ;;  %v4668_v9 = vld [vmem:[#allocation10 + $0x430] sm:$0xf0] }
 0x1ec   : > { %3048 = vmatpush.bf16.msra.mxu0 %v4147_v23  ;;  %3062 = vmatpush.bf16.msra.mxu1 %v4403_v24  ;;  %v5381_v23 = vld [vmem:[#allocation10 + $0x28c] sm:$0xf]  ;;  %v4666_v24 = vld [vmem:[#allocation10 + $0x410] sm:$0xf]  ;;  %v4635_v12 = vor.u32 %v5426_v5, %v4634_v63  ;;  %v4956_v5 = vld [vmem:[#allocation10 + $0x670] sm:$0xf0] }
 0x1ed   : > { %v4471_v38 = vor.u32 %v5381_v23, %v4468_v26  ;;  %v5454_v26 = vld [vmem:[#allocation10 + $0x4d4] sm:$0xf]  ;;  %v4218_v62 = vld [vmem:[#allocation10 + $0x90] sm:$0xf] }
 0x1ee   : > { %3200 = vmatpush.bf16.msra.mxu3 %v4987_v15  ;;  %3187 = vmatpush.bf16.msra.mxu2 %v4699_v18  ;;  %v4796_v15 = vld [vmem:[#allocation10 + $0x530] sm:$0xf0]  ;;  %v5354_v18 = vld [vmem:[#allocation10 + $0x1ac] sm:$0xf0] }
 0x1ef   : > { %3049 = vmatmul.bf16.vlgmr.msra.gmra.mxu0 %v6015_v50  ;;  %3063 = vmatmul.bf16.vlgmr.msra.gmra.mxu1 %v6017_v51  ;;  %v4347_v23 = vor.u32 %v5354_v18, %v4346_v13  ;;  %v5322_v63 = vld [vmem:[#allocation10 + $0xac] sm:$0xf0]  ;;  %v4898_v13 = vld [vmem:[#allocation10 + $0x5d8] sm:$0xf] }
 0x1f0   : > { %3097 = vmatpush.bf16.msrb.mxu0 %v4375_v27  ;;  %3111 = vmatpush.bf16.msrb.mxu1 %v4631_v28  ;;  %v4955_v27 = vor.u32 %v5506_v16, %v4954_v19  ;;  %v4667_v28 = vor.u32 %v5434_v25, %v4666_v24  ;;  %v4602_v19 = vld [vmem:[#allocation10 + $0x390] sm:$0xf]  ;;  %v4799_v16 = vor.u32 %v5462_v14, %v4796_v15  ;;  %v5491_v14 = vld [vmem:[#allocation10 + $0x5f4] sm:$0xf0] }
 0x1f1   : > { %v4603_v24 = vor.u32 %v5418_v20, %v4602_v19  ;;  %v4314_v25 = vld [vmem:[#allocation10 + $0x150] sm:$0xf]  ;;  %v4899_v15 = vor.u32 %v5491_v14, %v4898_v13  ;;  %v5494_v19 = vld [vmem:[#allocation10 + $0x614] sm:$0xf] }
 0x1f2   : > { %3201 = vmatpush.bf16.msra.mxu3 %v4955_v27  ;;  %3188 = vmatpush.bf16.msra.mxu2 %v4667_v28  ;;  %v4764_v27 = vld [vmem:[#allocation10 + $0x4f0] sm:$0xf0]  ;;  %v5346_v28 = vld [vmem:[#allocation10 + $0x16c] sm:$0xf0] }
 0x1f3   : > { %v4767_v32 = vor.u32 %v5454_v26, %v4764_v27  ;;  %v5386_v10 = vld [vmem:[#allocation10 + $0x2ac] sm:$0xf0]  ;;  %v4924_v20 = vld [vmem:[#allocation10 + $0x630] sm:$0xf0]  ;;  %v4866_v27 = vld [vmem:[#allocation10 + $0x598] sm:$0xf] }
 0x1f4   : > { %3098 = vmatpush.bf16.msrb.mxu0 %v4343_v40  ;;  %3112 = vmatpush.bf16.msrb.mxu1 %v4599_v41  ;;  %v5373_v40 = vld [vmem:[#allocation10 + $0x24c] sm:$0xf]  ;;  %v5148_v41 = vld [vmem:[#allocation10 + $0x7f0] sm:$0xf0]  ;;  %v4186_v18 = vld [vmem:[#allocation10 + $0x50] sm:$0xf]  ;;  %v4927_v26 = vor.u32 %v5494_v19, %v4924_v20 }
 0x1f5   : > { %v5151_v47 = vor.u32 %v5550_v35, %v5148_v41  ;;  %3189 = vmatmul.bf16.vlgmr.msra.gmra.mxu2 %v5965_v4  ;;  %v4315_v35 = vor.u32 %v5346_v28, %v4314_v25  ;;  %v5338_v41 = vld [vmem:[#allocation10 + $0x12c] sm:$0xf0]  ;;  %v5483_v28 = vld [vmem:[#allocation10 + $0x5b4] sm:$0xf0]  ;;  %v5406_v13 = vld [vmem:[#allocation10 + $0x354] sm:$0xf] }
 0x1f6   : > { %3237 = vmatpush.bf16.msrb.mxu2 %v4895_v31  ;;  %3202 = vmatpush.bf16.msra.mxu3 %v4923_v43  ;;  %v5402_v43 = vld [vmem:[#allocation10 + $0x32c] sm:$0xf0]  ;;  %v4572_v14 = vld [vmem:[#allocation10 + $0x370] sm:$0xf0]  ;;  %v5026_v19 = vld [vmem:[#allocation10 + $0x6d8] sm:$0xf] }
 0x1f7   : > { %v5378_v25 = vld [vmem:[#allocation10 + $0x26c] sm:$0xf0]  ;;  %v5523_v20 = vld [vmem:[#allocation10 + $0x6f4] sm:$0xf0] }
 0x1f8   : > { %3099 = vmatpush.bf16.msrb.mxu0 %v4311_v55  ;;  %3113 = vmatpush.bf16.msrb.mxu1 %v4567_v56  ;;  %v4439_v55 = vor.u32 %v5373_v40, %v4436_v42  ;;  %v4148_v56 = vld [vmem:[#allocation10 + $0x28] sm:$0xf0]  ;;  %v4732_v40 = vld [vmem:[#allocation10 + $0x4b0] sm:$0xf0]  ;;  %v4538_v42 = vld [vmem:[#allocation10 + $0x310] sm:$0xf] }
 0x1f9   : > { %3203 = vmatmul.bf16.vlgmr.msra.gmra.mxu3 %v5967_v7  ;;  %v4735_v46 = vor.u32 %v5446_v39, %v4732_v40  ;;  %v4539_v52 = vor.u32 %v5402_v43, %v4538_v42  ;;  %v5370_v39 = vld [vmem:[#allocation10 + $0x22c] sm:$0xf0]  ;;  %v5358_v40 = vld [vmem:[#allocation10 + $0x1d4] sm:$0xf]  ;;  %v5475_v42 = vld [vmem:[#allocation10 + $0x574] sm:$0xf0] }
 0x1fa   : > { %3251 = vmatpush.bf16.msrb.mxu3 %v5151_v47  ;;  %3238 = vmatpush.bf16.msrb.mxu2 %v4863_v48  ;;  %v5510_v47 = vld [vmem:[#allocation10 + $0x694] sm:$0xf] }
 0x1fb   : > { %v4988_v48 = vld [vmem:[#allocation10 + $0x6b0] sm:$0xf0] }
 0x1fc   : > { %3100 = vmatpush.bf16.msrb.mxu0 %v4279_v37  ;;  %3114 = vmatpush.bf16.msrb.mxu1 %v4535_v8  ;;  %v4151_v37 = vor.u32 %v5301_v49, %v4148_v56  ;;  %v4407_v8 = vor.u32 %v5365_v57, %v4404_v58  ;;  %v5330_v56 = vld [vmem:[#allocation10 + $0xec] sm:$0xf0]  ;;  %v4991_v59 = vor.u32 %v5510_v47, %v4988_v48  ;;  %v4380_v43 = vld [vmem:[#allocation10 + $0x1f0] sm:$0xf0] }
 0x1fd   : > { %v4506_v57 = vld [vmem:[#allocation10 + $0x2d0] sm:$0xf] }
 0x1fe   : > { %3252 = vmatpush.bf16.msrb.mxu3 %v5119_v44  ;;  %3239 = vmatpush.bf16.msrb.mxu2 %v4831_v6  ;;  %v5394_v58 = vld [vmem:[#allocation10 + $0x2ec] sm:$0xf0]  ;;  %v4251_v44 = vor.u32 %v5330_v56, %v4250_v53  ;;  %v5090_v53 = vld [vmem:[#allocation10 + $0x758] sm:$0xf] }
 0x1ff   : > { %v4507_v6 = vor.u32 %v5394_v58, %v4506_v57  ;;  %v5350_v57 = vld [vmem:[#allocation10 + $0x194] sm:$0xf]  ;;  %v4802_v58 = vld [vmem:[#allocation10 + $0x518] sm:$0xf] }
 0x200   : > { %3101 = vmatpush.bf16.msrb.mxu0 %v4247_v17  ;;  %3115 = vmatpush.bf16.msrb.mxu1 %v4503_v22  ;;  %v5526_v17 = vld [vmem:[#allocation10 + $0x714] sm:$0xf] }
 0x201   : > { %v5052_v22 = vld [vmem:[#allocation10 + $0x730] sm:$0xf0] }
 0x202   : > { %3253 = vmatpush.bf16.msrb.mxu3 %v5087_v21  ;;  %3240 = vmatpush.bf16.msrb.mxu2 %v4799_v16  ;;  %v5055_v31 = vor.u32 %v5526_v17, %v5052_v22  ;;  %v5154_v21 = vld [vmem:[#allocation10 + $0x7d8] sm:$0xf]  ;;  %v4219_v16 = vor.u32 %v5322_v63, %v4218_v62  ;;  %v5314_v22 = vld [vmem:[#allocation10 + $0x6c] sm:$0xf0]  ;;  %v4604_v62 = vld [vmem:[#allocation10 + $0x3b0] sm:$0xf0] }
 0x203   : > { %v4187_v34 = vor.u32 %v5314_v22, %v4186_v18  ;;  %v4738_v22 = vld [vmem:[#allocation10 + $0x498] sm:$0xf] }
 0x204   : > { %3102 = vmatpush.bf16.msrb.mxu0 %v4215_v36  ;;  %3116 = vmatpush.bf16.msrb.mxu1 %v4471_v38  ;;  %v4571_v36 = vor.u32 %v5410_v30, %v4570_v29  ;;  %v4282_v38 = vld [vmem:[#allocation10 + $0x110] sm:$0xf]  ;;  %v4867_v30 = vor.u32 %v5483_v28, %v4866_v27  ;;  %v5027_v27 = vor.u32 %v5523_v20, %v5026_v19  ;;  %v5124_v19 = vld [vmem:[#allocation10 + $0x7b8] sm:$0xf0] }
 0x205   : > { %v4283_v49 = vor.u32 %v5338_v41, %v4282_v38  ;;  %v4410_v38 = vld [vmem:[#allocation10 + $0x210] sm:$0xf]  ;;  %v4834_v41 = vld [vmem:[#allocation10 + $0x558] sm:$0xf] }
 0x206   : > { %3254 = vmatpush.bf16.msrb.mxu3 %v5055_v31  ;;  %3241 = vmatpush.bf16.msrb.mxu2 %v4767_v32  ;;  %v4154_v31 = vld [vmem:[#allocation10 + $0x10] sm:$0xf]  ;;  %v5122_v32 = vld [vmem:[#allocation10 + $0x798] sm:$0xf]  ;;  %v4835_v48 = vor.u32 %v5475_v42, %v4834_v41  ;;  %v5318_v42 = vld [vmem:[#allocation10 + $0x94] sm:$0xf] }
 0x207   : > { %v5123_v47 = vor.u32 %v5547_v33, %v5122_v32  ;;  %v5326_v33 = vld [vmem:[#allocation10 + $0xd4] sm:$0xf] }
 0x208   : > { %3103 = vmatpush.bf16.msrb.mxu0 %v4183_v54  ;;  %3117 = vmatpush.bf16.msrb.mxu1 %v4439_v55  ;;  %v5438_v54 = vld [vmem:[#allocation10 + $0x454] sm:$0xf] }
 0x209   : > { %v4700_v55 = vld [vmem:[#allocation10 + $0x470] sm:$0xf0] }
 0x20a   : > { %3255 = vmatpush.bf16.msrb.mxu3 %v5023_v45  ;;  %3242 = vmatpush.bf16.msrb.mxu2 %v4735_v46  ;;  %v4703_v60 = vor.u32 %v5438_v54, %v4700_v55  ;;  %v5422_v45 = vld [vmem:[#allocation10 + $0x3d4] sm:$0xf]  ;;  %v5539_v54 = vld [vmem:[#allocation10 + $0x774] sm:$0xf0]  ;;  %v4383_v55 = vor.u32 %v5358_v40, %v4380_v43 }
 0x20b   : > { %v4636_v46 = vld [vmem:[#allocation10 + $0x3f0] sm:$0xf0]  ;;  %v5091_v63 = vor.u32 %v5539_v54, %v5090_v53  ;;  %v5435_v53 = vld [vmem:[#allocation10 + $0x434] sm:$0xf0] }
 0x20c   : > { %3104 = vmatpush.bf16.msrb.mxu0 %v4151_v37  ;;  %3118 = vmatpush.bf16.msrb.mxu1 %v4407_v8  ;;  %v4474_v37 = vld [vmem:[#allocation10 + $0x290] sm:$0xf]  ;;  %v5430_v8 = vld [vmem:[#allocation10 + $0x414] sm:$0xf]  ;;  %v4639_v56 = vor.u32 %v5422_v45, %v4636_v46  ;;  %v4962_v45 = vld [vmem:[#allocation10 + $0x658] sm:$0xf] }
 0x20d   : > { %v4475_v17 = vor.u32 %v5386_v10, %v4474_v37  ;;  %v4770_v10 = vld [vmem:[#allocation10 + $0x4d8] sm:$0xf]  ;;  %v4220_v43 = vld [vmem:[#allocation10 + $0xb0] sm:$0xf0] }
 0x20e   : > { %3256 = vmatpush.bf16.msrb.mxu3 %v4991_v59  ;;  %3243 = vmatpush.bf16.msrb.mxu2 %v4703_v60  ;;  %v5467_v59 = vld [vmem:[#allocation10 + $0x534] sm:$0xf0]  ;;  %v4348_v60 = vld [vmem:[#allocation10 + $0x1b0] sm:$0xf0] }
 0x20f   : > { %3105 = vmatmul.bf16.vlgmr.msrb.gmra.mxu0 %v6015_v50  ;;  %3119 = vmatmul.bf16.vlgmr.msrb.gmra.mxu1 %v6017_v51  ;;  %v4351_v37 = vor.u32 %v5350_v57, %v4348_v60  ;;  %v5507_v46 = vld [vmem:[#allocation10 + $0x674] sm:$0xf0]  ;;  %v4476_v54 = vld [vmem:[#allocation10 + $0x2b0] sm:$0xf0]  ;;  %v5487_v57 = vld [vmem:[#allocation10 + $0x5dc] sm:$0xf] }
 0x210   : > { %3153 = vmatpush.bf16.msra.mxu0 %v4379_v11  ;;  %3167 = vmatpush.bf16.msra.mxu1 %v4635_v12  ;;  %v4959_v11 = vor.u32 %v5502_v61, %v4956_v5  ;;  %v4671_v12 = vor.u32 %v5430_v8, %v4668_v9  ;;  %v5414_v61 = vld [vmem:[#allocation10 + $0x394] sm:$0xf]  ;;  %v4803_v5 = vor.u32 %v5467_v59, %v4802_v58  ;;  %v4900_v58 = vld [vmem:[#allocation10 + $0x5f8] sm:$0xf0] }
 0x211   : > { %v4607_v8 = vor.u32 %v5414_v61, %v4604_v62  ;;  %v5342_v9 = vld [vmem:[#allocation10 + $0x154] sm:$0xf]  ;;  %v4903_v59 = vor.u32 %v5487_v57, %v4900_v58  ;;  %v4930_v62 = vld [vmem:[#allocation10 + $0x618] sm:$0xf] }
 0x212   : > { %3257 = vmatpush.bf16.msrb.mxu3 %v4959_v11  ;;  %3244 = vmatpush.bf16.msrb.mxu2 %v4671_v12  ;;  %v5459_v11 = vld [vmem:[#allocation10 + $0x4f4] sm:$0xf0]  ;;  %v4316_v12 = vld [vmem:[#allocation10 + $0x170] sm:$0xf0] }
 0x213   : > { %v4771_v18 = vor.u32 %v5459_v11, %v4770_v10  ;;  %v5310_v60 = vld [vmem:[#allocation10 + $0x54] sm:$0xf]  ;;  %v5479_v11 = vld [vmem:[#allocation10 + $0x59c] sm:$0xf]  ;;  %v5347_v57 = vld [vmem:[#allocation10 + $0x174] sm:$0xf0] }
 0x214   : > { %3154 = vmatpush.bf16.msra.mxu0 %v4347_v23  ;;  %3168 = vmatpush.bf16.msra.mxu1 %v4603_v24  ;;  %v4442_v23 = vld [vmem:[#allocation10 + $0x250] sm:$0xf]  ;;  %v5555_v24 = vld [vmem:[#allocation10 + $0x7f4] sm:$0xf0]  ;;  %v4188_v61 = vld [vmem:[#allocation10 + $0x70] sm:$0xf0] }
 0x215   : > { %v5155_v29 = vor.u32 %v5555_v24, %v5154_v21  ;;  %3245 = vmatmul.bf16.vlgmr.msrb.gmra.mxu2 %v5965_v4  ;;  %v4319_v21 = vor.u32 %v5342_v9, %v4316_v12  ;;  %v4284_v24 = vld [vmem:[#allocation10 + $0x130] sm:$0xf0]  ;;  %v4868_v12 = vld [vmem:[#allocation10 + $0x5b8] sm:$0xf0]  ;;  %v4191_v20 = vor.u32 %v5310_v60, %v4188_v61  ;;  %v4578_v58 = vld [vmem:[#allocation10 + $0x358] sm:$0xf] }
 0x216   : > { %3293 = vmatpush.bf16.msra.mxu2 %v4899_v15  ;;  %3258 = vmatpush.bf16.msrb.mxu3 %v4927_v26  ;;  %v4540_v26 = vld [vmem:[#allocation10 + $0x330] sm:$0xf0] }
 0x217   : > { %v4444_v9 = vld [vmem:[#allocation10 + $0x270] sm:$0xf0] }
 0x218   : > { %3155 = vmatpush.bf16.msra.mxu0 %v4315_v35  ;;  %3169 = vmatpush.bf16.msra.mxu1 %v4571_v36  ;;  %v4443_v35 = vor.u32 %v5378_v25, %v4442_v23  ;;  %v5306_v36 = vld [vmem:[#allocation10 + $0x2c] sm:$0xf0]  ;;  %v5451_v23 = vld [vmem:[#allocation10 + $0x4b4] sm:$0xf0]  ;;  %v5398_v25 = vld [vmem:[#allocation10 + $0x314] sm:$0xf] }
 0x219   : > { %3259 = vmatmul.bf16.vlgmr.msrb.gmra.mxu3 %v5967_v7  ;;  %v4739_v28 = vor.u32 %v5451_v23, %v4738_v22  ;;  %v4543_v32 = vor.u32 %v5398_v25, %v4540_v26  ;;  %v4412_v22 = vld [vmem:[#allocation10 + $0x230] sm:$0xf0]  ;;  %v4386_v23 = vld [vmem:[#allocation10 + $0x1d8] sm:$0xf]  ;;  %v4836_v25 = vld [vmem:[#allocation10 + $0x578] sm:$0xf0] }
 0x21a   : > { %3307 = vmatpush.bf16.msra.mxu3 %v5155_v29  ;;  %3294 = vmatpush.bf16.msra.mxu2 %v4867_v30  ;;  %v4994_v29 = vld [vmem:[#allocation10 + $0x698] sm:$0xf] }
 0x21b   : > { %v5515_v30 = vld [vmem:[#allocation10 + $0x6b4] sm:$0xf0] }
 0x21c   : > { %3156 = vmatpush.bf16.msra.mxu0 %v4283_v49  ;;  %3170 = vmatpush.bf16.msra.mxu1 %v4539_v52  ;;  %v4155_v49 = vor.u32 %v5306_v36, %v4154_v31  ;;  %v4411_v52 = vor.u32 %v5370_v39, %v4410_v38  ;;  %v4252_v36 = vld [vmem:[#allocation10 + $0xf0] sm:$0xf0]  ;;  %v4995_v40 = vor.u32 %v5515_v30, %v4994_v29  ;;  %v5363_v26 = vld [vmem:[#allocation10 + $0x1f4] sm:$0xf0] }
 0x21d   : > { %v5390_v38 = vld [vmem:[#allocation10 + $0x2d4] sm:$0xf] }
 0x21e   : > { %3308 = vmatpush.bf16.msra.mxu3 %v5123_v47  ;;  %3295 = vmatpush.bf16.msra.mxu2 %v4835_v48  ;;  %v4508_v39 = vld [vmem:[#allocation10 + $0x2f0] sm:$0xf0]  ;;  %v4255_v47 = vor.u32 %v5326_v33, %v4252_v36  ;;  %v4354_v33 = vld [vmem:[#allocation10 + $0x198] sm:$0xf] }
 0x21f   : > { %v4511_v48 = vor.u32 %v5390_v38, %v4508_v39  ;;  %v5092_v38 = vld [vmem:[#allocation10 + $0x778] sm:$0xf0] }
 0x220   : > { %3157 = vmatpush.bf16.msra.mxu0 %v4251_v44  ;;  %3171 = vmatpush.bf16.msra.mxu1 %v4507_v6  ;;  %v5058_v44 = vld [vmem:[#allocation10 + $0x718] sm:$0xf]  ;;  %v5463_v39 = vld [vmem:[#allocation10 + $0x51c] sm:$0xf] }
 0x221   : > { %v5531_v6 = vld [vmem:[#allocation10 + $0x734] sm:$0xf0] }
 0x222   : > { %3309 = vmatpush.bf16.msra.mxu3 %v5091_v63  ;;  %3296 = vmatpush.bf16.msra.mxu2 %v4803_v5  ;;  %v5059_v15 = vor.u32 %v5531_v6, %v5058_v44  ;;  %v5499_v63 = vld [vmem:[#allocation10 + $0x634] sm:$0xf0]  ;;  %v4223_v5 = vor.u32 %v5318_v42, %v4220_v43  ;;  %v5374_v6 = vld [vmem:[#allocation10 + $0x254] sm:$0xf] }
 0x223   : > { %v4931_v10 = vor.u32 %v5499_v63, %v4930_v62  ;;  %v4610_v42 = vld [vmem:[#allocation10 + $0x398] sm:$0xf]  ;;  %v2966_v62 = vpop.f32.mrf.mxu2 }
 0x224   : > { %3158 = vmatpush.bf16.msra.mxu0 %v4219_v16  ;;  %3172 = vmatpush.bf16.msra.mxu1 %v4475_v17  ;;  %v4575_v16 = vor.u32 %v5406_v13, %v4572_v14  ;;  %v5334_v17 = vld [vmem:[#allocation10 + $0x114] sm:$0xf]  ;;  %v4871_v14 = vor.u32 %v5479_v11, %v4868_v12  ;;  %v5419_v43 = vld [vmem:[#allocation10 + $0x3b4] sm:$0xf0]  ;;  %v2980_v11 = vpop.f32.mrf.mxu3 }
 0x225   : > { %v4287_v31 = vor.u32 %v5334_v17, %v4284_v24  ;;  %v5366_v17 = vld [vmem:[#allocation10 + $0x214] sm:$0xf]  ;;  %v5471_v24 = vld [vmem:[#allocation10 + $0x55c] sm:$0xf]  ;;  %v5339_v12 = vld [vmem:[#allocation10 + $0x134] sm:$0xf0] }
 0x226   : > { %3310 = vmatpush.bf16.msra.mxu3 %v5059_v15  ;;  %3297 = vmatpush.bf16.msra.mxu2 %v4771_v18  ;;  %v5302_v15 = vld [vmem:[#allocation10 + $0x14] sm:$0xf]  ;;  %v5543_v18 = vld [vmem:[#allocation10 + $0x79c] sm:$0xf]  ;;  %v4839_v30 = vor.u32 %v5471_v24, %v4836_v25 }
 0x227   : > { %v5127_v29 = vor.u32 %v5543_v18, %v5124_v19  ;;  %v5511_v19 = vld [vmem:[#allocation10 + $0x69c] sm:$0xf] }
 0x228   : > { %3159 = vmatpush.bf16.msra.mxu0 %v4187_v34  ;;  %3173 = vmatpush.bf16.msra.mxu1 %v4443_v35  ;;  %v4706_v34 = vld [vmem:[#allocation10 + $0x458] sm:$0xf]  ;;  %v5439_v24 = vld [vmem:[#allocation10 + $0x45c] sm:$0xf] }
 0x229   : > { %v5443_v35 = vld [vmem:[#allocation10 + $0x474] sm:$0xf0]  ;;  %v4708_v25 = vld [vmem:[#allocation10 + $0x478] sm:$0xf0] }
 0x22a   : > { %3311 = vmatpush.bf16.msra.mxu3 %v5027_v27  ;;  %3298 = vmatpush.bf16.msra.mxu2 %v4739_v28  ;;  %v4707_v41 = vor.u32 %v5443_v35, %v4706_v34  ;;  %v4642_v27 = vld [vmem:[#allocation10 + $0x3d8] sm:$0xf]  ;;  %v5535_v34 = vld [vmem:[#allocation10 + $0x75c] sm:$0xf]  ;;  %v4387_v35 = vor.u32 %v5363_v26, %v4386_v23 }
 0x22b   : > { %v5427_v28 = vld [vmem:[#allocation10 + $0x3f4] sm:$0xf0] }
 0x22c   : > { %3160 = vmatpush.bf16.msra.mxu0 %v4155_v49  ;;  %3174 = vmatpush.bf16.msra.mxu1 %v4411_v52  ;;  %v5382_v49 = vld [vmem:[#allocation10 + $0x294] sm:$0xf]  ;;  %v4674_v52 = vld [vmem:[#allocation10 + $0x418] sm:$0xf]  ;;  %v4643_v36 = vor.u32 %v5427_v28, %v4642_v27 }
 0x22d   : > { %v4479_v44 = vor.u32 %v5382_v49, %v4476_v54  ;;  %v5060_v49 = vld [vmem:[#allocation10 + $0x738] sm:$0xf0]  ;;  %v6037_v54 = vld [vmem:[#allocation11] sm:$0xff]  ;;  %v4258_v23 = vld [vmem:[#allocation10 + $0xd8] sm:$0xf] }
 0x22e   : > { %3312 = vmatpush.bf16.msra.mxu3 %v4995_v40  ;;  %3299 = vmatpush.bf16.msra.mxu2 %v4707_v41  ;;  %v4804_v40 = vld [vmem:[#allocation10 + $0x538] sm:$0xf0]  ;;  %v5355_v41 = vld [vmem:[#allocation10 + $0x1b4] sm:$0xf0]  ;;  %v1633_v63 = vperm.slane %v6037_v54, 0 }
 0x22f   : > { %3161 = vmatmul.bf16.vlgmr.msra.gmra.mxu0 %v6015_v50  ;;  %3175 = vmatmul.bf16.vlgmr.msra.gmra.mxu1 %v6017_v51  ;;  %v5331_v27 = vld [vmem:[#allocation10 + $0xf4] sm:$0xf0] }
 0x230   : > { %3209 = vmatpush.bf16.msrb.mxu0 %v4383_v55  ;;  %3223 = vmatpush.bf16.msrb.mxu1 %v4639_v56  ;;  %v4963_v55 = vor.u32 %v5507_v46, %v4962_v45  ;;  %v4675_v56 = vor.u32 %v5435_v53, %v4674_v52  ;;  %v5095_v45 = vor.u32 %v5535_v34, %v5092_v38  ;;  %v4514_v28 = vld [vmem:[#allocation10 + $0x2d8] sm:$0xf]  ;;  %v4964_v34 = vld [vmem:[#allocation10 + $0x678] sm:$0xf0] }
 0x231   : > { %v4807_v46 = vor.u32 %v5463_v39, %v4804_v40  ;;  %v4355_v52 = vor.u32 %v5355_v41, %v4354_v33  ;;  %v4611_v53 = vor.u32 %v5419_v43, %v4610_v42  ;;  %v5503_v33 = vld [vmem:[#allocation10 + $0x65c] sm:$0xf]  ;;  %v4226_v38 = vld [vmem:[#allocation10 + $0x98] sm:$0xf]  ;;  %v2968_v42 = vpop.f32.mrf.mxu2 }
 0x232   : > { %3313 = vmatpush.bf16.msra.mxu3 %v4963_v55  ;;  %3300 = vmatpush.bf16.msra.mxu2 %v4675_v56  ;;  %v5455_v55 = vld [vmem:[#allocation10 + $0x4dc] sm:$0xf]  ;;  %v5323_v43 = vld [vmem:[#allocation10 + $0xb4] sm:$0xf0] }
 0x233   : > { %v4772_v56 = vld [vmem:[#allocation10 + $0x4f8] sm:$0xf0] }
 0x234   : > { %3210 = vmatpush.bf16.msrb.mxu0 %v4351_v37  ;;  %3224 = vmatpush.bf16.msrb.mxu1 %v4607_v8  ;;  %v5551_v37 = vld [vmem:[#allocation10 + $0x7dc] sm:$0xf]  ;;  %v4775_v61 = vor.u32 %v5455_v55, %v4772_v56 }
 0x235   : > { %v5156_v8 = vld [vmem:[#allocation10 + $0x7f8] sm:$0xf0]  ;;  %3301 = vmatmul.bf16.vlgmr.msra.gmra.mxu2 %v5965_v4 }
 0x236   : > { %3349 = vmatpush.bf16.msrb.mxu2 %v4903_v59  ;;  %v5159_v13 = vor.u32 %v5551_v37, %v5156_v8  ;;  %3314 = vmatpush.bf16.msra.mxu3 %v4931_v10  ;;  %v5411_v59 = vld [vmem:[#allocation10 + $0x374] sm:$0xf0]  ;;  %v4740_v10 = vld [vmem:[#allocation10 + $0x4b8] sm:$0xf0] }
 0x237   : > { %v4579_v37 = vor.u32 %v5411_v59, %v4578_v58  ;;  %v4290_v8 = vld [vmem:[#allocation10 + $0x118] sm:$0xf]  ;;  %v5431_v39 = vld [vmem:[#allocation10 + $0x41c] sm:$0xf]  ;;  %v4227_v58 = vor.u32 %v5323_v43, %v4226_v38 }
 0x238   : > { %3211 = vmatpush.bf16.msrb.mxu0 %v4319_v21  ;;  %3225 = vmatpush.bf16.msrb.mxu1 %v4575_v16  ;;  %v4447_v21 = vor.u32 %v5374_v6, %v4444_v9  ;;  %v4156_v16 = vld [vmem:[#allocation10 + $0x30] sm:$0xf0]  ;;  %v5447_v9 = vld [vmem:[#allocation10 + $0x49c] sm:$0xf] }
 0x239   : > { %3315 = vmatmul.bf16.vlgmr.msra.gmra.mxu3 %v5967_v7  ;;  %v4743_v18 = vor.u32 %v5447_v9, %v4740_v10  ;;  %v4676_v40 = vld [vmem:[#allocation10 + $0x438] sm:$0xf0]  ;;  %v1634_v10 = vperm.slane %v6037_v54, 1 }
 0x23a   : > { %3363 = vmatpush.bf16.msrb.mxu3 %v5159_v13  ;;  %3350 = vmatpush.bf16.msrb.mxu2 %v4871_v14  ;;  %v4546_v13 = vld [vmem:[#allocation10 + $0x318] sm:$0xf]  ;;  %v4932_v55 = vld [vmem:[#allocation10 + $0x638] sm:$0xf0] }
 0x23b   : > { %v5403_v14 = vld [vmem:[#allocation10 + $0x334] sm:$0xf0]  ;;  %v4324_v38 = vld [vmem:[#allocation10 + $0x178] sm:$0xf0] }
 0x23c   : > { %3212 = vmatpush.bf16.msrb.mxu0 %v4287_v31  ;;  %3226 = vmatpush.bf16.msrb.mxu1 %v4543_v32  ;;  %v4159_v31 = vor.u32 %v5302_v15, %v4156_v16  ;;  %v4415_v32 = vor.u32 %v5366_v17, %v4412_v22  ;;  %v4291_v17 = vor.u32 %v5339_v12, %v4290_v8  ;;  %v5307_v12 = vld [vmem:[#allocation10 + $0x34] sm:$0xf0] }
 0x23d   : > { %v4547_v22 = vor.u32 %v5403_v14, %v4546_v13  ;;  %v4418_v14 = vld [vmem:[#allocation10 + $0x218] sm:$0xf] }
 0x23e   : > { %3364 = vmatpush.bf16.msrb.mxu3 %v5127_v29  ;;  %3351 = vmatpush.bf16.msrb.mxu2 %v4839_v30  ;;  %v5395_v29 = vld [vmem:[#allocation10 + $0x2f4] sm:$0xf0] }
 0x240   : > { %3213 = vmatpush.bf16.msrb.mxu0 %v4255_v47  ;;  %3227 = vmatpush.bf16.msrb.mxu1 %v4511_v48  ;;  %v4322_v47 = vld [vmem:[#allocation10 + $0x158] sm:$0xf]  ;;  %v5527_v48 = vld [vmem:[#allocation10 + $0x71c] sm:$0xf] }
 0x241   : > { %v5063_v60 = vor.u32 %v5527_v48, %v5060_v49  ;;  %v4323_v6 = vor.u32 %v5347_v57, %v4322_v47  ;;  %v4967_v47 = vor.u32 %v5503_v33, %v4964_v34  ;;  %v4679_v48 = vor.u32 %v5431_v39, %v4676_v40  ;;  %v5407_v39 = vld [vmem:[#allocation10 + $0x35c] sm:$0xf] }
 0x242   : > { %3365 = vmatpush.bf16.msrb.mxu3 %v5095_v45  ;;  %3352 = vmatpush.bf16.msrb.mxu2 %v4807_v46  ;;  %v4482_v45 = vld [vmem:[#allocation10 + $0x298] sm:$0xf]  ;;  %v4580_v40 = vld [vmem:[#allocation10 + $0x378] sm:$0xf0] }
 0x243   : > { %v5387_v46 = vld [vmem:[#allocation10 + $0x2b4] sm:$0xf0] }
 0x244   : > { %3214 = vmatpush.bf16.msrb.mxu0 %v4223_v5  ;;  %3228 = vmatpush.bf16.msrb.mxu1 %v4479_v44  ;;  %v5519_v5 = vld [vmem:[#allocation10 + $0x6dc] sm:$0xf]  ;;  %v4483_v59 = vor.u32 %v5387_v46, %v4482_v45 }
 0x245   : > { %v5028_v44 = vld [vmem:[#allocation10 + $0x6f8] sm:$0xf0] }
 0x246   : > { %3366 = vmatpush.bf16.msrb.mxu3 %v5063_v60  ;;  %3353 = vmatpush.bf16.msrb.mxu2 %v4775_v61  ;;  %v5031_v15 = vor.u32 %v5519_v5, %v5028_v44  ;;  %v4194_v60 = vld [vmem:[#allocation10 + $0x58] sm:$0xf] }
 0x247   : > { %v4450_v5 = vld [vmem:[#allocation10 + $0x258] sm:$0xf] }
 0x248   : > { %3215 = vmatpush.bf16.msrb.mxu0 %v4191_v20  ;;  %3229 = vmatpush.bf16.msrb.mxu1 %v4447_v21  ;;  %v4996_v20 = vld [vmem:[#allocation10 + $0x6b8] sm:$0xf0]  ;;  %v5379_v44 = vld [vmem:[#allocation10 + $0x274] sm:$0xf0] }
 0x249   : > { %v4999_v30 = vor.u32 %v5511_v19, %v4996_v20  ;;  %v4451_v9 = vor.u32 %v5379_v44, %v4450_v5  ;;  %v4388_v19 = vld [vmem:[#allocation10 + $0x1f8] sm:$0xf0] }
 0x24a   : > { %3367 = vmatpush.bf16.msrb.mxu3 %v5031_v15  ;;  %3354 = vmatpush.bf16.msrb.mxu2 %v4743_v18  ;;  %v5371_v15 = vld [vmem:[#allocation10 + $0x234] sm:$0xf0]  ;;  %v3022_v18 = vpop.f32.mrf.mxu2  ;;  %v5423_v20 = vld [vmem:[#allocation10 + $0x3dc] sm:$0xf] }
 0x24b   : > { %v4260_v5 = vld [vmem:[#allocation10 + $0xf8] sm:$0xf0] }
 0x24c   : > { %3216 = vmatpush.bf16.msrb.mxu0 %v4159_v31  ;;  %3230 = vmatpush.bf16.msrb.mxu1 %v4415_v32  ;;  %v2938_v21 = vpop.f32.mrf.mxu0  ;;  %v2952_v16 = vpop.f32.mrf.mxu1  ;;  %v4711_v31 = vor.u32 %v5439_v24, %v4708_v25  ;;  %v4419_v25 = vor.u32 %v5371_v15, %v4418_v14  ;;  %v5391_v44 = vld [vmem:[#allocation10 + $0x2dc] sm:$0xf] }
 0x24d   : > { %v2939_v26 = vadd.f32 %v2938_v21, %v1633_v63  ;;  %v4644_v21 = vld [vmem:[#allocation10 + $0x3f8] sm:$0xf0] }
 0x24e   : > { %3368 = vmatpush.bf16.msrb.mxu3 %v4999_v30  ;;  %3355 = vmatpush.bf16.msrb.mxu2 %v4711_v31  ;;  %v4356_v30 = vld [vmem:[#allocation10 + $0x1b8] sm:$0xf0] }
 0x24f   : > { %3217 = vmatmul.bf16.vlgmr.msrb.gmra.mxu0 %v6015_v50  ;;  %3231 = vmatmul.bf16.vlgmr.msrb.gmra.mxu1 %v6017_v51  ;;  %v2953_v32 = vadd.f32 %v2952_v16, %v2939_v26  ;;  %v4612_v31 = vld [vmem:[#allocation10 + $0x3b8] sm:$0xf0] }
 0x250   : > { %3265 = vmatpush.bf16.msra.mxu0 %v4387_v35  ;;  %3279 = vmatpush.bf16.msra.mxu1 %v4643_v36  ;;  %v4259_v35 = vor.u32 %v5331_v27, %v4258_v23  ;;  %v4515_v36 = vor.u32 %v5395_v29, %v4514_v28  ;;  %v4647_v28 = vor.u32 %v5423_v20, %v4644_v21  ;;  %v5351_v29 = vld [vmem:[#allocation10 + $0x19c] sm:$0xf] }
 0x251   : > { %v2967_v41 = vadd.f32 %v2966_v62, %v2953_v32  ;;  %v5315_v62 = vld [vmem:[#allocation10 + $0x74] sm:$0xf0]  ;;  %v4359_v34 = vor.u32 %v5351_v29, %v4356_v30  ;;  %v4228_v15 = vld [vmem:[#allocation10 + $0xb8] sm:$0xf0] }
 0x252   : > { %3369 = vmatpush.bf16.msrb.mxu3 %v4967_v47  ;;  %3356 = vmatpush.bf16.msrb.mxu2 %v4679_v48  ;;  %v4195_v8 = vor.u32 %v5315_v62, %v4194_v60  ;;  %v4583_v47 = vor.u32 %v5407_v39, %v4580_v40  ;;  %v5335_v48 = vld [vmem:[#allocation10 + $0x11c] sm:$0xf] }
 0x253   : > { %v6044_v49 = vadd.f32 %v2980_v11, %v2967_v41  ;;  %v4162_v11 = vld [vmem:[#allocation10 + $0x18] sm:$0xf]  ;;  %v5327_v62 = vld [vmem:[#allocation10 + $0xdc] sm:$0xf] }
 0x254   : > { %3266 = vmatpush.bf16.msra.mxu0 %v4355_v52  ;;  %3280 = vmatpush.bf16.msra.mxu1 %v4611_v53  ;;  %v2982_v52 = vpop.f32.mrf.mxu3  ;;  %v5495_v53 = vld [vmem:[#allocation10 + $0x61c] sm:$0xf]  ;;  %v2940_v56 = vpop.f32.mrf.mxu0  ;;  %v4163_v24 = vor.u32 %v5307_v12, %v4162_v11 }
 0x255   : > { %v2954_v57 = vpop.f32.mrf.mxu1  ;;  %v2941_v61 = vadd.f32 %v2940_v56, %v1633_v63  ;;  %v5359_v63 = vld [vmem:[#allocation10 + $0x1dc] sm:$0xf]  ;;  %3357 = vmatmul.bf16.vlgmr.msrb.gmra.mxu2 %v5965_v4 }
 0x256   : > { %v4391_v27 = vor.u32 %v5359_v63, %v4388_v19  ;;  %v5415_v4 = vld [vmem:[#allocation10 + $0x39c] sm:$0xf] }
 0x257   : > { %v4548_v56 = vld [vmem:[#allocation10 + $0x338] sm:$0xf0] }
 0x258   : > { %3267 = vmatpush.bf16.msra.mxu0 %v4323_v6  ;;  %3281 = vmatpush.bf16.msra.mxu1 %v4579_v37  ;;  %v4935_v6 = vor.u32 %v5495_v53, %v4932_v55  ;;  %v2955_v37 = vadd.f32 %v2954_v57, %v2941_v61  ;;  %v4292_v53 = vld [vmem:[#allocation10 + $0x138] sm:$0xf0] }
 0x259   : > { %v5399_v55 = vld [vmem:[#allocation10 + $0x31c] sm:$0xf]  ;;  %v4295_v60 = vor.u32 %v5335_v48, %v4292_v53 }
 0x25a   : > { %v2969_v13 = vadd.f32 %v2968_v42, %v2955_v37  ;;  %3370 = vmatpush.bf16.msrb.mxu3 %v4935_v6  ;;  %v4551_v61 = vor.u32 %v5399_v55, %v4548_v56  ;;  %v4516_v6 = vld [vmem:[#allocation10 + $0x2f8] sm:$0xf0] }
 0x25b   : > { %v4519_v11 = vor.u32 %v5391_v44, %v4516_v6  ;;  %v5319_v12 = vld [vmem:[#allocation10 + $0x9c] sm:$0xf] }
 0x25c   : > { %3268 = vmatpush.bf16.msra.mxu0 %v4291_v17  ;;  %3282 = vmatpush.bf16.msra.mxu1 %v4547_v22  ;;  %v6050_v16 = vadd.f32 %v2982_v52, %v2969_v13  ;;  %v3036_v17 = vpop.f32.mrf.mxu3  ;;  %v2994_v22 = vpop.f32.mrf.mxu0  ;;  %v4484_v63 = vld [vmem:[#allocation10 + $0x2b8] sm:$0xf0] }
 0x25d   : > { %v3008_v23 = vpop.f32.mrf.mxu1  ;;  %v2995_v26 = vadd.f32 %v2994_v22, %v1634_v10  ;;  %3371 = vmatmul.bf16.vlgmr.msrb.gmra.mxu3 %v5967_v7  ;;  %v3024_v7 = vpop.f32.mrf.mxu2  ;;  %v5303_v30 = vld [vmem:[#allocation10 + $0x1c] sm:$0xf] }
 0x25f   : > { %v3009_v32 = vadd.f32 %v3008_v23, %v2995_v26  ;;  %v5311_v23 = vld [vmem:[#allocation10 + $0x5c] sm:$0xf] }
 0x260   : > { %3269 = vmatpush.bf16.msra.mxu0 %v4259_v35  ;;  %3283 = vmatpush.bf16.msra.mxu1 %v4515_v36  ;;  %v4615_v35 = vor.u32 %v5415_v4, %v4612_v31  ;;  %v5343_v36 = vld [vmem:[#allocation10 + $0x15c] sm:$0xf] }
 0x261   : > { %v3023_v33 = vadd.f32 %v3022_v18, %v3009_v32  ;;  %v4327_v46 = vor.u32 %v5343_v36, %v4324_v38  ;;  %v5383_v18 = vld [vmem:[#allocation10 + $0x29c] sm:$0xf] }
 0x262   : > { %v4487_v22 = vor.u32 %v5383_v18, %v4484_v63  ;;  %v4452_v26 = vld [vmem:[#allocation10 + $0x278] sm:$0xf0] }
 0x263   : > { %v6053_v41 = vadd.f32 %v3036_v17, %v3023_v33  ;;  %v4231_v17 = vor.u32 %v5319_v12, %v4228_v15  ;;  %v4164_v4 = vld [vmem:[#allocation10 + $0x38] sm:$0xf0] }
 0x264   : > { %3270 = vmatpush.bf16.msra.mxu0 %v4227_v58  ;;  %3284 = vmatpush.bf16.msra.mxu1 %v4483_v59  ;;  %v2996_v42 = vpop.f32.mrf.mxu0  ;;  %v3038_v52 = vpop.f32.mrf.mxu3  ;;  %v1635_v59 = vperm.slane %v6037_v54, 2  ;;  %v5367_v31 = vld [vmem:[#allocation10 + $0x21c] sm:$0xf]  ;;  %v4167_v33 = vor.u32 %v5303_v30, %v4164_v4 }
 0x265   : > { %v3010_v43 = vpop.f32.mrf.mxu1  ;;  %v2997_v45 = vadd.f32 %v2996_v42, %v1634_v10  ;;  %v4263_v10 = vor.u32 %v5327_v62, %v4260_v5  ;;  %v3078_v14 = vpop.f32.mrf.mxu2  ;;  %v4420_v32 = vld [vmem:[#allocation10 + $0x238] sm:$0xf0] }
 0x267   : > { %v3011_v57 = vadd.f32 %v3010_v43, %v2997_v45 }
 0x268   : > { %3271 = vmatpush.bf16.msra.mxu0 %v4195_v8  ;;  %3285 = vmatpush.bf16.msra.mxu1 %v4451_v9 }
 0x269   : > { %v3025_v58 = vadd.f32 %v3024_v7, %v3011_v57 }
 0x26b   : > { %v6058_v37 = vadd.f32 %v3038_v52, %v3025_v58  ;;  %v5160_v52 = vmul.f32 -1.442695, %v6044_v49  ;;  %v5162_v58 = vmul.f32 -1.442695, %v6050_v16 }
 0x26c   : > { %3272 = vmatpush.bf16.msra.mxu0 %v4163_v24  ;;  %3286 = vmatpush.bf16.msra.mxu1 %v4419_v25  ;;  %v3050_v8 = vpop.f32.mrf.mxu0  ;;  %v3092_v20 = vpop.f32.mrf.mxu3  ;;  %v4196_v24 = vld [vmem:[#allocation10 + $0x78] sm:$0xf0] }
 0x26d   : > { %v3051_v9 = vadd.f32 %v3050_v8, %v1635_v59  ;;  %v3064_v13 = vpop.f32.mrf.mxu1  ;;  %v5375_v25 = vld [vmem:[#allocation10 + $0x25c] sm:$0xf]  ;;  %5609 = vpow2.f32 %v5160_v52 }
 0x26e   : > { %v4455_v29 = vor.u32 %v5375_v25, %v4452_v26  ;;  %5611 = vpow2.f32 %v5162_v58 }
 0x26f   : > { %3273 = vmatmul.bf16.vlgmr.msra.gmra.mxu0 %v6015_v50  ;;  %3287 = vmatmul.bf16.vlgmr.msra.gmra.mxu1 %v6017_v51  ;;  %v3065_v19 = vadd.f32 %v3064_v13, %v3051_v9 }
 0x270   : > { %3321 = vmatpush.bf16.msrb.mxu0 %v4391_v27  ;;  %3335 = vmatpush.bf16.msrb.mxu1 %v4647_v28  ;;  %v4199_v28 = vor.u32 %v5311_v23, %v4196_v24  ;;  %v5161_v23 = vmul.f32 -1.442695, %v6053_v41 }
 0x271   : > { %v3079_v21 = vadd.f32 %v3078_v14, %v3065_v19 }
 0x273   : > { %v3093_v27 = vadd.f32 %v3092_v20, %v3079_v21 }
 0x274   : > { %3322 = vmatpush.bf16.msrb.mxu0 %v4359_v34  ;;  %3336 = vmatpush.bf16.msrb.mxu1 %v4615_v35  ;;  %v4423_v34 = vor.u32 %v5367_v31, %v4420_v32  ;;  %v3080_v35 = vpop.f32.mrf.mxu2  ;;  %v3052_v36 = vpop.f32.mrf.mxu0  ;;  %v1637_v32 = vperm.slane %v6037_v54, 4 }
 0x275   : > { %v3066_v38 = vpop.f32.mrf.mxu1  ;;  %v3094_v39 = vpop.f32.mrf.mxu3  ;;  %v3053_v53 = vadd.f32 %v3052_v36, %v1635_v59 }
 0x277   : > { %v3067_v56 = vadd.f32 %v3066_v38, %v3053_v53 }
 0x278   : > { %3323 = vmatpush.bf16.msrb.mxu0 %v4327_v46  ;;  %3337 = vmatpush.bf16.msrb.mxu1 %v4583_v47 }
 0x279   : > { %v3081_v62 = vadd.f32 %v3080_v35, %v3067_v56 }
 0x27b   : > { %v3095_v49 = vadd.f32 %v3094_v39, %v3081_v62 }
 0x27c   : > { %3324 = vmatpush.bf16.msrb.mxu0 %v4295_v60  ;;  %3338 = vmatpush.bf16.msrb.mxu1 %v4551_v61  ;;  %v3134_v40 = vpop.f32.mrf.mxu2  ;;  %v5610_v60 = vpop.eup %5609  ;;  %v5164_v61 = vmul.f32 -1.442695, %v3093_v27 }
 0x27d   : > { %v3148_v43 = vpop.f32.mrf.mxu3  ;;  %v6074_v5 = vadd.f32 1.0, %v5610_v60  ;;  %v5166_v9 = vmul.f32 -1.442695, %v3095_v49  ;;  %v5612_v16 = vpop.eup %5611 }
 0x27e   : > { %5613 = vpow2.f32 %v5164_v61  ;;  %v6088_v13 = vadd.f32 1.0, %v5612_v16 }
 0x27f   : > { %5615 = vrcp.f32 %v6074_v5  ;;  %vm3398_vm2 = vweird.f32 %v6074_v5 }
 0x280   : > { %3325 = vmatpush.bf16.msrb.mxu0 %v4263_v10  ;;  %3339 = vmatpush.bf16.msrb.mxu1 %v4519_v11  ;;  %v1636_v10 = vperm.slane %v6037_v54, 3  ;;  %5617 = vpow2.f32 %v5166_v9  ;;  %vm3428_vm5 = vweird.f32 %v6088_v13 }
 0x281   : > { %5619 = vrcp.f32 %v6088_v13 }
 0x284   : > { %3326 = vmatpush.bf16.msrb.mxu0 %v4231_v17  ;;  %3340 = vmatpush.bf16.msrb.mxu1 %v4487_v22  ;;  %v6062_v45 = vpop.f32.mrf.mxu2  ;;  %v5614_v11 = vpop.eup %5613 }
 0x285   : > { %v6064_v48 = vpop.f32.mrf.mxu3  ;;  %v6094_v18 = vpop.eup %5615  ;;  %v6096_v63 = vadd.f32 1.0, %v5614_v11 }
 0x286   : > { %v3394_v21 = vmul.f32 %v6094_v18, %v6074_v5  ;;  %v5618_v22 = vpop.eup %5617  ;;  %vm3399_vm1 = vweird.f32 %v6094_v18 }
 0x287   : > { %5621 = vrcp.f32 %v6096_v63  ;;  %v6105_v25 = vadd.f32 1.0, %v5618_v22  ;;  %vm6136_vm3 = vmor %vm3398_vm2, %vm3399_vm1  ;;  %vm3474_vm8 = vweird.f32 %v6096_v63 }
 0x288   : > { %3327 = vmatpush.bf16.msrb.mxu0 %v4199_v28  ;;  %3341 = vmatpush.bf16.msrb.mxu1 %v4455_v29  ;;  %v3395_v24 = vsub.f32 1.0, %v3394_v21  ;;  %v6109_v29 = vpop.eup %5619  ;;  %5623 = vpow2.f32 %v5161_v23 }
 0x289   : > { %5625 = vrcp.f32 %v6105_v25  ;;  %v3424_v36 = vmul.f32 %v6109_v29, %v6088_v13  ;;  %vm3429_vm6 = vweird.f32 %v6109_v29  ;;  %vm3504_vm14 = vweird.f32 %v6105_v25 }
 0x28a   : > { %v3396_v41 = vmul.f32 %v6094_v18, %v3395_v24  ;;  %vm6168_vm9 = vmor %vm3428_vm5, %vm3429_vm6 }
 0x28b   : > { %v3425_v53 = vsub.f32 1.0, %v3424_v36 }
 0x28c   : > { %3328 = vmatpush.bf16.msrb.mxu0 %v4167_v33  ;;  %3342 = vmatpush.bf16.msrb.mxu1 %v4423_v34  ;;  %v3106_v7 = vpop.f32.mrf.mxu0  ;;  %v3120_v42 = vpop.f32.mrf.mxu1 }
 0x28d   : > { %v6071_v57 = vpop.f32.mrf.mxu3  ;;  %v3107_v19 = vadd.f32 %v3106_v7, %v1636_v10  ;;  %v6115_v31 = vpop.eup %5621  ;;  %v5163_v7 = vmul.f32 -1.442695, %v6058_v37 }
 0x28e   : > { %v3470_v38 = vmul.f32 %v6115_v31, %v6096_v63  ;;  %vm3475_vm7 = vweird.f32 %v6115_v31 }
 0x28f   : > { %3329 = vmatmul.bf16.vlgmr.msrb.gmra.mxu0 %v6015_v50  ;;  %3343 = vmatmul.bf16.vlgmr.msrb.gmra.mxu1 %v6017_v51  ;;  %v6067_v50 = vpop.f32.mrf.mxu2  ;;  %v3121_v17 = vadd.f32 %v3120_v42, %v3107_v19  ;;  %v3397_v42 = vadd.f32 %v6094_v18, %v3396_v41  ;;  %5627 = vpow2.f32 %v5163_v7  ;;  %vm6178_vm10 = vmor %vm3474_vm8, %vm3475_vm7 }
 0x290   : > { %v3471_v56 = vsub.f32 1.0, %v3470_v38 }
 0x291   : > { %v3135_v26 = vadd.f32 %v3134_v40, %v3121_v17  ;;  %v1639_v40 = vperm.slane %v6037_v54, 6 }
 0x292   : > { %v3472_v21 = vmul.f32 %v6115_v31, %v3471_v56 }
 0x293   : > { %v3149_v34 = vadd.f32 %v3148_v43, %v3135_v26 }
 0x294   : > { %v3108_v46 = vpop.f32.mrf.mxu0  ;;  %v3122_v47 = vpop.f32.mrf.mxu1 }
 0x295   : > { %v6082_v8 = vpop.f32.mrf.mxu3  ;;  %v3109_v27 = vadd.f32 %v3108_v46, %v1636_v10  ;;  %v5624_v46 = vpop.eup %5623  ;;  %v5165_v52 = vmul.f32 -1.442695, %v3149_v34  ;;  %v3401_v10 = vsel %vm6136_vm3, %v6094_v18, %v3397_v42  ;;  %v3473_v34 = vadd.f32 %v6115_v31, %v3472_v21 }
 0x296   : > { %v6133_v61 = vpop.eup %5625  ;;  %v6141_v9 = vadd.f32 1.0, %v5624_v46  ;;  %v3478_v42 = vand.u32 2147483647, %v6096_v63 }
 0x297   : > { %v6076_v44 = vpop.f32.mrf.mxu2  ;;  %v3123_v35 = vadd.f32 %v3122_v47, %v3109_v27  ;;  %5629 = vpow2.f32 %v5165_v52  ;;  %v3500_v17 = vmul.f32 %v6133_v61, %v6105_v25  ;;  %v5628_v41 = vpop.eup %5627  ;;  %vm3505_vm13 = vweird.f32 %v6133_v61 }
 0x298   : > { %5631 = vrcp.f32 %v6141_v9  ;;  %vm3479_vm11 = vcmp.eq.f32.partialorder %v3478_v42, 8.507059e+37  ;;  %vm3506_vm15 = vmor %vm3504_vm14, %vm3505_vm13  ;;  %vm3413_vm2 = vweird.f32 %v6141_v9 }
 0x299   : > { %v3137_v43 = vadd.f32 %v6062_v45, %v3123_v35  ;;  %v3402_v45 = vand.u32 2147483647, %v6074_v5 }
 0x29b   : > { %v3151_v11 = vadd.f32 %v6064_v48, %v3137_v43  ;;  %vm3403_vm4 = vcmp.eq.f32.partialorder %v3402_v45, 8.507059e+37 }
 0x29d   : > { %v6098_v20 = vpop.f32.mrf.mxu3  ;;  %v5167_v48 = vmul.f32 -1.442695, %v3151_v11  ;;  %v5630_v35 = vpop.eup %5629 }
 0x29e   : > { %v6182_v56 = vpop.eup %5631 }
 0x29f   : > { %v6086_v12 = vpop.f32.mrf.mxu2  ;;  %5633 = vpow2.f32 %v5167_v48  ;;  %vm3414_vm1 = vweird.f32 %v6182_v56 }
 0x2a0   : > { %vm3415_vm3 = vmor %vm3413_vm2, %vm3414_vm1 }
 0x2a5   : > { %v6118_v33 = vpop.f32.mrf.mxu3 }
 0x2a7   : > { %v6107_v28 = vpop.f32.mrf.mxu2 }
 0x2ac   : > { %v3162_v51 = vpop.f32.mrf.mxu0  ;;  %v6069_v55 = vpop.f32.mrf.mxu1 }
 0x2ad   : > { %v3163_v39 = vadd.f32 %v3162_v51, %v1637_v32  ;;  %v3404_v51 = vand.u32 2147483648, %v6074_v5 }
 0x2af   : > { %v3177_v37 = vadd.f32 %v6069_v55, %v3163_v39  ;;  %v3426_v55 = vmul.f32 %v6109_v29, %v3425_v53  ;;  %v3405_v5 = vor.u32 1.1754944e-38, %v3404_v51 }
 0x2b1   : > { %v3191_v22 = vadd.f32 %v6067_v50, %v3177_v37  ;;  %v3406_v18 = vsel %vm3403_vm4, %v3405_v5, %v3401_v10  ;;  %v3427_v27 = vadd.f32 %v6109_v29, %v3426_v55  ;;  %v3480_v50 = vand.u32 2147483648, %v6096_v63 }
 0x2b2   : > { %v3510_v55 = vand.u32 2147483648, %v6105_v25  ;;  %v3508_v5 = vand.u32 2147483647, %v6105_v25  ;;  %v1638_v25 = vperm.slane %v6037_v54, 5 }
 0x2b3   : > { %v3205_v36 = vadd.f32 %v6071_v57, %v3191_v22  ;;  %v3432_v57 = vand.u32 2147483647, %v6088_v13  ;;  %v3431_v37 = vsel %vm6168_vm9, %v6109_v29, %v3427_v27  ;;  %v5634_v29 = vpop.eup %5633 }
 0x2b4   : > { %v6078_v59 = vpop.f32.mrf.mxu0  ;;  %v6080_v6 = vpop.f32.mrf.mxu1  ;;  %vm3509_vm0 = vcmp.eq.f32.partialorder %v3508_v5, 8.507059e+37 }
 0x2b5   : > { %v3165_v23 = vadd.f32 %v6078_v59, %v1637_v32  ;;  %v3501_v59 = vsub.f32 1.0, %v3500_v17  ;;  %vm3433_vm12 = vcmp.eq.f32.partialorder %v3432_v57, 8.507059e+37 }
 0x2b7   : > { %v3179_v38 = vadd.f32 %v6080_v6, %v3165_v23  ;;  %v3434_v6 = vand.u32 2147483648, %v6088_v13  ;;  %v3477_v13 = vsel %vm6178_vm10, %v6115_v31, %v3473_v34 }
 0x2b8   : > { %v3302_v47 = vpop.f32.mrf.mxu2 }
 0x2b9   : > { %v3193_v49 = vadd.f32 %v6076_v44, %v3179_v38  ;;  %v3409_v44 = vmul.f32 %v6182_v56, %v6141_v9 }
 0x2bb   : > { %v3207_v21 = vadd.f32 %v6082_v8, %v3193_v49  ;;  %v3410_v34 = vsub.f32 1.0, %v3409_v44  ;;  %v3511_v8 = vor.u32 1.1754944e-38, %v3510_v55 }
 0x2bc   : > { %v3316_v16 = vpop.f32.mrf.mxu3 }
 0x2c0   : > { %v3304_v52 = vpop.f32.mrf.mxu2 }
 0x2c4   : > { %v3318_v51 = vpop.f32.mrf.mxu3 }
 0x2cc   : > { %v6090_v14 = vpop.f32.mrf.mxu0  ;;  %v6092_v15 = vpop.f32.mrf.mxu1 }
 0x2cd   : > { %v3219_v38 = vadd.f32 %v6090_v14, %v1638_v25 }
 0x2d4   : > { %v6111_v30 = vpop.f32.mrf.mxu0  ;;  %v6113_v4 = vpop.f32.mrf.mxu1 }
 0x2ec   : > { %v3274_v58 = vpop.f32.mrf.mxu0  ;;  %v3288_v60 = vpop.f32.mrf.mxu1 }
 0x2ed   : > { %v3275_v62 = vadd.f32 %v3274_v58, %v1639_v40  ;;  %v3502_v58 = vmul.f32 %v6133_v61, %v3501_v59 }
 0x2ef   : > { %v3289_v19 = vadd.f32 %v3288_v60, %v3275_v62  ;;  %v6185_v60 = vadd.f32 1.0, %v5630_v35  ;;  %v3481_v62 = vor.u32 1.1754944e-38, %v3480_v50 }
 0x2f1   : > { %v3303_v24 = vadd.f32 %v3302_v47, %v3289_v19  ;;  %v6174_v47 = vadd.f32 1.0, %v5628_v41  ;;  %v3482_v10 = vsel %vm3479_vm11, %v3481_v62, %v3477_v13  ;;  %v3503_v19 = vadd.f32 %v6133_v61, %v3502_v58  ;;  %v3358_v13 = vpop.f32.mrf.mxu2 }
 0x2f2   : > { %v3541_v22 = vsub.f32 1.0, %v3482_v10  ;;  %vm3489_vm8 = vweird.f32 %v6185_v60 }
 0x2f3   : > { %v3317_v26 = vadd.f32 %v3316_v16, %v3303_v24  ;;  %v3435_v16 = vor.u32 1.1754944e-38, %v3434_v6  ;;  %v3507_v27 = vsel %vm3506_vm15, %v6133_v61, %v3503_v19  ;;  %vm3443_vm5 = vweird.f32 %v6174_v47 }
 0x2f4   : > { %v3276_v32 = vpop.f32.mrf.mxu0  ;;  %v3290_v46 = vpop.f32.mrf.mxu1 }
 0x2f5   : > { %v3529_v39 = vmul.f32 %v3406_v18, %v3317_v26  ;;  %v3277_v7 = vadd.f32 %v3276_v32, %v1639_v40  ;;  %v3436_v31 = vsel %vm3433_vm12, %v3435_v16, %v3431_v37  ;;  %v6204_v18 = vadd.f32 1.0, %v5634_v29 }
 0x2f6   : > { %v3549_v26 = vmul.f32 %v5861_v0, %v3482_v10  ;;  %v3512_v32 = vsel %vm3509_vm0, %v3511_v8, %v3507_v27  ;;  %v3221_v10 = vadd.f32 %v6111_v30, %v1638_v25  ;;  %v3447_v27 = vand.u32 2147483647, %v6174_v47 }
 0x2f7   : > { %v3533_v40 = vadd.f32 %v3529_v39, %v3205_v36  ;;  %v3291_v53 = vadd.f32 %v3290_v46, %v3277_v7  ;;  %v3411_v36 = vmul.f32 %v6182_v56, %v3410_v34  ;;  %v3543_v39 = vsub.f32 1.0, %v3512_v32 }
 0x2f8   : > { %v1640_v7 = vperm.slane %v6037_v54, 7  ;;  %v3419_v54 = vand.u32 2147483648, %v6141_v9  ;;  %vm3448_vm12 = vcmp.eq.f32.partialorder %v3447_v27, 8.507059e+37  ;;  %vm3519_vm14 = vweird.f32 %v6204_v18 }
 0x2f9   : > { %5635 = vtanh.f32 %v3533_v40  ;;  %v3305_v45 = vadd.f32 %v3304_v52, %v3291_v53  ;;  %v3412_v63 = vadd.f32 %v6182_v56, %v3411_v36  ;;  %v3233_v53 = vadd.f32 %v6092_v15, %v3219_v38  ;;  %v3372_v15 = vpop.f32.mrf.mxu3  ;;  %v3360_v8 = vpop.f32.mrf.mxu2 }
 0x2fa   : > { %5637 = vrcp.f32 %v6174_v47  ;;  %v3420_v19 = vor.u32 1.1754944e-38, %v3419_v54 }
 0x2fb   : > { %v3319_v11 = vadd.f32 %v3318_v51, %v3305_v45  ;;  %5639 = vrcp.f32 %v6185_v60  ;;  %v3417_v51 = vand.u32 2147483647, %v6141_v9  ;;  %v3247_v16 = vadd.f32 %v6086_v12, %v3233_v53 }
 0x2fd   : > { %v3531_v17 = vmul.f32 %v3436_v31, %v3319_v11  ;;  %vm3418_vm4 = vcmp.eq.f32.partialorder %v3417_v51, 8.507059e+37  ;;  %v3261_v30 = vadd.f32 %v6098_v20, %v3247_v16 }
 0x2ff   : > { %v5636_v23 = vpop.eup %5635  ;;  %v3535_v24 = vadd.f32 %v3531_v17, %v3207_v21  ;;  %v3235_v21 = vadd.f32 %v6113_v4, %v3221_v10 }
 0x300   : > { %v3545_v48 = vmul.f32 %v5636_v23, %v3541_v22  ;;  %v6208_v41 = vpop.eup %5637  ;;  %v3493_v22 = vand.u32 2147483647, %v6185_v60 }
 0x301   : > { %5641 = vtanh.f32 %v3535_v24  ;;  %v6210_v50 = vpop.eup %5639  ;;  %v3439_v35 = vmul.f32 %v6208_v41, %v6174_v47  ;;  %vm3444_vm6 = vweird.f32 %v6208_v41  ;;  %v3374_v36 = vpop.f32.mrf.mxu3 }
 0x302   : > { %v6213_v0 = vadd.f32 %v3549_v26, %v3545_v48   ;;  %5643 = vrcp.f32 %v6204_v18  ;;  %v3485_v61 = vmul.f32 %v6210_v50, %v6185_v60  ;;  %vm3490_vm7 = vweird.f32 %v6210_v50  ;;  %vm6253_vm9 = vmor %vm3443_vm5, %vm3444_vm6 }
 0x303   : > { %v3440_v46 = vsub.f32 1.0, %v3439_v35  ;;  %v3449_v48 = vand.u32 2147483648, %v6174_v47  ;;  %vm6258_vm10 = vmor %vm3489_vm8, %vm3490_vm7  ;;  %v3249_v35 = vadd.f32 %v6107_v28, %v3235_v21  ;;  %vm3494_vm11 = vcmp.eq.f32.partialorder %v3493_v22, 8.507059e+37 }
 0x304   : > { %v6314_v59 = vmov %v6213_v0  ;;  %v3551_v0 = vmul.f32 %v5853_v2, %v3512_v32  ;;  %v3486_v43 = vsub.f32 1.0, %v3485_v61  ;;  %v3523_v28 = vand.u32 2147483647, %v6204_v18 }
 0x305   : > { %v3441_v62 = vmul.f32 %v6208_v41, %v3440_v46  ;;  %v3450_v38 = vor.u32 1.1754944e-38, %v3449_v48  ;;  %3557 = vst [vmem:[#allocation13] sm:$0xff] (%p121_p0), %v6314_v59 }
 0x306   : > { %v3487_v49 = vmul.f32 %v6210_v50, %v3486_v43  ;;  %vm3524_vm0 = vcmp.eq.f32.partialorder %v3523_v28, 8.507059e+37 }
 0x307   : > { %v5642_v42 = vpop.eup %5641  ;;  %v3442_v29 = vadd.f32 %v6208_v41, %v3441_v62 }
 0x308   : > { %v3547_v52 = vmul.f32 %v5642_v42, %v3543_v39  ;;  %v6226_v40 = vpop.eup %5643  ;;  %v3488_v44 = vadd.f32 %v6210_v50, %v3487_v49  ;;  %v3525_v42 = vand.u32 2147483648, %v6204_v18 }
 0x309   : > { %v3515_v45 = vmul.f32 %v6226_v40, %v6204_v18  ;;  %v3446_v25 = vsel %vm6253_vm9, %v6208_v41, %v3442_v29  ;;  %vm3520_vm13 = vweird.f32 %v6226_v40  ;;  %v3263_v41 = vadd.f32 %v6118_v33, %v3249_v35 }
 0x30a   : > { %v6229_v2 = vadd.f32 %v3551_v0, %v3547_v52   ;;  %vm3521_vm15 = vmor %vm3519_vm14, %vm3520_vm13  ;;  %v3526_v53 = vor.u32 1.1754944e-38, %v3525_v42 }
 0x30b   : > { %v3516_v12 = vsub.f32 1.0, %v3515_v45 }
 0x30c   : > { %v3330_v57 = vpop.f32.mrf.mxu0  ;;  %v3344_v6 = vpop.f32.mrf.mxu1  ;;  %v6315_v14 = vmov %v6229_v2  ;;  %v3416_v2 = vsel %vm3415_vm3, %v6182_v56, %v3412_v63  ;;  %v3495_v56 = vand.u32 2147483648, %v6185_v60  ;;  %v3492_v60 = vsel %vm6258_vm10, %v6210_v50, %v3488_v44 }
 0x30d   : > { %v3331_v58 = vadd.f32 %v3330_v57, %v1640_v7  ;;  %v3421_v31 = vsel %vm3418_vm4, %v3420_v19, %v3416_v2  ;;  %v3517_v34 = vmul.f32 %v6226_v40, %v3516_v12  ;;  %v6321_v2 = vmov %v6315_v14  ;;  %3559 = vst [vmem:[#allocation13 + $0x10] sm:$0xff] (%p121_p0), %v6315_v14 }
 0x30e   : > { %v3496_v32 = vor.u32 1.1754944e-38, %v3495_v56 }
 0x30f   : > { %v3345_v37 = vadd.f32 %v3344_v6, %v3331_v58  ;;  %v3518_v50 = vadd.f32 %v6226_v40, %v3517_v34 }
 0x310   : > { %v3497_v47 = vsel %vm3494_vm11, %v3496_v32, %v3492_v60 }
 0x311   : > { %v3359_v11 = vadd.f32 %v3358_v13, %v3345_v37  ;;  %v3542_v52 = vsub.f32 1.0, %v3497_v47  ;;  %v3550_v57 = vmul.f32 %v5857_v1, %v3497_v47  ;;  %v3522_v6 = vsel %vm3521_vm15, %v6226_v40, %v3518_v50 }
 0x312   : > { %v3527_v54 = vsel %vm3524_vm0, %v3526_v53, %v3522_v6 }
 0x313   : > { %v3373_v9 = vadd.f32 %v3372_v15, %v3359_v11  ;;  %v3544_v33 = vsub.f32 1.0, %v3527_v54  ;;  %v3552_v51 = vmul.f32 %v5849_v3, %v3527_v54 }
 0x314   : > { %v3332_v55 = vpop.f32.mrf.mxu0  ;;  %v3346_v23 = vpop.f32.mrf.mxu1 }
 0x315   : > { %v3530_v17 = vmul.f32 %v3421_v31, %v3373_v9  ;;  %v3333_v5 = vadd.f32 %v3332_v55, %v1640_v7  ;;  %v3451_v7 = vsel %vm3448_vm12, %v3450_v38, %v3446_v25 }
 0x317   : > { %v3534_v20 = vadd.f32 %v3530_v17, %v3261_v30  ;;  %v3347_v4 = vadd.f32 %v3346_v23, %v3333_v5 }
 0x319   : > { %5645 = vtanh.f32 %v3534_v20  ;;  %v3361_v61 = vadd.f32 %v3360_v8, %v3347_v4 }
 0x31b   : > { %v3375_v39 = vadd.f32 %v3374_v36, %v3361_v61 }
 0x31d   : > { %v3532_v46 = vmul.f32 %v3451_v7, %v3375_v39 }
 0x31f   : > { %v5646_v0 = vpop.eup %5645  ;;  %v3536_v43 = vadd.f32 %v3532_v46, %v3263_v41 }
 0x320   : > { %v3546_v63 = vmul.f32 %v5646_v0, %v3542_v52  ;;  %v6323_v0 = vmov %v6314_v59 }
 0x321   : > { %5647 = vtanh.f32 %v3536_v43 }
 0x322   : > { %v3554_v58 = vadd.f32 %v3550_v57, %v3546_v63  }
 0x324   : > { %v6322_v1 = vmov %v3554_v58  ;;  %3558 = vst [vmem:[#allocation13 + $0x8] sm:$0xff] (%p121_p0), %v3554_v58 }
 0x327   : > { %v5648_v13 = vpop.eup %5647 }
 0x328   : > { %v3548_v37 = vmul.f32 %v5648_v13, %v3544_v33  ;;  %123 = sbr.rel (!%p121_p0) target bundleno = 31 (0x1f), region = 78 }
 0x32a   : > { %v3556_v18 = vadd.f32 %v3552_v51, %v3548_v37  }
 0x32c   : > { %v6320_v3 = vmov %v3556_v18  ;;  %3560 = vst [vmem:[#allocation13 + $0x18] sm:$0xff] (%p121_p0), %v3556_v18 }
 0x32d   :  { %3573 = dma.vmem_to_hbm [thread:$0]  %s3566_s8, 512, %s3568_s30, [#allocation4], %s5872_s15, %s5872_s15, %s5873_s16  }
 0x32e   :  { %5845 = dma.done.wait [#allocation4], 512  }
 0x32f   :  { %5846 = vsyncadd [#allocation4], 4294966784 }
 0x330   :  { %3578 = vsyncpa [#allocation3], 1 }
 0x331   :  { %3579 = vsyncpa [#allocation6], 1 }
 0x332   :  { %3580 = vsyncpa [#allocation9], 1 }
 0x333   :  { %3581 = vsyncpa [#allocation12], 1 }
 0x334   :  { %3582 = vsyncpa [#allocation4], 1 }

</bundles_post_ra>
